<compile_context>
chip_gen: v5e
topology: v5e:2x2
jax: 0.10.0
libtpu: 0.0.40
codegen_flags: <defaults>
</compile_context>

<pallas_src>
import math

import jax
import jax.numpy as jnp
import numpy as np
from jax.experimental import pallas as pl
from jax.experimental.pallas import tpu as pltpu

H = W = 7              # spatial size (see TODO above)
C = 16                 # channels (Cin == Cout == 16)
K = 7                  # conv kernel size
PAD = 3                # padding of conv2 / conv3
P = H * W              # 49 flattened spatial positions
KC = K * C             # 112: contraction length of one column-shift group
KKC = K * K * C        # 784: rows of a fully flattened conv weight
HALO = PAD * W + PAD   # 24: offset of the image inside the padded row space
CENTER = PAD * W + PAD # 24: flat index of the centre output position (row 3, col 3)
WIDE = K * C           # 112 lanes: 7 row-shifted copies of the 16 channels
BUF_ROWS = 104         # >= HALO + PAD*W + P = 94, rounded up to a multiple of 8

# Static bounds for the wide scratch buffer (VMEM accesses are not runtime checked).
assert HALO >= PAD * W and HALO >= PAD
assert BUF_ROWS >= HALO + PAD * W + P


# ----------------------------- fused Pallas kernel -----------------------------

def _fused_forward_kernel(x1f_ref, x1_ref, x2_ref,
                          w1t_ref, w1k_ref, w2k_ref, w3k_ref,
                          b1_ref, b2_ref, b3_ref,
                          o_ref, wide_ref):
    f32 = jnp.float32

    # Zero the wide scratch once.  Every set_image() afterwards overwrites exactly
    # the same (image) rows of every lane block, so the halo rows stay zero.
    wide_ref[...] = jnp.zeros((BUF_ROWS, WIDE), f32)

    # Hoisted column-validity masks (JAX does not CSE iota/broadcasts): one mask
    # per non-zero column shift, shared by all three pad-3 convs.
    col = jax.lax.broadcasted_iota(jnp.int32, (P, C), 0) % W
    masks = {sc: jnp.logical_and(col + sc >= 0, col + sc < W)
             for sc in range(-PAD, PAD + 1) if sc != 0}

    def set_image(img):
        """Load a (49,16) image into wide_ref: lane block k holds the image
        shifted by (k - PAD) rows of the padded row space, so the LHS of the
        column-shift-sc matmul is the single sublane slice wide_ref[HALO+sc:+49]."""
        for k in range(K):                                      # k == kh
            r0 = HALO - (k - PAD) * W
            wide_ref[pl.ds(r0, P), pl.ds(k * C, C)] = img

    def conv_same(wk_ref, b_ref):
        """7x7 stride-1 pad-3 conv of the image currently in wide_ref -> (49,16).
        One (49,112)@(112,16) MXU dot per column shift (7 dots, not 49)."""
        acc = None
        for sc in range(-PAD, PAD + 1):
            lhs = wide_ref[pl.ds(HALO + sc, P), :]              # (49, 112)
            wt = wk_ref[pl.ds((sc + PAD) * KC, KC), :]          # (112, 16)
            part = jnp.dot(lhs, wt, preferred_element_type=f32)
            if sc != 0:   # zero rows whose window crossed the left/right border
                part = jnp.where(masks[sc], part, 0.0)
            acc = part if acc is None else acc + part
        return acc + b_ref[...]

    def conv_valid_center(wk_ref, b_ref):
        """7x7 stride-1 pad-0 conv (7x7 image -> 1x1) of the image in wide_ref.
        Equals the pad-3 conv at the centre position p=CENTER, where no column
        mask is needed: 7 tiny (1,112)@(112,16) dots."""
        acc = None
        for sc in range(-PAD, PAD + 1):
            lhs = wide_ref[pl.ds(HALO + CENTER + sc, 1), :]     # (1, 112)
            wt = wk_ref[pl.ds((sc + PAD) * KC, KC), :]          # (112, 16)
            part = jnp.dot(lhs, wt, preferred_element_type=f32)
            acc = part if acc is None else acc + part
        return acc + b_ref[...]

    x1 = x1_ref[...]                             # (49, 16)
    x2 = x2_ref[...]                             # (49, 16)

    # v1 = conv1(x1): one (1,784)@(784,16) MXU dot on the pre-flattened input.
    v1 = jnp.dot(x1f_ref[...], w1t_ref[...], preferred_element_type=f32) + b1_ref[...]
    # NOTE: v2 = conv2(v1) in the original module is dead (never used) -> dropped.

    v4 = jnp.maximum(v1 + x1, 0.0)               # relu(v1 + x1), broadcast over rows
    set_image(v4)
    v5 = conv_same(w3k_ref, b3_ref)              # conv3(v4)
    set_image(v5)
    v6 = conv_same(w2k_ref, b2_ref)              # conv2(v5)
    set_image(v6)
    v7 = conv_same(w3k_ref, b3_ref)              # conv3(v6)

    v9 = x2 + (v5 + v7)                          # x2 + (v5 + v7)
    set_image(v9)
    v10 = conv_valid_center(w1k_ref, b1_ref)     # conv1(v9) -> (1, 16)

    o_ref[...] = v10.astype(o_ref.dtype)


# ----------------------------- wrappers -----------------------------

def _flatten_image(x_nchw):
    # NCHW -> NHWC -> (H*W, C)
    return jnp.transpose(x_nchw, (0, 2, 3, 1)).reshape(H * W, C)


def _tap_major_weight(w_oihw):
    # OIHW -> (KH, KW, Cin, Cout) -> (KH*KW*Cin, Cout); row = (kh*K + kw)*Cin + ci
    return jnp.transpose(w_oihw, (2, 3, 1, 0)).reshape(KKC, C)


def _kw_major_weight(w_oihw):
    # OIHW -> (KW, KH, Cin, Cout) -> (KW*KH*Cin, Cout); row = (kw*K + kh)*Cin + ci
    return jnp.transpose(w_oihw, (3, 2, 1, 0)).reshape(KKC, C)


def prepare_params(params):
    """One-time re-layout of PyTorch-layout conv params into the kernel layouts."""
    (w1, b1), (w2, b2), (w3, b3) = params
    return dict(
        w1_tap=_tap_major_weight(w1),   # for the single-dot valid conv on x1
        w1_kw=_kw_major_weight(w1),     # for the centre-row valid conv on v9
        w2_kw=_kw_major_weight(w2),
        w3_kw=_kw_major_weight(w3),
        b1=b1.reshape(1, C), b2=b2.reshape(1, C), b3=b3.reshape(1, C),
    )


def forward(fp, x1_nchw, x2_nchw):
    x1_img = _flatten_image(x1_nchw)             # (49, 16)
    x2_img = _flatten_image(x2_nchw)             # (49, 16)
    x1_flat = x1_img.reshape(1, KKC)             # (1, 784), free lane-dense reshape

    vmem = pltpu.MemorySpace.VMEM
    out2d = pl.pallas_call(
        _fused_forward_kernel,
        out_shape=jax.ShapeDtypeStruct((1, C), jnp.float32),
        in_specs=[pl.BlockSpec(memory_space=vmem)] * 10,
        out_specs=pl.BlockSpec(memory_space=vmem),
        scratch_shapes=[pltpu.VMEM((BUF_ROWS, WIDE), jnp.float32)],
    )(x1_flat, x1_img, x2_img,
      fp["w1_tap"], fp["w1_kw"], fp["w2_kw"], fp["w3_kw"],
      fp["b1"], fp["b2"], fp["b3"])

    return out2d.reshape(1, C, 1, 1)             # NCHW (1, 16, 1, 1)


# ----------------------------- pure-JAX reference -----------------------------

def _ref_conv(x, w, b, pad):
    out = jax.lax.conv_general_dilated(
        x, w, window_strides=(1, 1), padding=[(pad, pad), (pad, pad)],
        dimension_numbers=("NCHW", "OIHW", "NCHW"))
    return out + b[None, :, None, None]


def ref_forward(params, x1, x2):
    (w1, b1), (w2, b2), (w3, b3) = params
    v1 = _ref_conv(x1, w1, b1, 0)
    v4 = jnp.maximum(v1 + x1, 0.0)
    v5 = _ref_conv(v4, w3, b3, 3)
    v6 = _ref_conv(v5, w2, b2, 3)
    v7 = _ref_conv(v6, w3, b3, 3)
    v9 = x2 + (v5 + v7)
    return _ref_conv(v9, w1, b1, 0)


# ----------------------------- main -----------------------------

if __name__ == "__main__":
    key = jax.random.PRNGKey(0)
    k_x1, k_x2, k_p = jax.random.split(key, 3)

    # Small shapes consistent with the module (see TODO(synk) above).
    x1 = jax.random.normal(k_x1, (1, C, H, W), dtype=jnp.float32)
    x2 = jax.random.normal(k_x2, (1, C, H, W), dtype=jnp.float32)

    def init_conv(k, cout, cin, ksz):
        fan_in = cin * ksz * ksz
        bound = 1.0 / math.sqrt(fan_in)
        kw_, kb_ = jax.random.split(k)
        w = jax.random.uniform(kw_, (cout, cin, ksz, ksz),
                               minval=-bound, maxval=bound, dtype=jnp.float32)
        b = jax.random.uniform(kb_, (cout,),
                               minval=-bound, maxval=bound, dtype=jnp.float32)
        return w, b

    kc1, kc2, kc3 = jax.random.split(k_p, 3)
    params = (init_conv(kc1, C, C, K),
              init_conv(kc2, C, C, K),
              init_conv(kc3, C, C, K))

    # One-time weight/bias re-layout into kernel layouts (not repeated per call).
    flat_params = prepare_params(params)

    out = jax.jit(forward)(flat_params, x1, x2)
    out = jax.block_until_ready(out)

    ref = ref_forward(params, x1, x2)
    assert out.shape == ref.shape == (1, C, 1, 1)
    np.testing.assert_allclose(np.asarray(out), np.asarray(ref), rtol=5e-4, atol=5e-4)

    print("KERNEL_OK")
</pallas_src>

<mosaic_0001>
module attributes {stable_mosaic.version = 11 : i64} {
  func.func @_fused_forward_kernel(%arg0: memref<1x784xf32, #tpu.memory_space<vmem>>, %arg1: memref<49x16xf32, #tpu.memory_space<vmem>>, %arg2: memref<49x16xf32, #tpu.memory_space<vmem>>, %arg3: memref<784x16xf32, #tpu.memory_space<vmem>>, %arg4: memref<784x16xf32, #tpu.memory_space<vmem>>, %arg5: memref<784x16xf32, #tpu.memory_space<vmem>>, %arg6: memref<784x16xf32, #tpu.memory_space<vmem>>, %arg7: memref<1x16xf32, #tpu.memory_space<vmem>>, %arg8: memref<1x16xf32, #tpu.memory_space<vmem>>, %arg9: memref<1x16xf32, #tpu.memory_space<vmem>>, %arg10: memref<1x16xf32, #tpu.memory_space<vmem>>, %arg11: memref<104x112xf32, #tpu.memory_space<vmem>>) attributes {dimension_semantics = [], scalar_prefetch = 0 : i64, scratch_operands = 1 : i64, tpu.core_type = #tpu.core_type<tc>} {
    %cst = arith.constant 0.000000e+00 : f32
    %0 = vector.broadcast %cst : f32 to vector<104x112xf32>
    %c0 = arith.constant 0 : index
    %c0_0 = arith.constant 0 : index
    %1 = vector.load %arg11[%c0, %c0_0] : memref<104x112xf32, #tpu.memory_space<vmem>>, vector<104x112xf32>
    tpu.vector_store %arg11[%c0, %c0_0], %0 {strides = array<i32>} : memref<104x112xf32, #tpu.memory_space<vmem>>, vector<104x112xf32>,
    %2 = tpu.iota {dimensions = array<i32: 0>} : vector<49x16xi32>
    %c7_i32 = arith.constant 7 : i32
    %c0_i32 = arith.constant 0 : i32
    %3 = arith.cmpi eq, %c7_i32, %c0_i32 : i32
    %c1_i32 = arith.constant 1 : i32
    %4 = arith.select %3, %c1_i32, %c7_i32 : i32
    %5 = vector.broadcast %4 : i32 to vector<49x16xi32>
    %6 = arith.remsi %2, %5 : vector<49x16xi32>
    %c0_i32_1 = arith.constant 0 : i32
    %7 = vector.broadcast %c0_i32_1 : i32 to vector<49x16xi32>
    %8 = arith.cmpi ne, %6, %7 : vector<49x16xi32>
    %c0_i32_2 = arith.constant 0 : i32
    %9 = vector.broadcast %c0_i32_2 : i32 to vector<49x16xi32>
    %10 = arith.cmpi slt, %6, %9 : vector<49x16xi32>
    %c0_i32_3 = arith.constant 0 : i32
    %11 = arith.cmpi slt, %4, %c0_i32_3 : i32
    %12 = vector.broadcast %11 : i1 to vector<49x16xi1>
    %13 = vector.broadcast %12 : vector<49x16xi1> to vector<49x16xi1>
    %14 = arith.xori %10, %13 : vector<49x16xi1>
    %15 = arith.andi %14, %8 : vector<49x16xi1>
    %16 = vector.broadcast %4 : i32 to vector<49x16xi32>
    %17 = arith.addi %6, %16 : vector<49x16xi32>
    %18 = arith.select %15, %17, %6 : vector<49x16xi1>, vector<49x16xi32>
    %c-3_i32 = arith.constant -3 : i32
    %19 = vector.broadcast %c-3_i32 : i32 to vector<49x16xi32>
    %20 = arith.addi %18, %19 : vector<49x16xi32>
    %c0_i32_4 = arith.constant 0 : i32
    %21 = vector.broadcast %c0_i32_4 : i32 to vector<49x16xi32>
    %22 = arith.cmpi sge, %20, %21 : vector<49x16xi32>
    %c-3_i32_5 = arith.constant -3 : i32
    %23 = vector.broadcast %c-3_i32_5 : i32 to vector<49x16xi32>
    %24 = arith.addi %18, %23 : vector<49x16xi32>
    %c7_i32_6 = arith.constant 7 : i32
    %25 = vector.broadcast %c7_i32_6 : i32 to vector<49x16xi32>
    %26 = arith.cmpi slt, %24, %25 : vector<49x16xi32>
    %27 = arith.andi %22, %26 : vector<49x16xi1>
    %c-2_i32 = arith.constant -2 : i32
    %28 = vector.broadcast %c-2_i32 : i32 to vector<49x16xi32>
    %29 = arith.addi %18, %28 : vector<49x16xi32>
    %c0_i32_7 = arith.constant 0 : i32
    %30 = vector.broadcast %c0_i32_7 : i32 to vector<49x16xi32>
    %31 = arith.cmpi sge, %29, %30 : vector<49x16xi32>
    %c-2_i32_8 = arith.constant -2 : i32
    %32 = vector.broadcast %c-2_i32_8 : i32 to vector<49x16xi32>
    %33 = arith.addi %18, %32 : vector<49x16xi32>
    %c7_i32_9 = arith.constant 7 : i32
    %34 = vector.broadcast %c7_i32_9 : i32 to vector<49x16xi32>
    %35 = arith.cmpi slt, %33, %34 : vector<49x16xi32>
    %36 = arith.andi %31, %35 : vector<49x16xi1>
    %c-1_i32 = arith.constant -1 : i32
    %37 = vector.broadcast %c-1_i32 : i32 to vector<49x16xi32>
    %38 = arith.addi %18, %37 : vector<49x16xi32>
    %c0_i32_10 = arith.constant 0 : i32
    %39 = vector.broadcast %c0_i32_10 : i32 to vector<49x16xi32>
    %40 = arith.cmpi sge, %38, %39 : vector<49x16xi32>
    %c-1_i32_11 = arith.constant -1 : i32
    %41 = vector.broadcast %c-1_i32_11 : i32 to vector<49x16xi32>
    %42 = arith.addi %18, %41 : vector<49x16xi32>
    %c7_i32_12 = arith.constant 7 : i32
    %43 = vector.broadcast %c7_i32_12 : i32 to vector<49x16xi32>
    %44 = arith.cmpi slt, %42, %43 : vector<49x16xi32>
    %45 = arith.andi %40, %44 : vector<49x16xi1>
    %c1_i32_13 = arith.constant 1 : i32
    %46 = vector.broadcast %c1_i32_13 : i32 to vector<49x16xi32>
    %47 = arith.addi %18, %46 : vector<49x16xi32>
    %c0_i32_14 = arith.constant 0 : i32
    %48 = vector.broadcast %c0_i32_14 : i32 to vector<49x16xi32>
    %49 = arith.cmpi sge, %47, %48 : vector<49x16xi32>
    %c1_i32_15 = arith.constant 1 : i32
    %50 = vector.broadcast %c1_i32_15 : i32 to vector<49x16xi32>
    %51 = arith.addi %18, %50 : vector<49x16xi32>
    %c7_i32_16 = arith.constant 7 : i32
    %52 = vector.broadcast %c7_i32_16 : i32 to vector<49x16xi32>
    %53 = arith.cmpi slt, %51, %52 : vector<49x16xi32>
    %54 = arith.andi %49, %53 : vector<49x16xi1>
    %c2_i32 = arith.constant 2 : i32
    %55 = vector.broadcast %c2_i32 : i32 to vector<49x16xi32>
    %56 = arith.addi %18, %55 : vector<49x16xi32>
    %c0_i32_17 = arith.constant 0 : i32
    %57 = vector.broadcast %c0_i32_17 : i32 to vector<49x16xi32>
    %58 = arith.cmpi sge, %56, %57 : vector<49x16xi32>
    %c2_i32_18 = arith.constant 2 : i32
    %59 = vector.broadcast %c2_i32_18 : i32 to vector<49x16xi32>
    %60 = arith.addi %18, %59 : vector<49x16xi32>
    %c7_i32_19 = arith.constant 7 : i32
    %61 = vector.broadcast %c7_i32_19 : i32 to vector<49x16xi32>
    %62 = arith.cmpi slt, %60, %61 : vector<49x16xi32>
    %63 = arith.andi %58, %62 : vector<49x16xi1>
    %c3_i32 = arith.constant 3 : i32
    %64 = vector.broadcast %c3_i32 : i32 to vector<49x16xi32>
    %65 = arith.addi %18, %64 : vector<49x16xi32>
    %c0_i32_20 = arith.constant 0 : i32
    %66 = vector.broadcast %c0_i32_20 : i32 to vector<49x16xi32>
    %67 = arith.cmpi sge, %65, %66 : vector<49x16xi32>
    %c3_i32_21 = arith.constant 3 : i32
    %68 = vector.broadcast %c3_i32_21 : i32 to vector<49x16xi32>
    %69 = arith.addi %18, %68 : vector<49x16xi32>
    %c7_i32_22 = arith.constant 7 : i32
    %70 = vector.broadcast %c7_i32_22 : i32 to vector<49x16xi32>
    %71 = arith.cmpi slt, %69, %70 : vector<49x16xi32>
    %72 = arith.andi %67, %71 : vector<49x16xi1>
    %c0_23 = arith.constant 0 : index
    %c0_24 = arith.constant 0 : index
    %73 = vector.load %arg1[%c0_23, %c0_24] : memref<49x16xf32, #tpu.memory_space<vmem>>, vector<49x16xf32>
    %c0_25 = arith.constant 0 : index
    %c0_26 = arith.constant 0 : index
    %74 = vector.load %arg2[%c0_25, %c0_26] : memref<49x16xf32, #tpu.memory_space<vmem>>, vector<49x16xf32>
    %c0_27 = arith.constant 0 : index
    %c0_28 = arith.constant 0 : index
    %75 = vector.load %arg0[%c0_27, %c0_28] : memref<1x784xf32, #tpu.memory_space<vmem>>, vector<1x784xf32>
    %c0_29 = arith.constant 0 : index
    %c0_30 = arith.constant 0 : index
    %76 = vector.load %arg3[%c0_29, %c0_30] : memref<784x16xf32, #tpu.memory_space<vmem>>, vector<784x16xf32>
    %cst_31 = arith.constant dense<0.000000e+00> : vector<1x16xf32>
    %77 = tpu.matmul %75, %76, %cst_31 {dimension_numbers = #tpu.dot_dimension_numbers<[1], [0], [0], [1], [0, 0, 1, 1], [], []>} : vector<1x784xf32>, vector<784x16xf32>, vector<1x16xf32> -> vector<1x16xf32>
    %c0_32 = arith.constant 0 : index
    %c0_33 = arith.constant 0 : index
    %78 = vector.load %arg7[%c0_32, %c0_33] : memref<1x16xf32, #tpu.memory_space<vmem>>, vector<1x16xf32>
    %79 = arith.addf %77, %78 : vector<1x16xf32>
    %80 = vector.broadcast %79 : vector<1x16xf32> to vector<49x16xf32>
    %81 = arith.addf %80, %73 : vector<49x16xf32>
    %cst_34 = arith.constant 0.000000e+00 : f32
    %82 = vector.broadcast %cst_34 : f32 to vector<49x16xf32>
    %83 = arith.maximumf %81, %82 : vector<49x16xf32>
    %c45 = arith.constant 45 : index
    %c0_35 = arith.constant 0 : index
    %84 = vector.load %arg11[%c45, %c0_35] : memref<104x112xf32, #tpu.memory_space<vmem>>, vector<49x16xf32>
    tpu.vector_store %arg11[%c45, %c0_35], %83 {strides = array<i32>} : memref<104x112xf32, #tpu.memory_space<vmem>>, vector<49x16xf32>,
    %c38 = arith.constant 38 : index
    %c16 = arith.constant 16 : index
    %85 = vector.load %arg11[%c38, %c16] : memref<104x112xf32, #tpu.memory_space<vmem>>, vector<49x16xf32>
    tpu.vector_store %arg11[%c38, %c16], %83 {strides = array<i32>} : memref<104x112xf32, #tpu.memory_space<vmem>>, vector<49x16xf32>,
    %c31 = arith.constant 31 : index
    %c32 = arith.constant 32 : index
    %86 = vector.load %arg11[%c31, %c32] : memref<104x112xf32, #tpu.memory_space<vmem>>, vector<49x16xf32>
    tpu.vector_store %arg11[%c31, %c32], %83 {strides = array<i32>} : memref<104x112xf32, #tpu.memory_space<vmem>>, vector<49x16xf32>,
    %c24 = arith.constant 24 : index
    %c48 = arith.constant 48 : index
    %87 = vector.load %arg11[%c24, %c48] : memref<104x112xf32, #tpu.memory_space<vmem>>, vector<49x16xf32>
    tpu.vector_store %arg11[%c24, %c48], %83 {strides = array<i32>} : memref<104x112xf32, #tpu.memory_space<vmem>>, vector<49x16xf32>,
    %c17 = arith.constant 17 : index
    %c64 = arith.constant 64 : index
    %88 = vector.load %arg11[%c17, %c64] : memref<104x112xf32, #tpu.memory_space<vmem>>, vector<49x16xf32>
    tpu.vector_store %arg11[%c17, %c64], %83 {strides = array<i32>} : memref<104x112xf32, #tpu.memory_space<vmem>>, vector<49x16xf32>,
    %c10 = arith.constant 10 : index
    %c80 = arith.constant 80 : index
    %89 = vector.load %arg11[%c10, %c80] : memref<104x112xf32, #tpu.memory_space<vmem>>, vector<49x16xf32>
    tpu.vector_store %arg11[%c10, %c80], %83 {strides = array<i32>} : memref<104x112xf32, #tpu.memory_space<vmem>>, vector<49x16xf32>,
    %c3 = arith.constant 3 : index
    %c96 = arith.constant 96 : index
    %90 = vector.load %arg11[%c3, %c96] : memref<104x112xf32, #tpu.memory_space<vmem>>, vector<49x16xf32>
    tpu.vector_store %arg11[%c3, %c96], %83 {strides = array<i32>} : memref<104x112xf32, #tpu.memory_space<vmem>>, vector<49x16xf32>,
    %c21 = arith.constant 21 : index
    %c0_36 = arith.constant 0 : index
    %91 = vector.load %arg11[%c21, %c0_36] : memref<104x112xf32, #tpu.memory_space<vmem>>, vector<49x112xf32>
    %c0_37 = arith.constant 0 : index
    %c0_38 = arith.constant 0 : index
    %92 = vector.load %arg6[%c0_37, %c0_38] : memref<784x16xf32, #tpu.memory_space<vmem>>, vector<112x16xf32>
    %cst_39 = arith.constant dense<0.000000e+00> : vector<49x16xf32>
    %93 = tpu.matmul %91, %92, %cst_39 {dimension_numbers = #tpu.dot_dimension_numbers<[1], [0], [0], [1], [0, 0, 1, 1], [], []>} : vector<49x112xf32>, vector<112x16xf32>, vector<49x16xf32> -> vector<49x16xf32>
    %cst_40 = arith.constant 0.000000e+00 : f32
    %94 = vector.broadcast %cst_40 : f32 to vector<49x16xf32>
    %95 = arith.select %27, %93, %94 : vector<49x16xi1>, vector<49x16xf32>
    %c22 = arith.constant 22 : index
    %c0_41 = arith.constant 0 : index
    %96 = vector.load %arg11[%c22, %c0_41] : memref<104x112xf32, #tpu.memory_space<vmem>>, vector<49x112xf32>
    %c112 = arith.constant 112 : index
    %c0_42 = arith.constant 0 : index
    %97 = vector.load %arg6[%c112, %c0_42] : memref<784x16xf32, #tpu.memory_space<vmem>>, vector<112x16xf32>
    %cst_43 = arith.constant dense<0.000000e+00> : vector<49x16xf32>
    %98 = tpu.matmul %96, %97, %cst_43 {dimension_numbers = #tpu.dot_dimension_numbers<[1], [0], [0], [1], [0, 0, 1, 1], [], []>} : vector<49x112xf32>, vector<112x16xf32>, vector<49x16xf32> -> vector<49x16xf32>
    %cst_44 = arith.constant 0.000000e+00 : f32
    %99 = vector.broadcast %cst_44 : f32 to vector<49x16xf32>
    %100 = arith.select %36, %98, %99 : vector<49x16xi1>, vector<49x16xf32>
    %101 = arith.addf %95, %100 : vector<49x16xf32>
    %c23 = arith.constant 23 : index
    %c0_45 = arith.constant 0 : index
    %102 = vector.load %arg11[%c23, %c0_45] : memref<104x112xf32, #tpu.memory_space<vmem>>, vector<49x112xf32>
    %c224 = arith.constant 224 : index
    %c0_46 = arith.constant 0 : index
    %103 = vector.load %arg6[%c224, %c0_46] : memref<784x16xf32, #tpu.memory_space<vmem>>, vector<112x16xf32>
    %cst_47 = arith.constant dense<0.000000e+00> : vector<49x16xf32>
    %104 = tpu.matmul %102, %103, %cst_47 {dimension_numbers = #tpu.dot_dimension_numbers<[1], [0], [0], [1], [0, 0, 1, 1], [], []>} : vector<49x112xf32>, vector<112x16xf32>, vector<49x16xf32> -> vector<49x16xf32>
    %cst_48 = arith.constant 0.000000e+00 : f32
    %105 = vector.broadcast %cst_48 : f32 to vector<49x16xf32>
    %106 = arith.select %45, %104, %105 : vector<49x16xi1>, vector<49x16xf32>
    %107 = arith.addf %101, %106 : vector<49x16xf32>
    %c24_49 = arith.constant 24 : index
    %c0_50 = arith.constant 0 : index
    %108 = vector.load %arg11[%c24_49, %c0_50] : memref<104x112xf32, #tpu.memory_space<vmem>>, vector<49x112xf32>
    %c336 = arith.constant 336 : index
    %c0_51 = arith.constant 0 : index
    %109 = vector.load %arg6[%c336, %c0_51] : memref<784x16xf32, #tpu.memory_space<vmem>>, vector<112x16xf32>
    %cst_52 = arith.constant dense<0.000000e+00> : vector<49x16xf32>
    %110 = tpu.matmul %108, %109, %cst_52 {dimension_numbers = #tpu.dot_dimension_numbers<[1], [0], [0], [1], [0, 0, 1, 1], [], []>} : vector<49x112xf32>, vector<112x16xf32>, vector<49x16xf32> -> vector<49x16xf32>
    %111 = arith.addf %107, %110 : vector<49x16xf32>
    %c25 = arith.constant 25 : index
    %c0_53 = arith.constant 0 : index
    %112 = vector.load %arg11[%c25, %c0_53] : memref<104x112xf32, #tpu.memory_space<vmem>>, vector<49x112xf32>
    %c448 = arith.constant 448 : index
    %c0_54 = arith.constant 0 : index
    %113 = vector.load %arg6[%c448, %c0_54] : memref<784x16xf32, #tpu.memory_space<vmem>>, vector<112x16xf32>
    %cst_55 = arith.constant dense<0.000000e+00> : vector<49x16xf32>
    %114 = tpu.matmul %112, %113, %cst_55 {dimension_numbers = #tpu.dot_dimension_numbers<[1], [0], [0], [1], [0, 0, 1, 1], [], []>} : vector<49x112xf32>, vector<112x16xf32>, vector<49x16xf32> -> vector<49x16xf32>
    %cst_56 = arith.constant 0.000000e+00 : f32
    %115 = vector.broadcast %cst_56 : f32 to vector<49x16xf32>
    %116 = arith.select %54, %114, %115 : vector<49x16xi1>, vector<49x16xf32>
    %117 = arith.addf %111, %116 : vector<49x16xf32>
    %c26 = arith.constant 26 : index
    %c0_57 = arith.constant 0 : index
    %118 = vector.load %arg11[%c26, %c0_57] : memref<104x112xf32, #tpu.memory_space<vmem>>, vector<49x112xf32>
    %c560 = arith.constant 560 : index
    %c0_58 = arith.constant 0 : index
    %119 = vector.load %arg6[%c560, %c0_58] : memref<784x16xf32, #tpu.memory_space<vmem>>, vector<112x16xf32>
    %cst_59 = arith.constant dense<0.000000e+00> : vector<49x16xf32>
    %120 = tpu.matmul %118, %119, %cst_59 {dimension_numbers = #tpu.dot_dimension_numbers<[1], [0], [0], [1], [0, 0, 1, 1], [], []>} : vector<49x112xf32>, vector<112x16xf32>, vector<49x16xf32> -> vector<49x16xf32>
    %cst_60 = arith.constant 0.000000e+00 : f32
    %121 = vector.broadcast %cst_60 : f32 to vector<49x16xf32>
    %122 = arith.select %63, %120, %121 : vector<49x16xi1>, vector<49x16xf32>
    %123 = arith.addf %117, %122 : vector<49x16xf32>
    %c27 = arith.constant 27 : index
    %c0_61 = arith.constant 0 : index
    %124 = vector.load %arg11[%c27, %c0_61] : memref<104x112xf32, #tpu.memory_space<vmem>>, vector<49x112xf32>
    %c672 = arith.constant 672 : index
    %c0_62 = arith.constant 0 : index
    %125 = vector.load %arg6[%c672, %c0_62] : memref<784x16xf32, #tpu.memory_space<vmem>>, vector<112x16xf32>
    %cst_63 = arith.constant dense<0.000000e+00> : vector<49x16xf32>
    %126 = tpu.matmul %124, %125, %cst_63 {dimension_numbers = #tpu.dot_dimension_numbers<[1], [0], [0], [1], [0, 0, 1, 1], [], []>} : vector<49x112xf32>, vector<112x16xf32>, vector<49x16xf32> -> vector<49x16xf32>
    %cst_64 = arith.constant 0.000000e+00 : f32
    %127 = vector.broadcast %cst_64 : f32 to vector<49x16xf32>
    %128 = arith.select %72, %126, %127 : vector<49x16xi1>, vector<49x16xf32>
    %129 = arith.addf %123, %128 : vector<49x16xf32>
    %c0_65 = arith.constant 0 : index
    %c0_66 = arith.constant 0 : index
    %130 = vector.load %arg9[%c0_65, %c0_66] : memref<1x16xf32, #tpu.memory_space<vmem>>, vector<1x16xf32>
    %131 = vector.broadcast %130 : vector<1x16xf32> to vector<49x16xf32>
    %132 = arith.addf %129, %131 : vector<49x16xf32>
    %c45_67 = arith.constant 45 : index
    %c0_68 = arith.constant 0 : index
    %133 = vector.load %arg11[%c45_67, %c0_68] : memref<104x112xf32, #tpu.memory_space<vmem>>, vector<49x16xf32>
    tpu.vector_store %arg11[%c45_67, %c0_68], %132 {strides = array<i32>} : memref<104x112xf32, #tpu.memory_space<vmem>>, vector<49x16xf32>,
    %c38_69 = arith.constant 38 : index
    %c16_70 = arith.constant 16 : index
    %134 = vector.load %arg11[%c38_69, %c16_70] : memref<104x112xf32, #tpu.memory_space<vmem>>, vector<49x16xf32>
    tpu.vector_store %arg11[%c38_69, %c16_70], %132 {strides = array<i32>} : memref<104x112xf32, #tpu.memory_space<vmem>>, vector<49x16xf32>,
    %c31_71 = arith.constant 31 : index
    %c32_72 = arith.constant 32 : index
    %135 = vector.load %arg11[%c31_71, %c32_72] : memref<104x112xf32, #tpu.memory_space<vmem>>, vector<49x16xf32>
    tpu.vector_store %arg11[%c31_71, %c32_72], %132 {strides = array<i32>} : memref<104x112xf32, #tpu.memory_space<vmem>>, vector<49x16xf32>,
    %c24_73 = arith.constant 24 : index
    %c48_74 = arith.constant 48 : index
    %136 = vector.load %arg11[%c24_73, %c48_74] : memref<104x112xf32, #tpu.memory_space<vmem>>, vector<49x16xf32>
    tpu.vector_store %arg11[%c24_73, %c48_74], %132 {strides = array<i32>} : memref<104x112xf32, #tpu.memory_space<vmem>>, vector<49x16xf32>,
    %c17_75 = arith.constant 17 : index
    %c64_76 = arith.constant 64 : index
    %137 = vector.load %arg11[%c17_75, %c64_76] : memref<104x112xf32, #tpu.memory_space<vmem>>, vector<49x16xf32>
    tpu.vector_store %arg11[%c17_75, %c64_76], %132 {strides = array<i32>} : memref<104x112xf32, #tpu.memory_space<vmem>>, vector<49x16xf32>,
    %c10_77 = arith.constant 10 : index
    %c80_78 = arith.constant 80 : index
    %138 = vector.load %arg11[%c10_77, %c80_78] : memref<104x112xf32, #tpu.memory_space<vmem>>, vector<49x16xf32>
    tpu.vector_store %arg11[%c10_77, %c80_78], %132 {strides = array<i32>} : memref<104x112xf32, #tpu.memory_space<vmem>>, vector<49x16xf32>,
    %c3_79 = arith.constant 3 : index
    %c96_80 = arith.constant 96 : index
    %139 = vector.load %arg11[%c3_79, %c96_80] : memref<104x112xf32, #tpu.memory_space<vmem>>, vector<49x16xf32>
    tpu.vector_store %arg11[%c3_79, %c96_80], %132 {strides = array<i32>} : memref<104x112xf32, #tpu.memory_space<vmem>>, vector<49x16xf32>,
    %c21_81 = arith.constant 21 : index
    %c0_82 = arith.constant 0 : index
    %140 = vector.load %arg11[%c21_81, %c0_82] : memref<104x112xf32, #tpu.memory_space<vmem>>, vector<49x112xf32>
    %c0_83 = arith.constant 0 : index
    %c0_84 = arith.constant 0 : index
    %141 = vector.load %arg5[%c0_83, %c0_84] : memref<784x16xf32, #tpu.memory_space<vmem>>, vector<112x16xf32>
    %cst_85 = arith.constant dense<0.000000e+00> : vector<49x16xf32>
    %142 = tpu.matmul %140, %141, %cst_85 {dimension_numbers = #tpu.dot_dimension_numbers<[1], [0], [0], [1], [0, 0, 1, 1], [], []>} : vector<49x112xf32>, vector<112x16xf32>, vector<49x16xf32> -> vector<49x16xf32>
    %cst_86 = arith.constant 0.000000e+00 : f32
    %143 = vector.broadcast %cst_86 : f32 to vector<49x16xf32>
    %144 = arith.select %27, %142, %143 : vector<49x16xi1>, vector<49x16xf32>
    %c22_87 = arith.constant 22 : index
    %c0_88 = arith.constant 0 : index
    %145 = vector.load %arg11[%c22_87, %c0_88] : memref<104x112xf32, #tpu.memory_space<vmem>>, vector<49x112xf32>
    %c112_89 = arith.constant 112 : index
    %c0_90 = arith.constant 0 : index
    %146 = vector.load %arg5[%c112_89, %c0_90] : memref<784x16xf32, #tpu.memory_space<vmem>>, vector<112x16xf32>
    %cst_91 = arith.constant dense<0.000000e+00> : vector<49x16xf32>
    %147 = tpu.matmul %145, %146, %cst_91 {dimension_numbers = #tpu.dot_dimension_numbers<[1], [0], [0], [1], [0, 0, 1, 1], [], []>} : vector<49x112xf32>, vector<112x16xf32>, vector<49x16xf32> -> vector<49x16xf32>
    %cst_92 = arith.constant 0.000000e+00 : f32
    %148 = vector.broadcast %cst_92 : f32 to vector<49x16xf32>
    %149 = arith.select %36, %147, %148 : vector<49x16xi1>, vector<49x16xf32>
    %150 = arith.addf %144, %149 : vector<49x16xf32>
    %c23_93 = arith.constant 23 : index
    %c0_94 = arith.constant 0 : index
    %151 = vector.load %arg11[%c23_93, %c0_94] : memref<104x112xf32, #tpu.memory_space<vmem>>, vector<49x112xf32>
    %c224_95 = arith.constant 224 : index
    %c0_96 = arith.constant 0 : index
    %152 = vector.load %arg5[%c224_95, %c0_96] : memref<784x16xf32, #tpu.memory_space<vmem>>, vector<112x16xf32>
    %cst_97 = arith.constant dense<0.000000e+00> : vector<49x16xf32>
    %153 = tpu.matmul %151, %152, %cst_97 {dimension_numbers = #tpu.dot_dimension_numbers<[1], [0], [0], [1], [0, 0, 1, 1], [], []>} : vector<49x112xf32>, vector<112x16xf32>, vector<49x16xf32> -> vector<49x16xf32>
    %cst_98 = arith.constant 0.000000e+00 : f32
    %154 = vector.broadcast %cst_98 : f32 to vector<49x16xf32>
    %155 = arith.select %45, %153, %154 : vector<49x16xi1>, vector<49x16xf32>
    %156 = arith.addf %150, %155 : vector<49x16xf32>
    %c24_99 = arith.constant 24 : index
    %c0_100 = arith.constant 0 : index
    %157 = vector.load %arg11[%c24_99, %c0_100] : memref<104x112xf32, #tpu.memory_space<vmem>>, vector<49x112xf32>
    %c336_101 = arith.constant 336 : index
    %c0_102 = arith.constant 0 : index
    %158 = vector.load %arg5[%c336_101, %c0_102] : memref<784x16xf32, #tpu.memory_space<vmem>>, vector<112x16xf32>
    %cst_103 = arith.constant dense<0.000000e+00> : vector<49x16xf32>
    %159 = tpu.matmul %157, %158, %cst_103 {dimension_numbers = #tpu.dot_dimension_numbers<[1], [0], [0], [1], [0, 0, 1, 1], [], []>} : vector<49x112xf32>, vector<112x16xf32>, vector<49x16xf32> -> vector<49x16xf32>
    %160 = arith.addf %156, %159 : vector<49x16xf32>
    %c25_104 = arith.constant 25 : index
    %c0_105 = arith.constant 0 : index
    %161 = vector.load %arg11[%c25_104, %c0_105] : memref<104x112xf32, #tpu.memory_space<vmem>>, vector<49x112xf32>
    %c448_106 = arith.constant 448 : index
    %c0_107 = arith.constant 0 : index
    %162 = vector.load %arg5[%c448_106, %c0_107] : memref<784x16xf32, #tpu.memory_space<vmem>>, vector<112x16xf32>
    %cst_108 = arith.constant dense<0.000000e+00> : vector<49x16xf32>
    %163 = tpu.matmul %161, %162, %cst_108 {dimension_numbers = #tpu.dot_dimension_numbers<[1], [0], [0], [1], [0, 0, 1, 1], [], []>} : vector<49x112xf32>, vector<112x16xf32>, vector<49x16xf32> -> vector<49x16xf32>
    %cst_109 = arith.constant 0.000000e+00 : f32
    %164 = vector.broadcast %cst_109 : f32 to vector<49x16xf32>
    %165 = arith.select %54, %163, %164 : vector<49x16xi1>, vector<49x16xf32>
    %166 = arith.addf %160, %165 : vector<49x16xf32>
    %c26_110 = arith.constant 26 : index
    %c0_111 = arith.constant 0 : index
    %167 = vector.load %arg11[%c26_110, %c0_111] : memref<104x112xf32, #tpu.memory_space<vmem>>, vector<49x112xf32>
    %c560_112 = arith.constant 560 : index
    %c0_113 = arith.constant 0 : index
    %168 = vector.load %arg5[%c560_112, %c0_113] : memref<784x16xf32, #tpu.memory_space<vmem>>, vector<112x16xf32>
    %cst_114 = arith.constant dense<0.000000e+00> : vector<49x16xf32>
    %169 = tpu.matmul %167, %168, %cst_114 {dimension_numbers = #tpu.dot_dimension_numbers<[1], [0], [0], [1], [0, 0, 1, 1], [], []>} : vector<49x112xf32>, vector<112x16xf32>, vector<49x16xf32> -> vector<49x16xf32>
    %cst_115 = arith.constant 0.000000e+00 : f32
    %170 = vector.broadcast %cst_115 : f32 to vector<49x16xf32>
    %171 = arith.select %63, %169, %170 : vector<49x16xi1>, vector<49x16xf32>
    %172 = arith.addf %166, %171 : vector<49x16xf32>
    %c27_116 = arith.constant 27 : index
    %c0_117 = arith.constant 0 : index
    %173 = vector.load %arg11[%c27_116, %c0_117] : memref<104x112xf32, #tpu.memory_space<vmem>>, vector<49x112xf32>
    %c672_118 = arith.constant 672 : index
    %c0_119 = arith.constant 0 : index
    %174 = vector.load %arg5[%c672_118, %c0_119] : memref<784x16xf32, #tpu.memory_space<vmem>>, vector<112x16xf32>
    %cst_120 = arith.constant dense<0.000000e+00> : vector<49x16xf32>
    %175 = tpu.matmul %173, %174, %cst_120 {dimension_numbers = #tpu.dot_dimension_numbers<[1], [0], [0], [1], [0, 0, 1, 1], [], []>} : vector<49x112xf32>, vector<112x16xf32>, vector<49x16xf32> -> vector<49x16xf32>
    %cst_121 = arith.constant 0.000000e+00 : f32
    %176 = vector.broadcast %cst_121 : f32 to vector<49x16xf32>
    %177 = arith.select %72, %175, %176 : vector<49x16xi1>, vector<49x16xf32>
    %178 = arith.addf %172, %177 : vector<49x16xf32>
    %c0_122 = arith.constant 0 : index
    %c0_123 = arith.constant 0 : index
    %179 = vector.load %arg8[%c0_122, %c0_123] : memref<1x16xf32, #tpu.memory_space<vmem>>, vector<1x16xf32>
    %180 = vector.broadcast %179 : vector<1x16xf32> to vector<49x16xf32>
    %181 = arith.addf %178, %180 : vector<49x16xf32>
    %c45_124 = arith.constant 45 : index
    %c0_125 = arith.constant 0 : index
    %182 = vector.load %arg11[%c45_124, %c0_125] : memref<104x112xf32, #tpu.memory_space<vmem>>, vector<49x16xf32>
    tpu.vector_store %arg11[%c45_124, %c0_125], %181 {strides = array<i32>} : memref<104x112xf32, #tpu.memory_space<vmem>>, vector<49x16xf32>,
    %c38_126 = arith.constant 38 : index
    %c16_127 = arith.constant 16 : index
    %183 = vector.load %arg11[%c38_126, %c16_127] : memref<104x112xf32, #tpu.memory_space<vmem>>, vector<49x16xf32>
    tpu.vector_store %arg11[%c38_126, %c16_127], %181 {strides = array<i32>} : memref<104x112xf32, #tpu.memory_space<vmem>>, vector<49x16xf32>,
    %c31_128 = arith.constant 31 : index
    %c32_129 = arith.constant 32 : index
    %184 = vector.load %arg11[%c31_128, %c32_129] : memref<104x112xf32, #tpu.memory_space<vmem>>, vector<49x16xf32>
    tpu.vector_store %arg11[%c31_128, %c32_129], %181 {strides = array<i32>} : memref<104x112xf32, #tpu.memory_space<vmem>>, vector<49x16xf32>,
    %c24_130 = arith.constant 24 : index
    %c48_131 = arith.constant 48 : index
    %185 = vector.load %arg11[%c24_130, %c48_131] : memref<104x112xf32, #tpu.memory_space<vmem>>, vector<49x16xf32>
    tpu.vector_store %arg11[%c24_130, %c48_131], %181 {strides = array<i32>} : memref<104x112xf32, #tpu.memory_space<vmem>>, vector<49x16xf32>,
    %c17_132 = arith.constant 17 : index
    %c64_133 = arith.constant 64 : index
    %186 = vector.load %arg11[%c17_132, %c64_133] : memref<104x112xf32, #tpu.memory_space<vmem>>, vector<49x16xf32>
    tpu.vector_store %arg11[%c17_132, %c64_133], %181 {strides = array<i32>} : memref<104x112xf32, #tpu.memory_space<vmem>>, vector<49x16xf32>,
    %c10_134 = arith.constant 10 : index
    %c80_135 = arith.constant 80 : index
    %187 = vector.load %arg11[%c10_134, %c80_135] : memref<104x112xf32, #tpu.memory_space<vmem>>, vector<49x16xf32>
    tpu.vector_store %arg11[%c10_134, %c80_135], %181 {strides = array<i32>} : memref<104x112xf32, #tpu.memory_space<vmem>>, vector<49x16xf32>,
    %c3_136 = arith.constant 3 : index
    %c96_137 = arith.constant 96 : index
    %188 = vector.load %arg11[%c3_136, %c96_137] : memref<104x112xf32, #tpu.memory_space<vmem>>, vector<49x16xf32>
    tpu.vector_store %arg11[%c3_136, %c96_137], %181 {strides = array<i32>} : memref<104x112xf32, #tpu.memory_space<vmem>>, vector<49x16xf32>,
    %c21_138 = arith.constant 21 : index
    %c0_139 = arith.constant 0 : index
    %189 = vector.load %arg11[%c21_138, %c0_139] : memref<104x112xf32, #tpu.memory_space<vmem>>, vector<49x112xf32>
    %c0_140 = arith.constant 0 : index
    %c0_141 = arith.constant 0 : index
    %190 = vector.load %arg6[%c0_140, %c0_141] : memref<784x16xf32, #tpu.memory_space<vmem>>, vector<112x16xf32>
    %cst_142 = arith.constant dense<0.000000e+00> : vector<49x16xf32>
    %191 = tpu.matmul %189, %190, %cst_142 {dimension_numbers = #tpu.dot_dimension_numbers<[1], [0], [0], [1], [0, 0, 1, 1], [], []>} : vector<49x112xf32>, vector<112x16xf32>, vector<49x16xf32> -> vector<49x16xf32>
    %cst_143 = arith.constant 0.000000e+00 : f32
    %192 = vector.broadcast %cst_143 : f32 to vector<49x16xf32>
    %193 = arith.select %27, %191, %192 : vector<49x16xi1>, vector<49x16xf32>
    %c22_144 = arith.constant 22 : index
    %c0_145 = arith.constant 0 : index
    %194 = vector.load %arg11[%c22_144, %c0_145] : memref<104x112xf32, #tpu.memory_space<vmem>>, vector<49x112xf32>
    %c112_146 = arith.constant 112 : index
    %c0_147 = arith.constant 0 : index
    %195 = vector.load %arg6[%c112_146, %c0_147] : memref<784x16xf32, #tpu.memory_space<vmem>>, vector<112x16xf32>
    %cst_148 = arith.constant dense<0.000000e+00> : vector<49x16xf32>
    %196 = tpu.matmul %194, %195, %cst_148 {dimension_numbers = #tpu.dot_dimension_numbers<[1], [0], [0], [1], [0, 0, 1, 1], [], []>} : vector<49x112xf32>, vector<112x16xf32>, vector<49x16xf32> -> vector<49x16xf32>
    %cst_149 = arith.constant 0.000000e+00 : f32
    %197 = vector.broadcast %cst_149 : f32 to vector<49x16xf32>
    %198 = arith.select %36, %196, %197 : vector<49x16xi1>, vector<49x16xf32>
    %199 = arith.addf %193, %198 : vector<49x16xf32>
    %c23_150 = arith.constant 23 : index
    %c0_151 = arith.constant 0 : index
    %200 = vector.load %arg11[%c23_150, %c0_151] : memref<104x112xf32, #tpu.memory_space<vmem>>, vector<49x112xf32>
    %c224_152 = arith.constant 224 : index
    %c0_153 = arith.constant 0 : index
    %201 = vector.load %arg6[%c224_152, %c0_153] : memref<784x16xf32, #tpu.memory_space<vmem>>, vector<112x16xf32>
    %cst_154 = arith.constant dense<0.000000e+00> : vector<49x16xf32>
    %202 = tpu.matmul %200, %201, %cst_154 {dimension_numbers = #tpu.dot_dimension_numbers<[1], [0], [0], [1], [0, 0, 1, 1], [], []>} : vector<49x112xf32>, vector<112x16xf32>, vector<49x16xf32> -> vector<49x16xf32>
    %cst_155 = arith.constant 0.000000e+00 : f32
    %203 = vector.broadcast %cst_155 : f32 to vector<49x16xf32>
    %204 = arith.select %45, %202, %203 : vector<49x16xi1>, vector<49x16xf32>
    %205 = arith.addf %199, %204 : vector<49x16xf32>
    %c24_156 = arith.constant 24 : index
    %c0_157 = arith.constant 0 : index
    %206 = vector.load %arg11[%c24_156, %c0_157] : memref<104x112xf32, #tpu.memory_space<vmem>>, vector<49x112xf32>
    %c336_158 = arith.constant 336 : index
    %c0_159 = arith.constant 0 : index
    %207 = vector.load %arg6[%c336_158, %c0_159] : memref<784x16xf32, #tpu.memory_space<vmem>>, vector<112x16xf32>
    %cst_160 = arith.constant dense<0.000000e+00> : vector<49x16xf32>
    %208 = tpu.matmul %206, %207, %cst_160 {dimension_numbers = #tpu.dot_dimension_numbers<[1], [0], [0], [1], [0, 0, 1, 1], [], []>} : vector<49x112xf32>, vector<112x16xf32>, vector<49x16xf32> -> vector<49x16xf32>
    %209 = arith.addf %205, %208 : vector<49x16xf32>
    %c25_161 = arith.constant 25 : index
    %c0_162 = arith.constant 0 : index
    %210 = vector.load %arg11[%c25_161, %c0_162] : memref<104x112xf32, #tpu.memory_space<vmem>>, vector<49x112xf32>
    %c448_163 = arith.constant 448 : index
    %c0_164 = arith.constant 0 : index
    %211 = vector.load %arg6[%c448_163, %c0_164] : memref<784x16xf32, #tpu.memory_space<vmem>>, vector<112x16xf32>
    %cst_165 = arith.constant dense<0.000000e+00> : vector<49x16xf32>
    %212 = tpu.matmul %210, %211, %cst_165 {dimension_numbers = #tpu.dot_dimension_numbers<[1], [0], [0], [1], [0, 0, 1, 1], [], []>} : vector<49x112xf32>, vector<112x16xf32>, vector<49x16xf32> -> vector<49x16xf32>
    %cst_166 = arith.constant 0.000000e+00 : f32
    %213 = vector.broadcast %cst_166 : f32 to vector<49x16xf32>
    %214 = arith.select %54, %212, %213 : vector<49x16xi1>, vector<49x16xf32>
    %215 = arith.addf %209, %214 : vector<49x16xf32>
    %c26_167 = arith.constant 26 : index
    %c0_168 = arith.constant 0 : index
    %216 = vector.load %arg11[%c26_167, %c0_168] : memref<104x112xf32, #tpu.memory_space<vmem>>, vector<49x112xf32>
    %c560_169 = arith.constant 560 : index
    %c0_170 = arith.constant 0 : index
    %217 = vector.load %arg6[%c560_169, %c0_170] : memref<784x16xf32, #tpu.memory_space<vmem>>, vector<112x16xf32>
    %cst_171 = arith.constant dense<0.000000e+00> : vector<49x16xf32>
    %218 = tpu.matmul %216, %217, %cst_171 {dimension_numbers = #tpu.dot_dimension_numbers<[1], [0], [0], [1], [0, 0, 1, 1], [], []>} : vector<49x112xf32>, vector<112x16xf32>, vector<49x16xf32> -> vector<49x16xf32>
    %cst_172 = arith.constant 0.000000e+00 : f32
    %219 = vector.broadcast %cst_172 : f32 to vector<49x16xf32>
    %220 = arith.select %63, %218, %219 : vector<49x16xi1>, vector<49x16xf32>
    %221 = arith.addf %215, %220 : vector<49x16xf32>
    %c27_173 = arith.constant 27 : index
    %c0_174 = arith.constant 0 : index
    %222 = vector.load %arg11[%c27_173, %c0_174] : memref<104x112xf32, #tpu.memory_space<vmem>>, vector<49x112xf32>
    %c672_175 = arith.constant 672 : index
    %c0_176 = arith.constant 0 : index
    %223 = vector.load %arg6[%c672_175, %c0_176] : memref<784x16xf32, #tpu.memory_space<vmem>>, vector<112x16xf32>
    %cst_177 = arith.constant dense<0.000000e+00> : vector<49x16xf32>
    %224 = tpu.matmul %222, %223, %cst_177 {dimension_numbers = #tpu.dot_dimension_numbers<[1], [0], [0], [1], [0, 0, 1, 1], [], []>} : vector<49x112xf32>, vector<112x16xf32>, vector<49x16xf32> -> vector<49x16xf32>
    %cst_178 = arith.constant 0.000000e+00 : f32
    %225 = vector.broadcast %cst_178 : f32 to vector<49x16xf32>
    %226 = arith.select %72, %224, %225 : vector<49x16xi1>, vector<49x16xf32>
    %227 = arith.addf %221, %226 : vector<49x16xf32>
    %c0_179 = arith.constant 0 : index
    %c0_180 = arith.constant 0 : index
    %228 = vector.load %arg9[%c0_179, %c0_180] : memref<1x16xf32, #tpu.memory_space<vmem>>, vector<1x16xf32>
    %229 = vector.broadcast %228 : vector<1x16xf32> to vector<49x16xf32>
    %230 = arith.addf %227, %229 : vector<49x16xf32>
    %231 = arith.addf %132, %230 : vector<49x16xf32>
    %232 = arith.addf %74, %231 : vector<49x16xf32>
    %c45_181 = arith.constant 45 : index
    %c0_182 = arith.constant 0 : index
    %233 = vector.load %arg11[%c45_181, %c0_182] : memref<104x112xf32, #tpu.memory_space<vmem>>, vector<49x16xf32>
    tpu.vector_store %arg11[%c45_181, %c0_182], %232 {strides = array<i32>} : memref<104x112xf32, #tpu.memory_space<vmem>>, vector<49x16xf32>,
    %c38_183 = arith.constant 38 : index
    %c16_184 = arith.constant 16 : index
    %234 = vector.load %arg11[%c38_183, %c16_184] : memref<104x112xf32, #tpu.memory_space<vmem>>, vector<49x16xf32>
    tpu.vector_store %arg11[%c38_183, %c16_184], %232 {strides = array<i32>} : memref<104x112xf32, #tpu.memory_space<vmem>>, vector<49x16xf32>,
    %c31_185 = arith.constant 31 : index
    %c32_186 = arith.constant 32 : index
    %235 = vector.load %arg11[%c31_185, %c32_186] : memref<104x112xf32, #tpu.memory_space<vmem>>, vector<49x16xf32>
    tpu.vector_store %arg11[%c31_185, %c32_186], %232 {strides = array<i32>} : memref<104x112xf32, #tpu.memory_space<vmem>>, vector<49x16xf32>,
    %c24_187 = arith.constant 24 : index
    %c48_188 = arith.constant 48 : index
    %236 = vector.load %arg11[%c24_187, %c48_188] : memref<104x112xf32, #tpu.memory_space<vmem>>, vector<49x16xf32>
    tpu.vector_store %arg11[%c24_187, %c48_188], %232 {strides = array<i32>} : memref<104x112xf32, #tpu.memory_space<vmem>>, vector<49x16xf32>,
    %c17_189 = arith.constant 17 : index
    %c64_190 = arith.constant 64 : index
    %237 = vector.load %arg11[%c17_189, %c64_190] : memref<104x112xf32, #tpu.memory_space<vmem>>, vector<49x16xf32>
    tpu.vector_store %arg11[%c17_189, %c64_190], %232 {strides = array<i32>} : memref<104x112xf32, #tpu.memory_space<vmem>>, vector<49x16xf32>,
    %c10_191 = arith.constant 10 : index
    %c80_192 = arith.constant 80 : index
    %238 = vector.load %arg11[%c10_191, %c80_192] : memref<104x112xf32, #tpu.memory_space<vmem>>, vector<49x16xf32>
    tpu.vector_store %arg11[%c10_191, %c80_192], %232 {strides = array<i32>} : memref<104x112xf32, #tpu.memory_space<vmem>>, vector<49x16xf32>,
    %c3_193 = arith.constant 3 : index
    %c96_194 = arith.constant 96 : index
    %239 = vector.load %arg11[%c3_193, %c96_194] : memref<104x112xf32, #tpu.memory_space<vmem>>, vector<49x16xf32>
    tpu.vector_store %arg11[%c3_193, %c96_194], %232 {strides = array<i32>} : memref<104x112xf32, #tpu.memory_space<vmem>>, vector<49x16xf32>,
    %c45_195 = arith.constant 45 : index
    %c0_196 = arith.constant 0 : index
    %240 = vector.load %arg11[%c45_195, %c0_196] : memref<104x112xf32, #tpu.memory_space<vmem>>, vector<1x112xf32>
    %c0_197 = arith.constant 0 : index
    %c0_198 = arith.constant 0 : index
    %241 = vector.load %arg4[%c0_197, %c0_198] : memref<784x16xf32, #tpu.memory_space<vmem>>, vector<112x16xf32>
    %cst_199 = arith.constant dense<0.000000e+00> : vector<1x16xf32>
    %242 = tpu.matmul %240, %241, %cst_199 {dimension_numbers = #tpu.dot_dimension_numbers<[1], [0], [0], [1], [0, 0, 1, 1], [], []>} : vector<1x112xf32>, vector<112x16xf32>, vector<1x16xf32> -> vector<1x16xf32>
    %c46 = arith.constant 46 : index
    %c0_200 = arith.constant 0 : index
    %243 = vector.load %arg11[%c46, %c0_200] : memref<104x112xf32, #tpu.memory_space<vmem>>, vector<1x112xf32>
    %c112_201 = arith.constant 112 : index
    %c0_202 = arith.constant 0 : index
    %244 = vector.load %arg4[%c112_201, %c0_202] : memref<784x16xf32, #tpu.memory_space<vmem>>, vector<112x16xf32>
    %cst_203 = arith.constant dense<0.000000e+00> : vector<1x16xf32>
    %245 = tpu.matmul %243, %244, %cst_203 {dimension_numbers = #tpu.dot_dimension_numbers<[1], [0], [0], [1], [0, 0, 1, 1], [], []>} : vector<1x112xf32>, vector<112x16xf32>, vector<1x16xf32> -> vector<1x16xf32>
    %246 = arith.addf %242, %245 : vector<1x16xf32>
    %c47 = arith.constant 47 : index
    %c0_204 = arith.constant 0 : index
    %247 = vector.load %arg11[%c47, %c0_204] : memref<104x112xf32, #tpu.memory_space<vmem>>, vector<1x112xf32>
    %c224_205 = arith.constant 224 : index
    %c0_206 = arith.constant 0 : index
    %248 = vector.load %arg4[%c224_205, %c0_206] : memref<784x16xf32, #tpu.memory_space<vmem>>, vector<112x16xf32>
    %cst_207 = arith.constant dense<0.000000e+00> : vector<1x16xf32>
    %249 = tpu.matmul %247, %248, %cst_207 {dimension_numbers = #tpu.dot_dimension_numbers<[1], [0], [0], [1], [0, 0, 1, 1], [], []>} : vector<1x112xf32>, vector<112x16xf32>, vector<1x16xf32> -> vector<1x16xf32>
    %250 = arith.addf %246, %249 : vector<1x16xf32>
    %c48_208 = arith.constant 48 : index
    %c0_209 = arith.constant 0 : index
    %251 = vector.load %arg11[%c48_208, %c0_209] : memref<104x112xf32, #tpu.memory_space<vmem>>, vector<1x112xf32>
    %c336_210 = arith.constant 336 : index
    %c0_211 = arith.constant 0 : index
    %252 = vector.load %arg4[%c336_210, %c0_211] : memref<784x16xf32, #tpu.memory_space<vmem>>, vector<112x16xf32>
    %cst_212 = arith.constant dense<0.000000e+00> : vector<1x16xf32>
    %253 = tpu.matmul %251, %252, %cst_212 {dimension_numbers = #tpu.dot_dimension_numbers<[1], [0], [0], [1], [0, 0, 1, 1], [], []>} : vector<1x112xf32>, vector<112x16xf32>, vector<1x16xf32> -> vector<1x16xf32>
    %254 = arith.addf %250, %253 : vector<1x16xf32>
    %c49 = arith.constant 49 : index
    %c0_213 = arith.constant 0 : index
    %255 = vector.load %arg11[%c49, %c0_213] : memref<104x112xf32, #tpu.memory_space<vmem>>, vector<1x112xf32>
    %c448_214 = arith.constant 448 : index
    %c0_215 = arith.constant 0 : index
    %256 = vector.load %arg4[%c448_214, %c0_215] : memref<784x16xf32, #tpu.memory_space<vmem>>, vector<112x16xf32>
    %cst_216 = arith.constant dense<0.000000e+00> : vector<1x16xf32>
    %257 = tpu.matmul %255, %256, %cst_216 {dimension_numbers = #tpu.dot_dimension_numbers<[1], [0], [0], [1], [0, 0, 1, 1], [], []>} : vector<1x112xf32>, vector<112x16xf32>, vector<1x16xf32> -> vector<1x16xf32>
    %258 = arith.addf %254, %257 : vector<1x16xf32>
    %c50 = arith.constant 50 : index
    %c0_217 = arith.constant 0 : index
    %259 = vector.load %arg11[%c50, %c0_217] : memref<104x112xf32, #tpu.memory_space<vmem>>, vector<1x112xf32>
    %c560_218 = arith.constant 560 : index
    %c0_219 = arith.constant 0 : index
    %260 = vector.load %arg4[%c560_218, %c0_219] : memref<784x16xf32, #tpu.memory_space<vmem>>, vector<112x16xf32>
    %cst_220 = arith.constant dense<0.000000e+00> : vector<1x16xf32>
    %261 = tpu.matmul %259, %260, %cst_220 {dimension_numbers = #tpu.dot_dimension_numbers<[1], [0], [0], [1], [0, 0, 1, 1], [], []>} : vector<1x112xf32>, vector<112x16xf32>, vector<1x16xf32> -> vector<1x16xf32>
    %262 = arith.addf %258, %261 : vector<1x16xf32>
    %c51 = arith.constant 51 : index
    %c0_221 = arith.constant 0 : index
    %263 = vector.load %arg11[%c51, %c0_221] : memref<104x112xf32, #tpu.memory_space<vmem>>, vector<1x112xf32>
    %c672_222 = arith.constant 672 : index
    %c0_223 = arith.constant 0 : index
    %264 = vector.load %arg4[%c672_222, %c0_223] : memref<784x16xf32, #tpu.memory_space<vmem>>, vector<112x16xf32>
    %cst_224 = arith.constant dense<0.000000e+00> : vector<1x16xf32>
    %265 = tpu.matmul %263, %264, %cst_224 {dimension_numbers = #tpu.dot_dimension_numbers<[1], [0], [0], [1], [0, 0, 1, 1], [], []>} : vector<1x112xf32>, vector<112x16xf32>, vector<1x16xf32> -> vector<1x16xf32>
    %266 = arith.addf %262, %265 : vector<1x16xf32>
    %c0_225 = arith.constant 0 : index
    %c0_226 = arith.constant 0 : index
    %267 = vector.load %arg7[%c0_225, %c0_226] : memref<1x16xf32, #tpu.memory_space<vmem>>, vector<1x16xf32>
    %268 = arith.addf %266, %267 : vector<1x16xf32>
    %c0_227 = arith.constant 0 : index
    %c0_228 = arith.constant 0 : index
    %269 = vector.load %arg10[%c0_227, %c0_228] : memref<1x16xf32, #tpu.memory_space<vmem>>, vector<1x16xf32>
    tpu.vector_store %arg10[%c0_227, %c0_228], %268 {strides = array<i32>} : memref<1x16xf32, #tpu.memory_space<vmem>>, vector<1x16xf32>,
    return
  }
}

</mosaic_0001>

<bundles_post_ra>
// kernel: forward.1
= control target key start
LH: loop header
LB: loop body
LE: loop exit
PB: predicated region body
PF: predicated region fallthrough
CT: control target
= control target key end

     0   :  { %s7159_s0 = inlined_call_operand.vmem [shape: f32[1,784], index: 0, kind: input, shape index: {}]   ;;  %s7160_s1 = inlined_call_operand.vmem [shape: f32[49,16], index: 1, kind: input, shape index: {}]   ;;  %s7161_s2 = inlined_call_operand.vmem [shape: f32[49,16], index: 2, kind: input, shape index: {}]   ;;  %s7162_s3 = inlined_call_operand.vmem [shape: f32[784,16], index: 3, kind: input, shape index: {}]   ;;  %s7163_s4 = inlined_call_operand.vmem [shape: f32[784,16], index: 4, kind: input, shape index: {}]   ;;  %s7164_s5 = inlined_call_operand.vmem [shape: f32[784,16], index: 5, kind: input, shape index: {}]   ;;  %s7165_s6 = inlined_call_operand.vmem [shape: f32[784,16], index: 6, kind: input, shape index: {}]   ;;  %s7166_s7 = inlined_call_operand.vmem [shape: f32[1,16], index: 7, kind: input, shape index: {}]   ;;  %s7167_s8 = inlined_call_operand.vmem [shape: f32[1,16], index: 8, kind: input, shape index: {}]   ;;  %s7168_s9 = inlined_call_operand.vmem [shape: f32[1,16], index: 9, kind: input, shape index: {}]   ;;  %s7169_s10 = inlined_call_operand.hbm [shape: f32[1,16], index: 10, kind: output, shape index: {}]  }
   0x1   :  { %v515_v0 = vld [vmem:[%s7162_s3 + $0x78] sm:$0xff]  ;;  %v514_v1 = vld [vmem:[%s7162_s3 + $0x70] sm:$0xff]  ;;  %v513_v4 = vld [vmem:[%s7162_s3 + $0x68] sm:$0xff] }
   0x2   :  { %v531_v2 = vld [vmem:[%s7162_s3 + $0xf8] sm:$0xff]  ;;  %616 = vmatpush.msra.mxu0 %v515_v0  ;;  %v530_v3 = vld [vmem:[%s7162_s3 + $0xf0] sm:$0xff]  ;;  %v529_v5 = vld [vmem:[%s7162_s3 + $0xe8] sm:$0xff] }
   0x3   :  { %636 = vmatpush.msra.mxu1 %v531_v2  ;;  %v512_v6 = vld [vmem:[%s7162_s3 + $0x60] sm:$0xff]  ;;  %v511_v8 = vld [vmem:[%s7162_s3 + $0x58] sm:$0xff]  ;;  %v510_v10 = vld [vmem:[%s7162_s3 + $0x50] sm:$0xff] }
   0x4   :  { %617 = vmatpush.msra.mxu0 %v514_v1  ;;  %v528_v7 = vld [vmem:[%s7162_s3 + $0xe0] sm:$0xff]  ;;  %v527_v9 = vld [vmem:[%s7162_s3 + $0xd8] sm:$0xff]  ;;  %v526_v12 = vld [vmem:[%s7162_s3 + $0xd0] sm:$0xff] }
   0x5   :  { %637 = vmatpush.msra.mxu1 %v530_v3  ;;  %v547_v11 = vld [vmem:[%s7162_s3 + $0x178] sm:$0xff]  ;;  %v546_v13 = vld [vmem:[%s7162_s3 + $0x170] sm:$0xff]  ;;  %v545_v15 = vld [vmem:[%s7162_s3 + $0x168] sm:$0xff] }
   0x6   :  { %618 = vmatpush.msra.mxu0 %v513_v4  ;;  %656 = vmatpush.msra.mxu2 %v547_v11  ;;  %v563_v14 = vld [vmem:[%s7162_s3 + $0x1f8] sm:$0xff]  ;;  %v562_v16 = vld [vmem:[%s7162_s3 + $0x1f0] sm:$0xff]  ;;  %v509_v17 = vld [vmem:[%s7162_s3 + $0x48] sm:$0xff] }
   0x7   :  { %638 = vmatpush.msra.mxu1 %v529_v5  ;;  %v525_v18 = vld [vmem:[%s7162_s3 + $0xc8] sm:$0xff]  ;;  %676 = vmatpush.msra.mxu3 %v563_v14  ;;  %v544_v19 = vld [vmem:[%s7162_s3 + $0x160] sm:$0xff]  ;;  %v543_v23 = vld [vmem:[%s7162_s3 + $0x158] sm:$0xff] }
   0x8   :  { %619 = vmatpush.msra.mxu0 %v512_v6  ;;  %657 = vmatpush.msra.mxu2 %v546_v13  ;;  %v561_v20 = vld [vmem:[%s7162_s3 + $0x1e8] sm:$0xff]  ;;  %v508_v21 = vld [vmem:[%s7162_s3 + $0x40] sm:$0xff]  ;;  %v507_v25 = vld [vmem:[%s7162_s3 + $0x38] sm:$0xff] }
   0x9   :  { %639 = vmatpush.msra.mxu1 %v528_v7  ;;  %v524_v22 = vld [vmem:[%s7162_s3 + $0xc0] sm:$0xff]  ;;  %677 = vmatpush.msra.mxu3 %v562_v16  ;;  %v523_v26 = vld [vmem:[%s7162_s3 + $0xb8] sm:$0xff]  ;;  %v542_v27 = vld [vmem:[%s7162_s3 + $0x150] sm:$0xff] }
   0xa   :  { %620 = vmatpush.msra.mxu0 %v511_v8  ;;  %658 = vmatpush.msra.mxu2 %v545_v15  ;;  %v560_v24 = vld [vmem:[%s7162_s3 + $0x1e0] sm:$0xff]  ;;  %v559_v28 = vld [vmem:[%s7162_s3 + $0x1d8] sm:$0xff]  ;;  %v506_v29 = vld [vmem:[%s7162_s3 + $0x30] sm:$0xff] }
   0xb   :  { %640 = vmatpush.msra.mxu1 %v527_v9  ;;  %678 = vmatpush.msra.mxu3 %v561_v20  ;;  %v522_v30 = vld [vmem:[%s7162_s3 + $0xb0] sm:$0xff]  ;;  %v541_v31 = vld [vmem:[%s7162_s3 + $0x148] sm:$0xff]  ;;  %v540_v35 = vld [vmem:[%s7162_s3 + $0x140] sm:$0xff] }
   0xc   :  { %621 = vmatpush.msra.mxu0 %v510_v10  ;;  %659 = vmatpush.msra.mxu2 %v544_v19  ;;  %v558_v32 = vld [vmem:[%s7162_s3 + $0x1d0] sm:$0xff]  ;;  %v505_v33 = vld [vmem:[%s7162_s3 + $0x28] sm:$0xff]  ;;  %v504_v37 = vld [vmem:[%s7162_s3 + $0x20] sm:$0xff] }
   0xd   :  { %641 = vmatpush.msra.mxu1 %v526_v12  ;;  %679 = vmatpush.msra.mxu3 %v560_v24  ;;  %v521_v34 = vld [vmem:[%s7162_s3 + $0xa8] sm:$0xff]  ;;  %v520_v38 = vld [vmem:[%s7162_s3 + $0xa0] sm:$0xff]  ;;  %v539_v39 = vld [vmem:[%s7162_s3 + $0x138] sm:$0xff] }
   0xe   :  { %622 = vmatpush.msra.mxu0 %v509_v17  ;;  %660 = vmatpush.msra.mxu2 %v543_v23  ;;  %v557_v36 = vld [vmem:[%s7162_s3 + $0x1c8] sm:$0xff]  ;;  %v556_v40 = vld [vmem:[%s7162_s3 + $0x1c0] sm:$0xff]  ;;  %v503_v41 = vld [vmem:[%s7162_s3 + $0x18] sm:$0xff] }
   0xf   :  { %642 = vmatpush.msra.mxu1 %v525_v18  ;;  %680 = vmatpush.msra.mxu3 %v559_v28  ;;  %v519_v42 = vld [vmem:[%s7162_s3 + $0x98] sm:$0xff]  ;;  %v538_v43 = vld [vmem:[%s7162_s3 + $0x130] sm:$0xff]  ;;  %v537_v47 = vld [vmem:[%s7162_s3 + $0x128] sm:$0xff] }
  0x10   :  { %623 = vmatpush.msra.mxu0 %v508_v21  ;;  %661 = vmatpush.msra.mxu2 %v542_v27  ;;  %v555_v44 = vld [vmem:[%s7162_s3 + $0x1b8] sm:$0xff]  ;;  %v502_v45 = vld [vmem:[%s7162_s3 + $0x10] sm:$0xff]  ;;  %v501_v49 = vld [vmem:[%s7162_s3 + $0x8] sm:$0xff] }
  0x11   :  { %643 = vmatpush.msra.mxu1 %v524_v22  ;;  %681 = vmatpush.msra.mxu3 %v558_v32  ;;  %v518_v46 = vld [vmem:[%s7162_s3 + $0x90] sm:$0xff]  ;;  %v517_v50 = vld [vmem:[%s7162_s3 + $0x88] sm:$0xff]  ;;  %v536_v51 = vld [vmem:[%s7162_s3 + $0x120] sm:$0xff] }
  0x12   :  { %624 = vmatpush.msra.mxu0 %v507_v25  ;;  %662 = vmatpush.msra.mxu2 %v541_v31  ;;  %v554_v48 = vld [vmem:[%s7162_s3 + $0x1b0] sm:$0xff]  ;;  %v553_v52 = vld [vmem:[%s7162_s3 + $0x1a8] sm:$0xff]  ;;  %v500_v53 = vld [vmem:[%s7162_s3] sm:$0xff] }
  0x13   :  { %644 = vmatpush.msra.mxu1 %v523_v26  ;;  %682 = vmatpush.msra.mxu3 %v557_v36  ;;  %v516_v54 = vld [vmem:[%s7162_s3 + $0x80] sm:$0xff]  ;;  %v579_v55 = vld [vmem:[%s7162_s3 + $0x278] sm:$0xff]  ;;  %v578_v57 = vld [vmem:[%s7162_s3 + $0x270] sm:$0xff] }
  0x14   :  { %625 = vmatpush.msra.mxu0 %v506_v29  ;;  %663 = vmatpush.msra.mxu2 %v540_v35  ;;  %v595_v56 = vld [vmem:[%s7162_s3 + $0x2f8] sm:$0xff]  ;;  %v552_v59 = vld [vmem:[%s7162_s3 + $0x1a0] sm:$0xff]  ;;  %v577_v60 = vld [vmem:[%s7162_s3 + $0x268] sm:$0xff] }
  0x15   :  { %645 = vmatpush.msra.mxu1 %v522_v30  ;;  %683 = vmatpush.msra.mxu3 %v556_v40  ;;  %v535_v58 = vld [vmem:[%s7162_s3 + $0x118] sm:$0xff]  ;;  %v594_v61 = vld [vmem:[%s7162_s3 + $0x2f0] sm:$0xff]  ;;  %v593_v62 = vld [vmem:[%s7162_s3 + $0x2e8] sm:$0xff] }
  0x16   :  { %626 = vmatpush.msra.mxu0 %v505_v33  ;;  %664 = vmatpush.msra.mxu2 %v539_v39  ;;  %v534_v63 = vld [vmem:[%s7162_s3 + $0x110] sm:$0xff]  ;;  %v551_v0 = vld [vmem:[%s7162_s3 + $0x198] sm:$0xff]  ;;  %v533_v1 = vld [vmem:[%s7162_s3 + $0x108] sm:$0xff] }
  0x17   :  { %646 = vmatpush.msra.mxu1 %v521_v34  ;;  %684 = vmatpush.msra.mxu3 %v555_v44  ;;  %v550_v2 = vld [vmem:[%s7162_s3 + $0x190] sm:$0xff]  ;;  %v4242_v3 = vld [vmem:[%s7159_s0] sm:$0x7f] }
  0x18   :  { %627 = vmatpush.msra.mxu0 %v504_v37  ;;  %665 = vmatpush.msra.mxu2 %v538_v43 }
  0x19   :  { %647 = vmatpush.msra.mxu1 %v520_v38  ;;  %685 = vmatpush.msra.mxu3 %v554_v48 }
  0x1a   :  { %628 = vmatpush.msra.mxu0 %v503_v41  ;;  %666 = vmatpush.msra.mxu2 %v537_v47 }
  0x1b   :  { %648 = vmatpush.msra.mxu1 %v519_v42  ;;  %686 = vmatpush.msra.mxu3 %v553_v52 }
  0x1c   :  { %629 = vmatpush.msra.mxu0 %v502_v45  ;;  %667 = vmatpush.msra.mxu2 %v536_v51 }
  0x1d   :  { %649 = vmatpush.msra.mxu1 %v518_v46  ;;  %687 = vmatpush.msra.mxu3 %v552_v59 }
  0x1e   :  { %630 = vmatpush.msra.mxu0 %v501_v49  ;;  %668 = vmatpush.msra.mxu2 %v535_v58 }
  0x1f   :  { %650 = vmatpush.msra.mxu1 %v517_v50 }
  0x20   :  { %631 = vmatpush.msra.mxu0 %v500_v53 }
  0x21   :  { %651 = vmatpush.msra.mxu1 %v516_v54 }
  0x22   :  { %696 = vmatpush.msrb.mxu0 %v579_v55 }
  0x23   :  { %716 = vmatpush.msrb.mxu1 %v595_v56 }
  0x24   :  { %697 = vmatpush.msrb.mxu0 %v578_v57 }
  0x25   :  { %717 = vmatpush.msrb.mxu1 %v594_v61 }
  0x26   :  { %15 = vsyncpa [#allocation4], 0  ;;  %v576_v4 = vld [vmem:[%s7162_s3 + $0x260] sm:$0xff]  ;;  %669 = vmatpush.msra.mxu2 %v534_v63  ;;  %688 = vmatpush.msra.mxu3 %v551_v0  ;;  %v549_v7 = vld [vmem:[%s7162_s3 + $0x188] sm:$0xff]  ;;  %v602_v10 = vperm.slane %v4242_v3, 2  ;;  %v600_v14 = vperm.slane %v4242_v3, 0 }
  0x27   :  { %v592_v5 = vld [vmem:[%s7162_s3 + $0x2e0] sm:$0xff]  ;;  %698 = vmatpush.msrb.mxu0 %v577_v60  ;;  %718 = vmatpush.msrb.mxu1 %v593_v62  ;;  %v575_v8 = vld [vmem:[%s7162_s3 + $0x258] sm:$0xff]  ;;  %v574_v12 = vld [vmem:[%s7162_s3 + $0x250] sm:$0xff]  ;;  %v603_v18 = vperm.slane %v4242_v3, 3  ;;  %v601_v19 = vperm.slane %v4242_v3, 1  ;;  %v606_v25 = vperm.slane %v4242_v3, 6 }
  0x28   :  { %v532_v6 = vld [vmem:[%s7162_s3 + $0x100] sm:$0xff]  ;;  %v591_v9 = vld [vmem:[%s7162_s3 + $0x2d8] sm:$0xff]  ;;  %670 = vmatpush.msra.mxu2 %v533_v1  ;;  %689 = vmatpush.msra.mxu3 %v550_v2  ;;  %v590_v13 = vld [vmem:[%s7162_s3 + $0x2d0] sm:$0xff]  ;;  %vm7181_vm0 = vcmask 130048   ;;  %v604_v39 = vperm.slane %v4242_v3, 4  ;;  %v605_v41 = vperm.slane %v4242_v3, 5 }
  0x29   :  { %699 = vmatpush.msrb.mxu0 %v576_v4  ;;  %719 = vmatpush.msrb.mxu1 %v592_v5  ;;  %v548_v11 = vld [vmem:[%s7162_s3 + $0x180] sm:$0xff]  ;;  %v597_v15 = vld [vmem:[%s7162_s3 + $0x308] sm:$0xff]  ;;  %v571_v23 = vld [vmem:[%s7162_s3 + $0x238] sm:$0xff]  ;;  %vm7174_vm1 = vcmask 916480   ;;  %v3974_v44 = vmov 0.0   ;;  %s3975_s22 = smov 16  }
  0x2a   :  { %671 = vmatpush.msra.mxu2 %v532_v6  ;;  %690 = vmatpush.msra.mxu3 %v549_v7  ;;  %v573_v16 = vld [vmem:[%s7162_s3 + $0x248] sm:$0xff]  ;;  %v572_v20 = vld [vmem:[%s7162_s3 + $0x240] sm:$0xff]  ;;  %v587_v24 = vld [vmem:[%s7162_s3 + $0x2b8] sm:$0xff]  ;;  %39 = vst.msk [vmem:[#allocation2 + $0x10] sm:$0xff] %vm7174_vm1, %v3974_v44  ;;  %s3976_s23 = smov 32   ;;  %s3978_s24 = smov 64  }
  0x2b   :  { %700 = vmatpush.msrb.mxu0 %v575_v8  ;;  %720 = vmatpush.msrb.mxu1 %v591_v9  ;;  %v589_v17 = vld [vmem:[%s7162_s3 + $0x2c8] sm:$0xff]  ;;  %v588_v21 = vld [vmem:[%s7162_s3 + $0x2c0] sm:$0xff]  ;;  %v570_v26 = vld [vmem:[%s7162_s3 + $0x230] sm:$0xff]  ;;  %40 = vst.msk [vmem:[#allocation2 + $0x18] sm:$0xff] %vm7174_vm1, %v3974_v44  ;;  %s3979_s25 = smov 80   ;;  %s3980_s26 = smov 96  }
  0x2c   :  { %672 = vmatmul.f32.vlgmr.msra.gmra.mxu2 %v602_v10  ;;  %691 = vmatpush.msra.mxu3 %v548_v11  ;;  %v596_v22 = vld [vmem:[%s7162_s3 + $0x300] sm:$0xff]  ;;  %v586_v27 = vld [vmem:[%s7162_s3 + $0x2b0] sm:$0xff]  ;;  %v569_v28 = vld [vmem:[%s7162_s3 + $0x228] sm:$0xff]  ;;  %41 = vst.msk [vmem:[#allocation2 + $0x20] sm:$0xff] %vm7174_vm1, %v3974_v44  ;;  %vm7180_vm3 = vcmask 261248   ;;  %vm7179_vm4 = vcmask 392448  }
  0x2d   :  { %701 = vmatpush.msrb.mxu0 %v574_v12  ;;  %721 = vmatpush.msrb.mxu1 %v590_v13  ;;  %v585_v29 = vld [vmem:[%s7162_s3 + $0x2a8] sm:$0xff]  ;;  %v568_v30 = vld [vmem:[%s7162_s3 + $0x220] sm:$0xff]  ;;  %v567_v32 = vld [vmem:[%s7162_s3 + $0x218] sm:$0xff]  ;;  %42 = vst.msk [vmem:[#allocation2 + $0x28] sm:$0xff] %vm7174_vm1, %v3974_v44  ;;  %vm7178_vm5 = vcmask 523648   ;;  %vm7177_vm6 = vcmask 654848  }
  0x2e   :  { %750 = vmatpush.msrb.mxu2 %v597_v15  ;;  %632 = vmatmul.f32.vlgmr.msra.gmra.mxu0 %v600_v14  ;;  %v584_v31 = vld [vmem:[%s7162_s3 + $0x2a0] sm:$0xff]  ;;  %v583_v33 = vld [vmem:[%s7162_s3 + $0x298] sm:$0xff]  ;;  %v566_v34 = vld [vmem:[%s7162_s3 + $0x210] sm:$0xff]  ;;  %43 = vst.msk [vmem:[#allocation2 + $0x30] sm:$0xff] %vm7174_vm1, %v3974_v44  ;;  %vm7176_vm7 = vcmask 786048   ;;  %vm7175_vm8 = vcmask 917248  }
  0x2f   :  { %702 = vmatpush.msrb.mxu0 %v573_v16  ;;  %722 = vmatpush.msrb.mxu1 %v589_v17  ;;  %v582_v35 = vld [vmem:[%s7162_s3 + $0x290] sm:$0xff]  ;;  %v565_v36 = vld [vmem:[%s7162_s3 + $0x208] sm:$0xff]  ;;  %v564_v38 = vld [vmem:[%s7162_s3 + $0x200] sm:$0xff]  ;;  %44 = vst.msk [vmem:[#allocation2 + $0x38] sm:$0xff] %vm7174_vm1, %v3974_v44  ;;  %vm7170_vm9 = vcmask 647680   ;;  %vm7171_vm10 = vcmask 778880  }
  0x30   :  { %692 = vmatmul.f32.vlgmr.msra.gmra.mxu3 %v603_v18  ;;  %652 = vmatmul.f32.vlgmr.msra.gmra.mxu1 %v601_v19  ;;  %v581_v37 = vld [vmem:[%s7162_s3 + $0x288] sm:$0xff]  ;;  %v580_v40 = vld [vmem:[%s7162_s3 + $0x280] sm:$0xff]  ;;  %45 = vst.msk [vmem:[#allocation2 + $0x40] sm:$0xff] %vm7174_vm1, %v3974_v44  ;;  %v487_v58 = vld [vmem:[%s7160_s1 + $0x10] sm:$0xff]  ;;  %vm7172_vm11 = vcmask 910080   ;;  %vm7173_vm12 = vcmask 516480  }
  0x31   :  { %703 = vmatpush.msrb.mxu0 %v572_v20  ;;  %723 = vmatpush.msrb.mxu1 %v588_v21  ;;  %v598_v42 = vld [vmem:[%s7166_s7] sm:$0x1]  ;;  %46 = vst.msk [vmem:[#allocation2 + $0x48] sm:$0xff] %vm7174_vm1, %v3974_v44  ;;  %v488_v60 = vld [vmem:[%s7160_s1 + $0x18] sm:$0xff]  ;;  %v486_v61 = vld [vmem:[%s7160_s1 + $0x8] sm:$0xff]  ;;  %s3772_s16 = sshll.u32 %s7169_s10, 4  ;;  %s3773_s16 = int_to_ptr.hbm [resolvable:$true] %s3772_s16 }
  0x32   :  { %751 = vmatpush.msrb.mxu2 %v596_v22  ;;  %v485_v59 = vld [vmem:[%s7160_s1] sm:$0xff]  ;;  %v490_v0 = vld [vmem:[%s7160_s1 + $0x28] sm:$0xff]  ;;  %v491_v1 = vld [vmem:[%s7160_s1 + $0x30] sm:$0x1] }
  0x33   :  { %704 = vmatpush.msrb.mxu0 %v571_v23  ;;  %724 = vmatpush.msrb.mxu1 %v587_v24  ;;  %v489_v63 = vld [vmem:[%s7160_s1 + $0x20] sm:$0xff]  ;;  %s3977_s1 = smov 48   ;;  %v986_v19 = vld [vmem:[%s7165_s6 + $0x68] sm:$0xff]  ;;  %v1073_v20 = vld [vmem:[%s7165_s6 + $0xd8] sm:$0xff] }
  0x34   :  { %3781 = vmatmul.msk.f32.vlgmr.msrb.gmra.mxu2 %vm7181_vm0, %v606_v25  ;;  %v1167_v21 = vld [vmem:[%s7165_s6 + $0x148] sm:$0xff]  ;;  %1010 = vmatpush.msrb.mxu3 %v986_v19  ;;  %v1261_v22 = vld [vmem:[%s7165_s6 + $0x1b8] sm:$0xff] }
  0x35   :  { %705 = vmatpush.msrb.mxu0 %v570_v26  ;;  %725 = vmatpush.msrb.mxu1 %v586_v27  ;;  %v985_v26 = vld [vmem:[%s7165_s6 + $0x60] sm:$0xff]  ;;  %v1072_v27 = vld [vmem:[%s7165_s6 + $0xd0] sm:$0xff]  ;;  %v1249_v19 = vld [vmem:[%s7165_s6 + $0x158] sm:$0xff] }
  0x36   :  { %1097 = vmatpush.msra.mxu2 %v1073_v20  ;;  %1011 = vmatpush.msrb.mxu3 %v985_v26  ;;  %v973_v20 = vld [vmem:[%s7165_s6] sm:$0xff] }
  0x37   :  { %706 = vmatpush.msrb.mxu0 %v569_v28  ;;  %726 = vmatpush.msrb.mxu1 %v585_v29  ;;  %v1166_v28 = vld [vmem:[%s7165_s6 + $0x140] sm:$0xff]  ;;  %v1260_v29 = vld [vmem:[%s7165_s6 + $0x1b0] sm:$0xff] }
  0x38   :  { %1098 = vmatpush.msra.mxu2 %v1072_v27 }
  0x39   :  { %707 = vmatpush.msrb.mxu0 %v568_v30  ;;  %727 = vmatpush.msrb.mxu1 %v584_v31  ;;  %v984_v30 = vld [vmem:[%s7165_s6 + $0x58] sm:$0xff]  ;;  %v1071_v31 = vld [vmem:[%s7165_s6 + $0xc8] sm:$0xff] }
  0x3a   :  { %1012 = vmatpush.msrb.mxu3 %v984_v30  ;;  %1099 = vmatpush.msra.mxu2 %v1071_v31  ;;  %v1348_v30 = vld [vmem:[%s7165_s6 + $0x228] sm:$0xff]  ;;  %v1442_v31 = vld [vmem:[%s7165_s6 + $0x298] sm:$0xff] }
  0x3b   :  { %708 = vmatpush.msrb.mxu0 %v567_v32  ;;  %728 = vmatpush.msrb.mxu1 %v583_v33  ;;  %v1165_v32 = vld [vmem:[%s7165_s6 + $0x138] sm:$0xff]  ;;  %v1259_v33 = vld [vmem:[%s7165_s6 + $0x1a8] sm:$0xff] }
  0x3d   :  { %709 = vmatpush.msrb.mxu0 %v566_v34  ;;  %729 = vmatpush.msrb.mxu1 %v582_v35  ;;  %v983_v34 = vld [vmem:[%s7165_s6 + $0x50] sm:$0xff]  ;;  %v1070_v35 = vld [vmem:[%s7165_s6 + $0xc0] sm:$0xff] }
  0x3e   :  { %1013 = vmatpush.msrb.mxu3 %v983_v34  ;;  %1100 = vmatpush.msra.mxu2 %v1070_v35 }
  0x3f   :  { %710 = vmatpush.msrb.mxu0 %v565_v36  ;;  %730 = vmatpush.msrb.mxu1 %v581_v37  ;;  %v1164_v36 = vld [vmem:[%s7165_s6 + $0x130] sm:$0xff]  ;;  %v1258_v37 = vld [vmem:[%s7165_s6 + $0x1a0] sm:$0xff] }
  0x41   :  { %711 = vmatpush.msrb.mxu0 %v564_v38  ;;  %731 = vmatpush.msrb.mxu1 %v580_v40  ;;  %v982_v38 = vld [vmem:[%s7165_s6 + $0x48] sm:$0xff] }
  0x42   :  { %712 = vmatmul.f32.vlgmr.msrb.gmra.mxu0 %v604_v39  ;;  %732 = vmatmul.f32.vlgmr.msrb.gmra.mxu1 %v605_v41  ;;  %v1069_v39 = vld [vmem:[%s7165_s6 + $0xb8] sm:$0xff]  ;;  %v1163_v40 = vld [vmem:[%s7165_s6 + $0x128] sm:$0xff] }
  0x43   :  { %1191 = vmatpush.msra.mxu0 %v1167_v21  ;;  %1285 = vmatpush.msra.mxu1 %v1261_v22  ;;  %v1257_v41 = vld [vmem:[%s7165_s6 + $0x198] sm:$0xff]  ;;  %v1060_v21 = vld [vmem:[%s7165_s6 + $0x70] sm:$0xff]  ;;  %v1154_v22 = vld [vmem:[%s7165_s6 + $0xe0] sm:$0xff] }
  0x44   :  { %1014 = vmatpush.msrb.mxu3 %v982_v38  ;;  %1101 = vmatpush.msra.mxu2 %v1069_v39  ;;  %v1440_v38 = vld [vmem:[%s7165_s6 + $0x288] sm:$0xff] }
  0x45   :  { %1192 = vmatpush.msra.mxu0 %v1166_v28  ;;  %1286 = vmatpush.msra.mxu1 %v1260_v29  ;;  %v1536_v39 = vld [vmem:[%s7165_s6 + $0x308] sm:$0xff] }
  0x47   :  { %1193 = vmatpush.msra.mxu0 %v1165_v32  ;;  %1287 = vmatpush.msra.mxu1 %v1259_v33  ;;  %v1347_v32 = vld [vmem:[%s7165_s6 + $0x220] sm:$0xff] }
  0x49   :  { %1194 = vmatpush.msra.mxu0 %v1164_v36  ;;  %1288 = vmatpush.msra.mxu1 %v1258_v37  ;;  %v1441_v36 = vld [vmem:[%s7165_s6 + $0x290] sm:$0xff]  ;;  %v1346_v37 = vld [vmem:[%s7165_s6 + $0x218] sm:$0xff] }
  0x4b   :  { %1195 = vmatpush.msra.mxu0 %v1163_v40  ;;  %1289 = vmatpush.msra.mxu1 %v1257_v41  ;;  %v1345_v40 = vld [vmem:[%s7165_s6 + $0x210] sm:$0xff] }
  0xab   :  { %v633_v43 = vpop.f32.mrf.mxu0 }
  0xac   :  { %v634_v45 = vadd.f32 %v633_v43, %v598_v42 }
  0xad   :  { %v653_v46 = vpop.f32.mrf.mxu1 }
  0xae   :  { %v654_v47 = vadd.f32 %v653_v46, %v634_v45  ;;  %v981_v45 = vld [vmem:[%s7165_s6 + $0x40] sm:$0xff]  ;;  %v1068_v46 = vld [vmem:[%s7165_s6 + $0xb0] sm:$0xff] }
  0xaf   :  { %v673_v48 = vpop.f32.mrf.mxu2  ;;  %1015 = vmatpush.msrb.mxu3 %v981_v45  ;;  %1102 = vmatpush.msra.mxu2 %v1068_v46 }
  0xb0   :  { %v674_v49 = vadd.f32 %v673_v48, %v654_v47  ;;  %v1162_v47 = vld [vmem:[%s7165_s6 + $0x120] sm:$0xff]  ;;  %v1256_v48 = vld [vmem:[%s7165_s6 + $0x190] sm:$0xff] }
  0xb1   :  { %1196 = vmatpush.msra.mxu0 %v1162_v47  ;;  %1290 = vmatpush.msra.mxu1 %v1256_v48 }
  0xb3   :  { %v693_v50 = vpop.f32.mrf.mxu3 }
  0xb4   :  { %v694_v51 = vadd.f32 %v693_v50, %v674_v49  ;;  %v980_v49 = vld [vmem:[%s7165_s6 + $0x38] sm:$0xff]  ;;  %v1067_v50 = vld [vmem:[%s7165_s6 + $0xa8] sm:$0xff] }
  0xb5   :  { %1016 = vmatpush.msrb.mxu3 %v980_v49  ;;  %1103 = vmatpush.msra.mxu2 %v1067_v50 }
  0xb7   :  { %v753_v55 = vpop.f32.mrf.mxu2 }
  0xbf   :  { %v713_v52 = vpop.f32.mrf.mxu0  ;;  %v733_v53 = vpop.f32.mrf.mxu1 }
  0xc0   :  { %v714_v54 = vadd.f32 %v713_v52, %v694_v51  ;;  %v1161_v51 = vld [vmem:[%s7165_s6 + $0x118] sm:$0xff]  ;;  %v1255_v52 = vld [vmem:[%s7165_s6 + $0x188] sm:$0xff] }
  0xc1   :  { %1197 = vmatpush.msra.mxu0 %v1161_v51  ;;  %1291 = vmatpush.msra.mxu1 %v1255_v52  ;;  %v1439_v51 = vld [vmem:[%s7165_s6 + $0x280] sm:$0xff] }
  0xc2   :  { %v734_v56 = vadd.f32 %v733_v53, %v714_v54  ;;  %v979_v53 = vld [vmem:[%s7165_s6 + $0x30] sm:$0xff]  ;;  %v1066_v54 = vld [vmem:[%s7165_s6 + $0xa0] sm:$0xff] }
  0xc3   :  { %1017 = vmatpush.msrb.mxu3 %v979_v53  ;;  %1104 = vmatpush.msra.mxu2 %v1066_v54  ;;  %v1535_v52 = vld [vmem:[%s7165_s6 + $0x300] sm:$0xff]  ;;  %v1344_v53 = vld [vmem:[%s7165_s6 + $0x208] sm:$0xff]  ;;  %v1438_v54 = vld [vmem:[%s7165_s6 + $0x278] sm:$0xff] }
  0xc4   :  { %v754_v57 = vadd.f32 %v753_v55, %v734_v56  ;;  %v1160_v55 = vld [vmem:[%s7165_s6 + $0x110] sm:$0xff]  ;;  %v1254_v56 = vld [vmem:[%s7165_s6 + $0x180] sm:$0xff] }
  0xc5   :  { %1198 = vmatpush.msra.mxu0 %v1160_v55  ;;  %1292 = vmatpush.msra.mxu1 %v1254_v56  ;;  %v1534_v55 = vld [vmem:[%s7165_s6 + $0x2f8] sm:$0xff]  ;;  %v1343_v56 = vld [vmem:[%s7165_s6 + $0x200] sm:$0xff] }
  0xc6   :  { %v756_v62 = vperm.slane %v754_v57, 0  ;;  %v978_v57 = vld [vmem:[%s7165_s6 + $0x28] sm:$0xff] }
  0xc7   :  { %1018 = vmatpush.msrb.mxu3 %v978_v57 }
  0xc8   :  { %v759_v2 = vadd.f32 %v756_v62, %v487_v58  ;;  %v757_v3 = vadd.f32 %v756_v62, %v485_v59  ;;  %v760_v4 = vadd.f32 %v756_v62, %v488_v60  ;;  %v758_v5 = vadd.f32 %v756_v62, %v486_v61  ;;  %v1065_v58 = vld [vmem:[%s7165_s6 + $0x98] sm:$0xff]  ;;  %v1159_v59 = vld [vmem:[%s7165_s6 + $0x108] sm:$0xff] }
  0xc9   :  { %v761_v6 = vadd.f32 %v756_v62, %v489_v63  ;;  %v762_v7 = vadd.f32 %v756_v62, %v490_v0  ;;  %v763_v11 = vadd.f32 %v756_v62, %v491_v1  ;;  %v1253_v60 = vld [vmem:[%s7165_s6 + $0x178] sm:$0xff]  ;;  %1105 = vmatpush.msra.mxu2 %v1065_v58  ;;  %1199 = vmatpush.msra.mxu0 %v1159_v59  ;;  %v977_v0 = vld [vmem:[%s7165_s6 + $0x20] sm:$0xff]  ;;  %v1064_v1 = vld [vmem:[%s7165_s6 + $0x90] sm:$0xff] }
  0xca   :  { %v766_v8 = vmax.f32 %v759_v2, 0.0  ;;  %v4377_v9 = vmax.f32 %v757_v3, 0.0  ;;  %v765_v10 = vmax.f32 %v758_v5, 0.0  ;;  %v767_v12 = vmax.f32 %v760_v4, 0.0  ;;  %1293 = vmatpush.msra.mxu1 %v1253_v60  ;;  %v1158_v2 = vld [vmem:[%s7165_s6 + $0x100] sm:$0xff]  ;;  %1019 = vmatpush.msrb.mxu3 %v977_v0  ;;  %v1252_v3 = vld [vmem:[%s7165_s6 + $0x170] sm:$0xff] }
  0xcb   :  { %v768_v13 = vmax.f32 %v761_v6, 0.0  ;;  %v769_v14 = vmax.f32 %v762_v7, 0.0  ;;  %v770_v15 = vmax.f32 %v763_v11, 0.0  ;;  %1106 = vmatpush.msra.mxu2 %v1064_v1  ;;  %1200 = vmatpush.msra.mxu0 %v1158_v2  ;;  %v976_v4 = vld [vmem:[%s7165_s6 + $0x18] sm:$0xff]  ;;  %v1063_v5 = vld [vmem:[%s7165_s6 + $0x88] sm:$0xff]  ;;  %v1437_v60 = vld [vmem:[%s7165_s6 + $0x270] sm:$0xff] }
  0xcc   :  { %790 = vrot.lane.b32.xlu1 %v766_v8, %s3975_s22  ;;  %816 = vrot.lane.b32.xlu2 %v4377_v9, %s3976_s23  ;;  %772 = vst.msk [vmem:[#allocation2 + $0x35] sm:$0xff] %vm7181_vm0, %v765_v10  ;;  %v1157_v6 = vld [vmem:[%s7165_s6 + $0xf8] sm:$0xff] }
  0xcd   :  { %786 = vrot.lane.b32.xlu0 %v4377_v9, %s3975_s22  ;;  %773 = vst.msk [vmem:[#allocation2 + $0x3d] sm:$0xff] %vm7181_vm0, %v766_v8  ;;  %1294 = vmatpush.msra.mxu1 %v1252_v3  ;;  %v1436_v3 = vld [vmem:[%s7165_s6 + $0x268] sm:$0xff] }
  0xce   :  { %771 = vst.msk [vmem:[#allocation2 + $0x2d] sm:$0xff] %vm7181_vm0, %v4377_v9  ;;  %1020 = vmatpush.msrb.mxu3 %v976_v4  ;;  %1107 = vmatpush.msra.mxu2 %v1063_v5  ;;  %v1532_v4 = vld [vmem:[%s7165_s6 + $0x2e8] sm:$0xff]  ;;  %v1341_v5 = vld [vmem:[%s7165_s6 + $0x1f0] sm:$0xff] }
  0xcf   :  { %774 = vst.msk [vmem:[#allocation2 + $0x45] sm:$0xff] %vm7181_vm0, %v767_v12  ;;  %1201 = vmatpush.msra.mxu0 %v1157_v6  ;;  %v1435_v6 = vld [vmem:[%s7165_s6 + $0x260] sm:$0xff] }
  0xd4   :  { %792 = vrot.lane.b32.xlu1 %v767_v12, %s3975_s22  ;;  %818 = vrot.lane.b32.xlu2 %v765_v10, %s3976_s23 }
  0xd5   :  { %788 = vrot.lane.b32.xlu0 %v765_v10, %s3975_s22 }
  0xdc   :  { %822 = vrot.lane.b32.xlu1 %v767_v12, %s3976_s23  ;;  %846 = vrot.lane.b32.xlu2 %v4377_v9, %s3977_s1 }
  0xdd   :  { %820 = vrot.lane.b32.xlu0 %v766_v8, %s3976_s23 }
  0xe4   :  { %850 = vrot.lane.b32.xlu1 %v766_v8, %s3977_s1  ;;  %852 = vrot.lane.b32.xlu2 %v767_v12, %s3977_s1 }
  0xe5   :  { %848 = vrot.lane.b32.xlu0 %v765_v10, %s3977_s1 }
  0xec   :  { %878 = vrot.lane.b32.xlu1 %v765_v10, %s3978_s24  ;;  %880 = vrot.lane.b32.xlu2 %v766_v8, %s3978_s24 }
  0xed   :  { %876 = vrot.lane.b32.xlu0 %v4377_v9, %s3978_s24 }
  0xf4   :  { %908 = vrot.lane.b32.xlu1 %v765_v10, %s3979_s25  ;;  %910 = vrot.lane.b32.xlu2 %v766_v8, %s3979_s25 }
  0xf5   :  { %882 = vrot.lane.b32.xlu0 %v767_v12, %s3978_s24 }
  0xfc   :  { %940 = vrot.lane.b32.xlu1 %v766_v8, %s3980_s26  ;;  %942 = vrot.lane.b32.xlu2 %v767_v12, %s3980_s26 }
  0xfd   :  { %912 = vrot.lane.b32.xlu0 %v767_v12, %s3979_s25  ;;  %v975_v12 = vld [vmem:[%s7165_s6 + $0x10] sm:$0xff] }
  0xfe   :  { %1021 = vmatpush.msrb.mxu3 %v975_v12  ;;  %v1530_v12 = vld [vmem:[%s7165_s6 + $0x2d8] sm:$0xff] }
 0x104   :  { %824 = vrot.lane.b32.xlu1 %v768_v13, %s3976_s23  ;;  %854 = vrot.lane.b32.xlu2 %v768_v13, %s3977_s1 }
 0x105   :  { %794 = vrot.lane.b32.xlu0 %v768_v13, %s3975_s22 }
 0x10c   :  { %914 = vrot.lane.b32.xlu1 %v768_v13, %s3979_s25  ;;  %944 = vrot.lane.b32.xlu2 %v768_v13, %s3980_s26 }
 0x10d   :  { %884 = vrot.lane.b32.xlu0 %v768_v13, %s3978_s24  ;;  %v1062_v13 = vld [vmem:[%s7165_s6 + $0x80] sm:$0xff] }
 0x10e   :  { %1108 = vmatpush.msra.mxu2 %v1062_v13 }
 0x114   :  { %826 = vrot.lane.b32.xlu1 %v769_v14, %s3976_s23  ;;  %856 = vrot.lane.b32.xlu2 %v769_v14, %s3977_s1 }
 0x115   :  { %796 = vrot.lane.b32.xlu0 %v769_v14, %s3975_s22 }
 0x11c   :  { %916 = vrot.lane.b32.xlu1 %v769_v14, %s3979_s25  ;;  %946 = vrot.lane.b32.xlu2 %v769_v14, %s3980_s26 }
 0x11d   :  { %886 = vrot.lane.b32.xlu0 %v769_v14, %s3978_s24  ;;  %v1156_v14 = vld [vmem:[%s7165_s6 + $0xf0] sm:$0xff] }
 0x11e   :  { %1202 = vmatpush.msra.mxu0 %v1156_v14  ;;  %v1339_v14 = vld [vmem:[%s7165_s6 + $0x1e0] sm:$0xff] }
 0x124   :  { %918 = vrot.lane.b32.xlu1 %v770_v15, %s3979_s25  ;;  %888 = vrot.lane.b32.xlu2 %v770_v15, %s3978_s24 }
 0x125   :  { %948 = vrot.lane.b32.xlu0 %v770_v15, %s3980_s26 }
 0x126   :  { %v817_v16 = vpop.permute.xlu2 %816 }
 0x12c   :  { %938 = vrot.lane.b32.xlu1 %v765_v10, %s3980_s26  ;;  %906 = vrot.lane.b32.xlu2 %v4377_v9, %s3979_s25  ;;  %v1251_v10 = vld [vmem:[%s7165_s6 + $0x168] sm:$0xff] }
 0x12d   :  { %858 = vrot.lane.b32.xlu0 %v770_v15, %s3977_s1  ;;  %1295 = vmatpush.msra.mxu1 %v1251_v10  ;;  %v1434_v10 = vld [vmem:[%s7165_s6 + $0x258] sm:$0xff] }
 0x12e   :  { %v819_v17 = vpop.permute.xlu2 %818 }
 0x134   :  { %798 = vrot.lane.b32.xlu1 %v770_v15, %s3975_s22 }
 0x135   :  { %828 = vrot.lane.b32.xlu0 %v770_v15, %s3976_s23  ;;  %v1250_v15 = vld [vmem:[%s7165_s6 + $0x160] sm:$0xff] }
 0x136   :  { %v847_v18 = vpop.permute.xlu2 %846  ;;  %1296 = vmatpush.msra.mxu1 %v1250_v15  ;;  %v1433_v15 = vld [vmem:[%s7165_s6 + $0x250] sm:$0xff] }
 0x138   :  { %1297 = vmatpush.msra.mxu1 %v1249_v19  ;;  %v1528_v19 = vld [vmem:[%s7165_s6 + $0x2c8] sm:$0xff] }
 0x13e   :  { %v791_v23 = vpop.permute.xlu1 %790  ;;  %v4442_v24 = vpop.permute.xlu2 %852 }
 0x13f   :  { %810 = vst.msk [vmem:[#allocation2 + $0x36] sm:$0xff] %vm7180_vm3, %v791_v23  ;;  %v787_v25 = vpop.permute.xlu0 %786  ;;  %v1248_v23 = vld [vmem:[%s7165_s6 + $0x150] sm:$0xff] }
 0x140   :  { %808 = vst.msk [vmem:[#allocation2 + $0x26] sm:$0xff] %vm7180_vm3, %v787_v25  ;;  %1298 = vmatpush.msra.mxu1 %v1248_v23 }
 0x141   :  { %838 = vst.msk [vmem:[#allocation2 + $0x1f] sm:$0xff] %vm7179_vm4, %v817_v16  ;;  %v974_v16 = vld [vmem:[%s7165_s6 + $0x8] sm:$0xff] }
 0x142   :  { %868 = vst.msk [vmem:[#allocation2 + $0x18] sm:$0xff] %vm7178_vm5, %v847_v18  ;;  %v1155_v18 = vld [vmem:[%s7165_s6 + $0xe8] sm:$0xff]  ;;  %1022 = vmatpush.msrb.mxu3 %v974_v16  ;;  %v1529_v16 = vld [vmem:[%s7165_s6 + $0x2d0] sm:$0xff] }
 0x143   :  { %1203 = vmatpush.msra.mxu0 %v1155_v18  ;;  %v1432_v18 = vld [vmem:[%s7165_s6 + $0x248] sm:$0xff] }
 0x144   :  { %1023 = vmatpush.msrb.mxu3 %v973_v20  ;;  %v1337_v20 = vld [vmem:[%s7165_s6 + $0x1d0] sm:$0xff] }
 0x145   :  { %1204 = vmatpush.msra.mxu0 %v1154_v22  ;;  %v1527_v22 = vld [vmem:[%s7165_s6 + $0x2c0] sm:$0xff] }
 0x146   :  { %v793_v42 = vpop.permute.xlu1 %792  ;;  %v4496_v43 = vpop.permute.xlu2 %880  ;;  %1372 = vmatpush.msra.mxu3 %v1348_v30  ;;  %v1526_v30 = vld [vmem:[%s7165_s6 + $0x2b8] sm:$0xff] }
 0x147   :  { %811 = vst.msk [vmem:[#allocation2 + $0x3e] sm:$0xff] %vm7180_vm3, %v793_v42  ;;  %v789_v44 = vpop.permute.xlu0 %788  ;;  %1560 = vmatpush.msrb.mxu0 %v1536_v39 }
 0x148   :  { %809 = vst.msk [vmem:[#allocation2 + $0x2e] sm:$0xff] %vm7180_vm3, %v789_v44  ;;  %1373 = vmatpush.msra.mxu3 %v1347_v32  ;;  %v1525_v32 = vld [vmem:[%s7165_s6 + $0x2b0] sm:$0xff] }
 0x149   :  { %839 = vst.msk [vmem:[#allocation2 + $0x27] sm:$0xff] %vm7179_vm4, %v819_v17  ;;  %v1061_v17 = vld [vmem:[%s7165_s6 + $0x78] sm:$0xff]  ;;  %1561 = vmatpush.msrb.mxu0 %v1535_v52 }
 0x14a   :  { %1109 = vmatpush.msra.mxu2 %v1061_v17  ;;  %1374 = vmatpush.msra.mxu3 %v1346_v37  ;;  %v1338_v17 = vld [vmem:[%s7165_s6 + $0x1d8] sm:$0xff] }
 0x14b   :  { %1562 = vmatpush.msrb.mxu0 %v1534_v55 }
 0x14c   :  { %1110 = vmatpush.msra.mxu2 %v1060_v21  ;;  %1375 = vmatpush.msra.mxu3 %v1345_v40  ;;  %v1431_v21 = vld [vmem:[%s7165_s6 + $0x240] sm:$0xff] }
 0x14d   :  { %v1523_v40 = vld [vmem:[%s7165_s6 + $0x2a0] sm:$0xff] }
 0x14e   :  { %v823_v61 = vpop.permute.xlu1 %822  ;;  %v4549_v62 = vpop.permute.xlu2 %910  ;;  %1466 = vmatpush.msrb.mxu2 %v1442_v31  ;;  %1376 = vmatpush.msra.mxu3 %v1344_v53  ;;  %v1430_v31 = vld [vmem:[%s7165_s6 + $0x238] sm:$0xff] }
 0x14f   :  { %841 = vst.msk [vmem:[#allocation2 + $0x37] sm:$0xff] %vm7179_vm4, %v823_v61  ;;  %v821_v63 = vpop.permute.xlu0 %820  ;;  %v1533_v61 = vld [vmem:[%s7165_s6 + $0x2f0] sm:$0xff] }
 0x150   :  { %840 = vst.msk [vmem:[#allocation2 + $0x2f] sm:$0xff] %vm7179_vm4, %v821_v63  ;;  %1467 = vmatpush.msrb.mxu2 %v1441_v36  ;;  %1377 = vmatpush.msra.mxu3 %v1343_v56 }
 0x151   :  { %871 = vst.msk [vmem:[#allocation2 + $0x30] sm:$0xff] %vm7178_vm5, %v4442_v24  ;;  %1563 = vmatpush.msrb.mxu0 %v1533_v61 }
 0x152   :  { %1468 = vmatpush.msrb.mxu2 %v1440_v38 }
 0x153   :  { %1564 = vmatpush.msrb.mxu0 %v1532_v4 }
 0x154   :  { %1469 = vmatpush.msrb.mxu2 %v1439_v51 }
 0x156   :  { %v851_v7 = vpop.permute.xlu1 %850  ;;  %v943_v8 = vpop.permute.xlu2 %942  ;;  %1470 = vmatpush.msrb.mxu2 %v1438_v54 }
 0x157   :  { %870 = vst.msk [vmem:[#allocation2 + $0x28] sm:$0xff] %vm7178_vm5, %v851_v7  ;;  %v849_v11 = vpop.permute.xlu0 %848  ;;  %v1531_v7 = vld [vmem:[%s7165_s6 + $0x2e0] sm:$0xff] }
 0x158   :  { %869 = vst.msk [vmem:[#allocation2 + $0x20] sm:$0xff] %vm7178_vm5, %v849_v11  ;;  %1471 = vmatpush.msrb.mxu2 %v1437_v60  ;;  %1565 = vmatpush.msrb.mxu0 %v1531_v7 }
 0x159   :  { %900 = vst.msk [vmem:[#allocation2 + $0x21] sm:$0xff] %vm7177_vm6, %v4496_v43 }
 0x15a   :  { %1472 = vmatpush.msrb.mxu2 %v1436_v3  ;;  %1566 = vmatpush.msrb.mxu0 %v1530_v12 }
 0x15c   :  { %1473 = vmatpush.msrb.mxu2 %v1435_v6  ;;  %1567 = vmatpush.msrb.mxu0 %v1529_v16 }
 0x15e   :  { %v879_v24 = vpop.permute.xlu1 %878  ;;  %v855_v25 = vpop.permute.xlu2 %854  ;;  %1474 = vmatpush.msrb.mxu2 %v1434_v10  ;;  %1568 = vmatpush.msrb.mxu0 %v1528_v19 }
 0x15f   :  { %899 = vst.msk [vmem:[#allocation2 + $0x19] sm:$0xff] %vm7177_vm6, %v879_v24  ;;  %v877_v26 = vpop.permute.xlu0 %876 }
 0x160   :  { %898 = vst.msk [vmem:[#allocation2 + $0x11] sm:$0xff] %vm7177_vm6, %v877_v26  ;;  %1475 = vmatpush.msrb.mxu2 %v1433_v15  ;;  %1569 = vmatpush.msrb.mxu0 %v1527_v22 }
 0x161   :  { %930 = vst.msk [vmem:[#allocation2 + $0x1a] sm:$0xff] %vm7176_vm7, %v4549_v62  ;;  %v1342_v62 = vld [vmem:[%s7165_s6 + $0x1f8] sm:$0xff] }
 0x162   :  { %1378 = vmatpush.msra.mxu3 %v1342_v62  ;;  %1476 = vmatpush.msrb.mxu2 %v1432_v18 }
 0x163   :  { %1570 = vmatpush.msrb.mxu0 %v1526_v30 }
 0x164   :  { %1379 = vmatpush.msra.mxu3 %v1341_v5  ;;  %1477 = vmatpush.msrb.mxu2 %v1431_v21 }
 0x165   :  { %1571 = vmatpush.msrb.mxu0 %v1525_v32 }
 0x166   :  { %v909_v27 = vpop.permute.xlu1 %908  ;;  %v945_v28 = vpop.permute.xlu2 %944  ;;  %1478 = vmatpush.msrb.mxu2 %v1430_v31 }
 0x167   :  { %929 = vst.msk [vmem:[#allocation2 + $0x12] sm:$0xff] %vm7176_vm7, %v909_v27  ;;  %v883_v29 = vpop.permute.xlu0 %882 }
 0x168   :  { %901 = vst.msk [vmem:[#allocation2 + $0x29] sm:$0xff] %vm7177_vm6, %v883_v29  ;;  %v1336_v29 = vld [vmem:[%s7165_s6 + $0x1c8] sm:$0xff] }
 0x16e   :  { %v941_v33 = vpop.permute.xlu1 %940  ;;  %v857_v34 = vpop.permute.xlu2 %856 }
 0x16f   :  { %960 = vst.msk [vmem:[#allocation2 + $0x13] sm:$0xff] %vm7175_vm8, %v941_v33  ;;  %v913_v35 = vpop.permute.xlu0 %912  ;;  %v1335_v33 = vld [vmem:[%s7165_s6 + $0x1c0] sm:$0xff] }
 0x170   :  { %931 = vst.msk [vmem:[#allocation2 + $0x22] sm:$0xff] %vm7176_vm7, %v913_v35  ;;  %v1429_v35 = vld [vmem:[%s7165_s6 + $0x230] sm:$0xff] }
 0x171   :  { %961 = vst.msk [vmem:[#allocation2 + $0x1b] sm:$0xff] %vm7175_vm8, %v943_v8  ;;  %v1340_v8 = vld [vmem:[%s7165_s6 + $0x1e8] sm:$0xff]  ;;  %1479 = vmatpush.msrb.mxu2 %v1429_v35 }
 0x172   :  { %1380 = vmatpush.msra.mxu3 %v1340_v8  ;;  %v50_v8 = vlaneseq }
 0x174   :  { %1381 = vmatpush.msra.mxu3 %v1339_v14  ;;  %v4815_v10 = vshrl.u32 %v50_v8, 7 }
 0x176   :  { %v825_v41 = vpop.permute.xlu1 %824  ;;  %v4652_v42 = vpop.permute.xlu2 %946  ;;  %1382 = vmatpush.msra.mxu3 %v1338_v17  ;;  %v61_v14 = vand.u32 65535, %v4815_v10  ;;  %v62_v15 = vshrl.u32 %v4815_v10, 16  ;;  %v4823_v19 = vadd.s32 8, %v4815_v10  ;;  %v4832_v32 = vadd.s32 16, %v4815_v10 }
 0x177   :  { %v795_v43 = vpop.permute.xlu0 %794 }
 0x178   :  { %v966_v44 = vld [vmem:[#allocation2 + $0x15] sm:$0xff]  ;;  %812 = vst.msk [vmem:[#allocation2 + $0x46] sm:$0xff] %vm7180_vm3, %v795_v43  ;;  %1383 = vmatpush.msra.mxu3 %v1337_v20  ;;  %v65_v16 = vmul.u32 37449, %v61_v14  ;;  %v64_v21 = vmul.u32 9362, %v61_v14  ;;  %v66_v22 = vmul.u32 9362, %v62_v15 }
 0x179   :  { %v1053_v45 = vld [vmem:[#allocation2 + $0x16] sm:$0xff]  ;;  %842 = vst.msk [vmem:[#allocation2 + $0x3f] sm:$0xff] %vm7179_vm4, %v825_v41  ;;  %3782 = vmatmul.msk.f32.vlgmr.msrb.gmra.mxu3 %vm7174_vm1, %v966_v44 }
 0x17a   :  { %v1147_v46 = vld [vmem:[#allocation2 + $0x17] sm:$0xff]  ;;  %3789 = vmatmul.msk.f32.vlgmr.msra.gmra.mxu2 %vm7174_vm1, %v1053_v45  ;;  %872 = vst.msk [vmem:[#allocation2 + $0x38] sm:$0xff] %vm7178_vm5, %v855_v25  ;;  %1384 = vmatpush.msra.mxu3 %v1336_v29  ;;  %v3981_v29 = vmov 0  }
 0x17b   :  { %v1241_v47 = vld [vmem:[#allocation2 + $0x18] sm:$0xff]  ;;  %3796 = vmatmul.msk.f32.vlgmr.msra.gmra.mxu0 %vm7174_vm1, %v1147_v46 }
 0x17c   :  { %3803 = vmatmul.msk.f32.vlgmr.msra.gmra.mxu1 %vm7174_vm1, %v1241_v47  ;;  %1385 = vmatpush.msra.mxu3 %v1335_v33 }
 0x17e   :  { %v915_v48 = vpop.permute.xlu1 %914  ;;  %v889_v49 = vpop.permute.xlu2 %888 }
 0x17f   :  { %v885_v50 = vpop.permute.xlu0 %884 }
 0x180   :  { %902 = vst.msk [vmem:[#allocation2 + $0x31] sm:$0xff] %vm7177_vm6, %v885_v50 }
 0x181   :  { %932 = vst.msk [vmem:[#allocation2 + $0x2a] sm:$0xff] %vm7176_vm7, %v915_v48 }
 0x182   :  { %962 = vst.msk [vmem:[#allocation2 + $0x23] sm:$0xff] %vm7175_vm8, %v945_v28 }
 0x186   :  { %v827_v57 = vpop.permute.xlu1 %826  ;;  %v907_v58 = vpop.permute.xlu2 %906 }
 0x187   :  { %v797_v59 = vpop.permute.xlu0 %796  ;;  %843 = vst.msk [vmem:[#allocation2 + $0x47] sm:$0xff] %vm7179_vm4, %v827_v57  ;;  %v1328_v57 = vld [vmem:[#allocation2 + $0x19] sm:$0xff] }
 0x188   :  { %873 = vst.msk [vmem:[#allocation2 + $0x40] sm:$0xff] %vm7178_vm5, %v857_v34  ;;  %v1524_v34 = vld [vmem:[%s7165_s6 + $0x2a8] sm:$0xff]  ;;  %v1422_v58 = vld [vmem:[#allocation2 + $0x1a] sm:$0xff] }
 0x189   :  { %v967_v63 = vld [vmem:[#allocation2 + $0x1d] sm:$0xff]  ;;  %905 = vst.msk [vmem:[#allocation2 + $0x41] sm:$0x1] %vm7170_vm9, %v889_v49  ;;  %1572 = vmatpush.msrb.mxu0 %v1524_v34 }
 0x18a   :  { %v1054_v0 = vld [vmem:[#allocation2 + $0x1e] sm:$0xff]  ;;  %3783 = vmatmul.msk.f32.gmra.mxu3 %vm7174_vm1, %v967_v63 }
 0x18b   :  { %v1148_v1 = vld [vmem:[#allocation2 + $0x1f] sm:$0xff]  ;;  %3790 = vmatmul.msk.f32.gmra.mxu2 %vm7174_vm1, %v1054_v0  ;;  %1573 = vmatpush.msrb.mxu0 %v1523_v40 }
 0x18c   :  { %v1242_v2 = vld [vmem:[#allocation2 + $0x20] sm:$0xff]  ;;  %3797 = vmatmul.msk.f32.gmra.mxu0 %vm7174_vm1, %v1148_v1 }
 0x18d   :  { %3804 = vmatmul.msk.f32.gmra.mxu1 %vm7174_vm1, %v1242_v2  ;;  %v1516_v59 = vld [vmem:[#allocation2 + $0x1b] sm:$0xff]  ;;  %v1517_v62 = vld [vmem:[#allocation2 + $0x23] sm:$0xff] }
 0x18e   :  { %v917_v11 = vpop.permute.xlu1 %916  ;;  %v1329_v60 = vld [vmem:[#allocation2 + $0x21] sm:$0xff]  ;;  %v1334_v17 = vld [vmem:[#allocation2 + $0x49] sm:$0x1]  ;;  %v1428_v18 = vld [vmem:[#allocation2 + $0x4a] sm:$0x1] }
 0x18f   :  { %v887_v13 = vpop.permute.xlu0 %886  ;;  %v972_v53 = vld [vmem:[#allocation2 + $0x45] sm:$0x1]  ;;  %v1059_v54 = vld [vmem:[#allocation2 + $0x46] sm:$0x1]  ;;  %v1153_v56 = vld [vmem:[#allocation2 + $0x47] sm:$0x1] }
 0x190   :  { %903 = vst.msk [vmem:[#allocation2 + $0x39] sm:$0xff] %vm7177_vm6, %v887_v13  ;;  %v1423_v61 = vld [vmem:[#allocation2 + $0x22] sm:$0xff]  ;;  %v1522_v20 = vld [vmem:[#allocation2 + $0x4b] sm:$0x1] }
 0x191   :  { %933 = vst.msk [vmem:[#allocation2 + $0x32] sm:$0xff] %vm7176_vm7, %v917_v11 }
 0x192   :  { %963 = vst.msk [vmem:[#allocation2 + $0x2b] sm:$0xff] %vm7175_vm8, %v4652_v42 }
 0x196   :  { %v919_v23 = vpop.permute.xlu1 %918 }
 0x197   :  { %935 = vst.msk [vmem:[#allocation2 + $0x3a] sm:$0x1] %vm7171_vm10, %v919_v23  ;;  %v949_v24 = vpop.permute.xlu0 %948  ;;  %v971_v49 = vld [vmem:[#allocation2 + $0x3d] sm:$0xff]  ;;  %v68_v23 = vshll.u32 %v65_v16, 16 }
 0x198   :  { %965 = vst.msk [vmem:[#allocation2 + $0x33] sm:$0x1] %vm7172_vm11, %v949_v24  ;;  %v1058_v50 = vld [vmem:[#allocation2 + $0x3e] sm:$0xff]  ;;  %v93_v24 = vand.u32 65535, %v4823_v19 }
 0x199   :  { %v968_v25 = vld [vmem:[#allocation2 + $0x25] sm:$0xff]  ;;  %v1520_v7 = vld [vmem:[#allocation2 + $0x3b] sm:$0xff]  ;;  %vm72_vm13 = vc.u32 %v64_v21, %v68_v23 }
 0x19a   :  { %v1055_v26 = vld [vmem:[#allocation2 + $0x26] sm:$0xff]  ;;  %3784 = vmatmul.msk.f32.gmra.mxu3 %vm7174_vm1, %v968_v25  ;;  %v70_v25 = vshll.u32 %v66_v22, 16  ;;  %v73_v30 = vsel %vm72_vm13, 1, %v3981_v29  ;;  %v97_v31 = vmul.u32 37449, %v93_v24 }
 0x19b   :  { %v1149_v27 = vld [vmem:[#allocation2 + $0x27] sm:$0xff]  ;;  %3791 = vmatmul.msk.f32.gmra.mxu2 %vm7174_vm1, %v1055_v26  ;;  %v1152_v51 = vld [vmem:[#allocation2 + $0x3f] sm:$0xff]  ;;  %v74_v26 = vadd.s32 %v68_v23, %v64_v21 }
 0x19c   :  { %v1243_v28 = vld [vmem:[#allocation2 + $0x28] sm:$0xff]  ;;  %3798 = vmatmul.msk.f32.gmra.mxu0 %vm7174_vm1, %v1149_v27  ;;  %v1246_v52 = vld [vmem:[#allocation2 + $0x40] sm:$0xff]  ;;  %v67_v27 = vmul.u32 37449, %v62_v15 }
 0x19d   :  { %3805 = vmatmul.msk.f32.gmra.mxu1 %vm7174_vm1, %v1243_v28  ;;  %v1330_v63 = vld [vmem:[#allocation2 + $0x29] sm:$0xff]  ;;  %v94_v28 = vshrl.u32 %v4823_v19, 16  ;;  %vm76_vm14 = vc.u32 %v74_v26, %v70_v25  ;;  %v78_v40 = vadd.s32 %v74_v26, %v70_v25 }
 0x19e   :  { %v939_v36 = vpop.permute.xlu1 %938  ;;  %v970_v45 = vld [vmem:[#allocation2 + $0x35] sm:$0xff]  ;;  %v1424_v0 = vld [vmem:[#allocation2 + $0x2a] sm:$0xff]  ;;  %v75_v33 = vadd.s32 %v73_v30, %v67_v27  ;;  %v77_v35 = vsel %vm76_vm14, 1, %v3981_v29 }
 0x19f   :  { %v859_v37 = vpop.permute.xlu0 %858  ;;  %v969_v38 = vld [vmem:[#allocation2 + $0x2d] sm:$0xff]  ;;  %v1057_v46 = vld [vmem:[#allocation2 + $0x36] sm:$0xff]  ;;  %v4834_v34 = vmul.u32 9362, %v94_v28  ;;  %v96_v36 = vmul.u32 9362, %v93_v24  ;;  %vm82_vm13 = vc.u32 %v78_v40, 2454267026 }
 0x1a0   :  { %875 = vst.msk [vmem:[#allocation2 + $0x48] sm:$0x1] %vm7173_vm12, %v859_v37  ;;  %v1056_v39 = vld [vmem:[#allocation2 + $0x2e] sm:$0xff]  ;;  %v1151_v47 = vld [vmem:[#allocation2 + $0x37] sm:$0xff]  ;;  %v100_v37 = vshll.u32 %v97_v31, 16 }
 0x1a1   :  { %v1150_v41 = vld [vmem:[#allocation2 + $0x2f] sm:$0xff]  ;;  %v1245_v48 = vld [vmem:[#allocation2 + $0x38] sm:$0xff] }
 0x1a2   :  { %3785 = vmatmul.msk.f32.gmra.mxu3 %vm7174_vm1, %v969_v38  ;;  %v1244_v42 = vld [vmem:[#allocation2 + $0x30] sm:$0xff]  ;;  %v1426_v5 = vld [vmem:[#allocation2 + $0x3a] sm:$0xff]  ;;  %v125_v38 = vand.u32 65535, %v4832_v32  ;;  %vm104_vm15 = vc.u32 %v96_v36, %v100_v37 }
 0x1a3   :  { %3792 = vmatmul.msk.f32.gmra.mxu2 %vm7174_vm1, %v1056_v39  ;;  %v1518_v1 = vld [vmem:[#allocation2 + $0x2b] sm:$0xff]  ;;  %v1519_v4 = vld [vmem:[#allocation2 + $0x33] sm:$0xff]  ;;  %v69_v39 = vshrl.u32 %v65_v16, 16 }
 0x1a4   :  { %3799 = vmatmul.msk.f32.gmra.mxu0 %vm7174_vm1, %v1150_v41  ;;  %v1425_v2 = vld [vmem:[#allocation2 + $0x32] sm:$0xff]  ;;  %v79_v41 = vadd.s32 %v77_v35, %v75_v33 }
 0x1a5   :  { %3806 = vmatmul.msk.f32.gmra.mxu1 %vm7174_vm1, %v1244_v42  ;;  %v1331_v3 = vld [vmem:[#allocation2 + $0x31] sm:$0xff]  ;;  %v1332_v6 = vld [vmem:[#allocation2 + $0x39] sm:$0xff]  ;;  %v102_v42 = vshll.u32 %v4834_v34, 16 }
 0x1a6   :  { %v799_v43 = vpop.permute.xlu1 %798 }
 0x1a7   :  { %v829_v44 = vpop.permute.xlu0 %828  ;;  %v1247_v55 = vld [vmem:[#allocation2 + $0x48] sm:$0x1]  ;;  %v126_v43 = vshrl.u32 %v4832_v32, 16 }
 0x1a8   :  { %v1333_v11 = vld [vmem:[#allocation2 + $0x41] sm:$0xff]  ;;  %v106_v44 = vadd.s32 %v100_v37, %v96_v36 }
 0x1a9   :  { %v1427_v12 = vld [vmem:[#allocation2 + $0x42] sm:$0xff] }
 0x1aa   :  { %3786 = vmatmul.msk.f32.gmra.mxu3 %vm7174_vm1, %v970_v45  ;;  %v1521_v13 = vld [vmem:[#allocation2 + $0x43] sm:$0xff]  ;;  %v4840_v45 = vmul.u32 37449, %v125_v38  ;;  %vm108_vm14 = vc.u32 %v106_v44, %v102_v42 }
 0x1ab   :  { %3793 = vmatmul.msk.f32.gmra.mxu2 %vm7174_vm1, %v1057_v46  ;;  %v4843_v46 = vadd.s32 24, %v4815_v10 }
 0x1ac   :  { %3800 = vmatmul.msk.f32.gmra.mxu0 %vm7174_vm1, %v1151_v47  ;;  %v71_v47 = vshrl.u32 %v66_v22, 16 }
 0x1ad   :  { %3807 = vmatmul.msk.f32.gmra.mxu1 %vm7174_vm1, %v1245_v48  ;;  %v99_v48 = vmul.u32 37449, %v94_v28 }
 0x1b2   :  { %3787 = vmatmul.msk.f32.gmra.mxu3 %vm7174_vm1, %v971_v49  ;;  %v80_v49 = vadd.s32 %v79_v41, %v69_v39  ;;  %v4889_v41 = vadd.s32 40, %v4815_v10 }
 0x1b3   :  { %3794 = vmatmul.msk.f32.gmra.mxu2 %vm7174_vm1, %v1058_v50  ;;  %v105_v50 = vsel %vm104_vm15, 1, %v3981_v29 }
 0x1b4   :  { %3801 = vmatmul.msk.f32.gmra.mxu0 %vm7174_vm1, %v1152_v51  ;;  %v4846_v51 = vmul.u32 9362, %v126_v43 }
 0x1b5   :  { %3808 = vmatmul.msk.f32.gmra.mxu1 %vm7174_vm1, %v1246_v52  ;;  %v128_v52 = vmul.u32 9362, %v125_v38 }
 0x1ba   :  { %3788 = vmatmul.msk.f32.gmra.mxu3 %vm7174_vm1, %v972_v53  ;;  %v132_v53 = vshll.u32 %v4840_v45, 16 }
 0x1bb   :  { %3795 = vmatmul.msk.f32.gmra.mxu2 %vm7174_vm1, %v1059_v54  ;;  %v157_v54 = vand.u32 65535, %v4843_v46 }
 0x1bc   :  { %3802 = vmatmul.msk.f32.gmra.mxu0 %vm7174_vm1, %v1153_v56  ;;  %v107_v56 = vadd.s32 %v105_v50, %v99_v48  ;;  %vm136_vm15 = vc.u32 %v128_v52, %v132_v53 }
 0x1bd   :  { %3809 = vmatmul.msk.f32.gmra.mxu1 %vm7174_vm1, %v1247_v55  ;;  %v4851_v55 = vadd.s32 32, %v4815_v10 }
 0x1bf   :  { %v190_v15 = vshrl.u32 %v4851_v55, 16 }
 0x1c1   :  { %v4878_v27 = vmul.u32 9362, %v190_v15  ;;  %v195_v50 = vmul.u32 37449, %v190_v15 }
 0x1c2   :  { %3810 = vmatmul.msk.f32.vlgmr.msra.gmra.mxu3 %vm7174_vm1, %v1328_v57  ;;  %v81_v57 = vadd.s32 %v80_v49, %v71_v47 }
 0x1c3   :  { %3817 = vmatmul.msk.f32.vlgmr.msrb.gmra.mxu2 %vm7174_vm1, %v1422_v58  ;;  %v83_v58 = vsel %vm82_vm13, 1, %v3981_v29 }
 0x1c4   :  { %3824 = vmatmul.msk.f32.vlgmr.msrb.gmra.mxu0 %vm7174_vm1, %v1516_v59 }
 0x1ca   :  { %3811 = vmatmul.msk.f32.gmra.mxu3 %vm7174_vm1, %v1329_v60  ;;  %v109_v60 = vsel %vm108_vm14, 1, %v3981_v29 }
 0x1cb   :  { %3818 = vmatmul.msk.f32.gmra.mxu2 %vm7174_vm1, %v1423_v61  ;;  %v134_v61 = vshll.u32 %v4846_v51, 16 }
 0x1cc   :  { %3825 = vmatmul.msk.f32.gmra.mxu0 %vm7174_vm1, %v1517_v62  ;;  %v138_v62 = vadd.s32 %v132_v53, %v128_v52 }
 0x1ce   :  { %vm140_vm13 = vc.u32 %v138_v62, %v134_v61  ;;  %v142_v35 = vadd.s32 %v138_v62, %v134_v61 }
 0x1cf   :  { %v141_v22 = vsel %vm140_vm13, 1, %v3981_v29 }
 0x1d2   :  { %3812 = vmatmul.msk.f32.gmra.mxu3 %vm7174_vm1, %v1330_v63  ;;  %v158_v63 = vshrl.u32 %v4843_v46, 16 }
 0x1d3   :  { %3819 = vmatmul.msk.f32.gmra.mxu2 %vm7174_vm1, %v1424_v0  ;;  %v4859_v0 = vmul.u32 37449, %v157_v54 }
 0x1d4   :  { %3826 = vmatmul.msk.f32.gmra.mxu0 %vm7174_vm1, %v1518_v1  ;;  %v189_v1 = vand.u32 65535, %v4851_v55  ;;  %v163_v36 = vmul.u32 37449, %v158_v63 }
 0x1d5   :  { %v164_v14 = vshll.u32 %v4859_v0, 16  ;;  %v165_v61 = vshrl.u32 %v4859_v0, 16 }
 0x1d6   :  { %v4871_v16 = vmul.u32 37449, %v189_v1  ;;  %v192_v26 = vmul.u32 9362, %v189_v1  ;;  %v222_v1 = vshrl.u32 %v4889_v41, 16 }
 0x1d8   :  { %v196_v28 = vshll.u32 %v4871_v16, 16 }
 0x1da   :  { %3813 = vmatmul.msk.f32.gmra.mxu3 %vm7174_vm1, %v1331_v3  ;;  %v111_v3 = vadd.s32 %v109_v60, %v107_v56  ;;  %vm200_vm2 = vc.u32 %v192_v26, %v196_v28 }
 0x1db   :  { %3820 = vmatmul.msk.f32.gmra.mxu2 %vm7174_vm1, %v1425_v2  ;;  %v101_v2 = vshrl.u32 %v97_v31, 16  ;;  %v133_v31 = vshrl.u32 %v4840_v45, 16  ;;  %v135_v45 = vshrl.u32 %v4846_v51, 16  ;;  %v201_v53 = vsel %vm200_vm2, 1, %v3981_v29 }
 0x1dc   :  { %3827 = vmatmul.msk.f32.gmra.mxu0 %vm7174_vm1, %v1519_v4  ;;  %v131_v4 = vmul.u32 37449, %v126_v43  ;;  %v202_v43 = vadd.s32 %v196_v28, %v192_v26 }
 0x1e2   :  { %3814 = vmatmul.msk.f32.gmra.mxu3 %vm7174_vm1, %v1332_v6  ;;  %v110_v6 = vadd.s32 %v106_v44, %v102_v42  ;;  %v198_v42 = vshll.u32 %v4878_v27, 16 }
 0x1e3   :  { %3821 = vmatmul.msk.f32.gmra.mxu2 %vm7174_vm1, %v1426_v5  ;;  %v84_v5 = vadd.s32 %v83_v58, %v81_v57 }
 0x1e4   :  { %3828 = vmatmul.msk.f32.gmra.mxu0 %vm7174_vm1, %v1520_v7  ;;  %v137_v7 = vsel %vm136_vm15, 1, %v3981_v29  ;;  %vm114_vm14 = vc.u32 %v110_v6, 2454267026  ;;  %v4910_v6 = vadd.s32 48, %v4815_v10  ;;  %v206_v28 = vadd.s32 %v202_v43, %v198_v42 }
 0x1e5   :  { %v85_v23 = vshrl.u32 %v84_v5, 2 }
 0x1e7   :  { %v86_v37 = vmul.u32 7, %v85_v23 }
 0x1e9   :  { %v87_v56 = vsub.s32 %v4815_v10, %v86_v37  ;;  %v253_v10 = vand.u32 65535, %v4910_v6  ;;  %v254_v37 = vshrl.u32 %v4910_v6, 16 }
 0x1ea   :  { %3815 = vmatmul.msk.f32.gmra.mxu3 %vm7174_vm1, %v1333_v11 }
 0x1eb   :  { %3822 = vmatmul.msk.f32.gmra.mxu2 %vm7174_vm1, %v1427_v12  ;;  %v160_v12 = vmul.u32 9362, %v157_v54  ;;  %v221_v54 = vand.u32 65535, %v4889_v41  ;;  %vm282_vm2 = vcmp.ne.s32.totalorder %v87_v56, 0 }
 0x1ec   :  { %3829 = vmatmul.msk.f32.gmra.mxu0 %vm7174_vm1, %v1521_v13  ;;  %v4867_v13 = vmul.u32 9362, %v158_v63  ;;  %v203_v63 = vadd.s32 %v201_v53, %v195_v50  ;;  %v4937_v50 = vmul.u32 9362, %v254_v37 }
 0x1ed   :  { %vm168_vm15 = vc.u32 %v160_v12, %v164_v14  ;;  %v170_v25 = vadd.s32 %v164_v14, %v160_v12  ;;  %v4907_v5 = vmul.u32 37449, %v221_v54 }
 0x1ee   :  { %v166_v24 = vshll.u32 %v4867_v13, 16  ;;  %v169_v40 = vsel %vm168_vm15, 1, %v3981_v29  ;;  %vm204_vm15 = vc.u32 %v202_v43, %v198_v42  ;;  %v167_v0 = vshrl.u32 %v4867_v13, 16 }
 0x1ef   :  { %v171_v49 = vadd.s32 %v169_v40, %v163_v36  ;;  %v228_v23 = vshll.u32 %v4907_v5, 16  ;;  %v4930_v40 = vmul.u32 37449, %v253_v10  ;;  %v227_v42 = vmul.u32 37449, %v222_v1 }
 0x1f0   :  { %vm172_vm13 = vc.u32 %v170_v25, %v166_v24  ;;  %v174_v51 = vadd.s32 %v170_v25, %v166_v24  ;;  %v303_v24 = vadd.s32 7, %v87_v56 }
 0x1f1   :  { %v173_v52 = vsel %vm172_vm13, 1, %v3981_v29  ;;  %vm289_vm13 = vcmp.lt.s32.totalorder %v87_v56, 0 }
 0x1f2   :  { %3816 = vmatmul.msk.f32.gmra.mxu3 %vm7174_vm1, %v1334_v17  ;;  %v103_v17 = vshrl.u32 %v4834_v34, 16  ;;  %v115_v34 = vsel %vm114_vm14, 1, %v3981_v29  ;;  %vm146_vm14 = vc.u32 %v142_v35, 2454267026  ;;  %v175_v62 = vadd.s32 %v173_v52, %v171_v49 }
 0x1f3   :  { %3823 = vmatmul.msk.f32.gmra.mxu2 %vm7174_vm1, %v1428_v18  ;;  %v112_v18 = vadd.s32 %v111_v3, %v101_v2  ;;  %v147_v60 = vsel %vm146_vm14, 1, %v3981_v29  ;;  %vm178_vm14 = vc.u32 %v174_v51, 2454267026  ;;  %v256_v49 = vmul.u32 9362, %v253_v10 }
 0x1f4   :  { %3830 = vmatmul.msk.f32.gmra.mxu0 %vm7174_vm1, %v1522_v20  ;;  %v139_v20 = vadd.s32 %v137_v7, %v131_v4  ;;  %v205_v4 = vsel %vm204_vm15, 1, %v3981_v29  ;;  %v176_v14 = vadd.s32 %v175_v62, %v165_v61  ;;  %vm296_vm15 = vmand %vm289_vm13, %vm282_vm2  ;;  %v179_v26 = vsel %vm178_vm14, 1, %v3981_v29 }
 0x1f5   :  { %v113_v30 = vadd.s32 %v112_v18, %v103_v17  ;;  %v197_v17 = vshrl.u32 %v4871_v16, 16  ;;  %v207_v18 = vadd.s32 %v205_v4, %v203_v63  ;;  %v199_v16 = vshrl.u32 %v4878_v27, 16 }
 0x1f6   :  { %v143_v33 = vadd.s32 %v141_v22, %v139_v20  ;;  %v4916_v20 = vmul.u32 9362, %v222_v1  ;;  %v224_v22 = vmul.u32 9362, %v221_v54  ;;  %vm210_vm14 = vc.u32 %v206_v28, 2454267026 }
 0x1f7   :  { %v116_v44 = vadd.s32 %v115_v34, %v113_v30  ;;  %v177_v30 = vadd.s32 %v176_v14, %v167_v0  ;;  %v260_v52 = vshll.u32 %v4930_v40, 16  ;;  %v262_v4 = vshll.u32 %v4937_v50, 16 }
 0x1f8   :  { %v4854_v59 = vpop.f32.mrf.mxu0  ;;  %v144_v47 = vadd.s32 %v143_v33, %v133_v31  ;;  %v208_v31 = vadd.s32 %v207_v18, %v197_v17  ;;  %v230_v33 = vshll.u32 %v4916_v20, 16  ;;  %vm232_vm9 = vc.u32 %v224_v22, %v228_v23 }
 0x1f9   :  { %v117_v57 = vshrl.u32 %v116_v44, 2  ;;  %v234_v36 = vadd.s32 %v228_v23, %v224_v22  ;;  %v180_v43 = vadd.s32 %v179_v26, %v177_v30  ;;  %v259_v17 = vmul.u32 37449, %v254_v37 }
 0x1fa   :  { %v145_v58 = vadd.s32 %v144_v47, %v135_v45  ;;  %v209_v44 = vadd.s32 %v208_v31, %v199_v16  ;;  %v233_v47 = vsel %vm232_vm9, 1, %v3981_v29  ;;  %vm264_vm9 = vc.u32 %v256_v49, %v260_v52 }
 0x1fb   :  { %v118_v7 = vmul.u32 7, %v117_v57  ;;  %vm236_vm10 = vc.u32 %v234_v36, %v230_v33  ;;  %v181_v51 = vshrl.u32 %v180_v43, 2  ;;  %v265_v23 = vsel %vm264_vm9, 1, %v3981_v29 }
 0x1fc   :  { %v4863_v8 = vpop.f32.mrf.mxu3  ;;  %v148_v12 = vadd.s32 %v147_v60, %v145_v58  ;;  %v235_v58 = vadd.s32 %v233_v47, %v227_v42  ;;  %v237_v61 = vsel %vm236_vm10, 1, %v3981_v29  ;;  %v231_v28 = vshrl.u32 %v4916_v20, 16 }
 0x1fd   :  { %v4865_v11 = vpop.f32.mrf.mxu2  ;;  %v119_v25 = vsub.s32 %v4823_v19, %v118_v7  ;;  %v4932_v19 = vsel %vm296_vm15, %v303_v24, %v87_v56  ;;  %v211_v56 = vsel %vm210_vm14, 1, %v3981_v29  ;;  %v266_v7 = vadd.s32 %v260_v52, %v256_v49 }
 0x1fe   :  { %v149_v13 = vshrl.u32 %v148_v12, 2  ;;  %v317_v53 = vadd.s32 4294967293, %v4932_v19  ;;  %v345_v54 = vadd.s32 4294967294, %v4932_v19  ;;  %v212_v62 = vadd.s32 %v211_v56, %v209_v44 }
 0x1ff   :  { %vm283_vm2 = vcmp.ne.s32.totalorder %v119_v25, 0  ;;  %vm290_vm13 = vcmp.lt.s32.totalorder %v119_v25, 0  ;;  %v304_v57 = vadd.s32 7, %v119_v25  ;;  %v373_v12 = vadd.s32 4294967295, %v4932_v19 }
 0x200   :  { %v150_v27 = vmul.u32 7, %v149_v13  ;;  %vm297_vm15 = vmand %vm290_vm13, %vm283_vm2  ;;  %vm324_vm14 = vcmp.ge.s32.totalorder %v317_v53, 0  ;;  %vm331_vm11 = vcmp.lt.s32.totalorder %v317_v53, 7  ;;  %vm352_vm12 = vcmp.ge.s32.totalorder %v345_v54, 0 }
 0x201   :  { %v4953_v0 = vsel %vm297_vm15, %v304_v57, %v119_v25  ;;  %v239_v14 = vadd.s32 %v237_v61, %v235_v58  ;;  %v182_v18 = vmul.u32 7, %v181_v51  ;;  %vm359_vm13 = vcmp.lt.s32.totalorder %v345_v54, 7  ;;  %vm4961_vm8 = vmand %vm324_vm14, %vm331_vm11 }
 0x202   :  { %v151_v60 = vsub.s32 %v4832_v32, %v150_v27  ;;  %v229_v32 = vshrl.u32 %v4907_v5, 16  ;;  %v213_v10 = vshrl.u32 %v212_v62, 2  ;;  %v238_v24 = vadd.s32 %v234_v36, %v230_v33  ;;  %vm4974_vm7 = vmand %vm352_vm12, %vm359_vm13 }
 0x203   :  { %vm268_vm1 = vc.u32 %v266_v7, %v262_v4  ;;  %v7288_v25 = vmov 0  ;;  %v4966_v5 = vadd.s32 4294967295, %v4953_v0  ;;  %v267_v16 = vadd.s32 %v265_v23, %v259_v17 }
 0x204   :  { %vm284_vm10 = vcmp.ne.s32.totalorder %v151_v60, 0  ;;  %vm291_vm2 = vcmp.lt.s32.totalorder %v151_v60, 0  ;;  %v7289_v25 = vsel %vm4961_vm8, 4294967295, %v7288_v25  ;;  %v305_v13 = vadd.s32 7, %v151_v60 }
 0x205   :  { %7290 = vst [vmem:[#allocation6_spill] sm:$0xff] %v7289_v25  ;;  %vm4968_vm15 = vmand %vm291_vm2, %vm284_vm10  ;;  %v240_v30 = vadd.s32 %v239_v14, %v229_v32  ;;  %vm380_vm9 = vcmp.ge.s32.totalorder %v373_v12, 0  ;;  %v7293_v31 = vmov 0  ;;  %v183_v33 = vsub.s32 %v4843_v46, %v182_v18 }
 0x206   :  { %v7294_v31 = vsel %vm4974_vm7, 4294967295, %v7293_v31  ;;  %v269_v36 = vsel %vm268_vm1, 1, %v3981_v29  ;;  %vm387_vm11 = vcmp.lt.s32.totalorder %v373_v12, 7  ;;  %v318_v37 = vadd.s32 4294967293, %v4953_v0 }
 0x207   :  { %7295 = vst [vmem:[#allocation7_spill] sm:$0xff] %v7294_v31  ;;  %v214_v42 = vmul.u32 7, %v213_v10  ;;  %vm242_vm14 = vc.u32 %v238_v24, 2454267026  ;;  %v1046_v43 = vsel %vm4961_vm8, %v4863_v8, 0.0  ;;  %v4992_v46 = vsel %vm4968_vm15, %v305_v13, %v151_v60  ;;  %vm5004_vm13 = vmand %vm380_vm9, %vm387_vm11 }
 0x208   :  { %v1133_v44 = vsel %vm4974_vm7, %v4865_v11, 0.0  ;;  %v241_v47 = vadd.s32 %v240_v30, %v231_v28  ;;  %v261_v49 = vshrl.u32 %v4930_v40, 16  ;;  %v271_v52 = vadd.s32 %v269_v36, %v267_v16 }
 0x209   :  { %v4874_v21 = vpop.f32.mrf.mxu0  ;;  %v346_v53 = vadd.s32 4294967294, %v4953_v0  ;;  %vm285_vm1 = vcmp.ne.s32.totalorder %v183_v33, 0  ;;  %vm292_vm2 = vcmp.lt.s32.totalorder %v183_v33, 0  ;;  %v243_v8 = vsel %vm242_vm14, 1, %v3981_v29 }
 0x20a   :  { %v7296_v56 = vmov 0  ;;  %vm325_vm15 = vcmp.ge.s32.totalorder %v318_v37, 0  ;;  %v319_v11 = vadd.s32 4294967293, %v4992_v46  ;;  %v215_v40 = vsub.s32 %v4851_v55, %v214_v42  ;;  %vm5014_vm14 = vmand %vm292_vm2, %vm285_vm1 }
 0x20b   :  { %v7297_v56 = vsel %vm5004_vm13, 4294967295, %v7296_v56  ;;  %v270_v57 = vadd.s32 %v266_v7, %v262_v4  ;;  %v1140_v58 = vadd.f32 %v1133_v44, %v1046_v43  ;;  %vm332_vm6 = vcmp.lt.s32.totalorder %v318_v37, 7  ;;  %v1300_v4 = vpop.f32.mrf.mxu1 }
 0x20c   :  { %v5011_v60 = vadd.s32 4294967295, %v4992_v46  ;;  %v306_v51 = vadd.s32 7, %v183_v33  ;;  %v347_v61 = vadd.s32 4294967294, %v4992_v46  ;;  %v244_v12 = vadd.s32 %v243_v8, %v241_v47  ;;  %vm5029_vm2 = vmand %vm325_vm15, %vm332_vm6 }
 0x20d   :  { %v4883_v38 = vpop.f32.mrf.mxu3  ;;  %v263_v32 = vshrl.u32 %v4937_v50, 16  ;;  %v272_v14 = vadd.s32 %v271_v52, %v261_v49  ;;  %v1227_v55 = vsel %vm5004_vm13, %v4854_v59, 0.0  ;;  %vm353_vm9 = vcmp.ge.s32.totalorder %v346_v53, 0 }
 0x20e   :  { %v4885_v39 = vpop.f32.mrf.mxu2  ;;  %vm360_vm11 = vcmp.lt.s32.totalorder %v346_v53, 7  ;;  %v401_v7 = vadd.s32 1, %v4932_v19  ;;  %vm286_vm4 = vcmp.ne.s32.totalorder %v215_v40, 0  ;;  %vm293_vm3 = vcmp.lt.s32.totalorder %v215_v40, 0 }
 0x20f   :  { %vm274_vm1 = vc.u32 %v270_v57, 2454267026  ;;  %v1234_v23 = vadd.f32 %v1227_v55, %v1140_v58  ;;  %v7300_v50 = vmov 0  ;;  %vm333_vm10 = vcmp.lt.s32.totalorder %v319_v11, 7  ;;  %vm5042_vm5 = vmand %vm353_vm9, %vm360_vm11 }
 0x210   :  { %v7301_v50 = vsel %vm5029_vm2, 4294967295, %v7300_v50  ;;  %v5037_v59 = vsel %vm5014_vm14, %v306_v51, %v183_v33  ;;  %v429_v10 = vadd.s32 2, %v4932_v19  ;;  %v7302_v24 = vmov 0  ;;  %vm300_vm15 = vmand %vm293_vm3, %vm286_vm4 }
 0x211   :  { %v7303_v24 = vsel %vm5042_vm5, 4294967295, %v7302_v24  ;;  %v307_v13 = vadd.s32 7, %v215_v40  ;;  %v245_v26 = vshrl.u32 %v244_v12, 2  ;;  %v273_v28 = vadd.s32 %v272_v14, %v263_v32 }
 0x212   :  { %7304 = vst [vmem:[#allocation8_spill] sm:$0xff] %v7303_v24  ;;  %v275_v30 = vsel %vm274_vm1, 1, %v3981_v29  ;;  %v457_v16 = vadd.s32 3, %v4932_v19  ;;  %vm408_vm14 = vcmp.ge.s32.totalorder %v401_v7, 0  ;;  %vm415_vm0 = vcmp.lt.s32.totalorder %v401_v7, 7 }
 0x213   :  { %vm7305_vm9 = vcmp.lt.s32.totalorder %v4966_v5, 7  ;;  %vm7306_vm11 = vcmp.ge.s32.totalorder %v4966_v5, 0  ;;  %v7307_v36 = vmov 0  ;;  %v5060_v37 = vadd.s32 4294967295, %v5037_v59  ;;  %vm5072_vm1 = vmand %vm408_vm14, %vm415_vm0 }
 0x214   :  { %vm5055_vm12 = vmand %vm7306_vm11, %vm7305_vm9  ;;  %v320_v42 = vadd.s32 4294967293, %v5037_v59  ;;  %v348_v29 = vadd.s32 4294967294, %v5037_v59  ;;  %v1047_v19 = vsel %vm5029_vm2, %v4883_v38, 0.0  ;;  %v1134_v5 = vsel %vm5042_vm5, %v4885_v39, 0.0  ;;  %v1303_v38 = vpop.f32.mrf.mxu1 }
 0x215   :  { %v7308_v36 = vsel %vm5055_vm12, 4294967295, %v7307_v36  ;;  %vm443_vm4 = vcmp.lt.s32.totalorder %v429_v10, 7  ;;  %v5070_v43 = vsel %vm300_vm15, %v307_v13, %v215_v40  ;;  %v246_v44 = vmul.u32 7, %v245_v26 }
 0x216   :  { %v276_v47 = vadd.s32 %v275_v30, %v273_v28  ;;  %v7309_v49 = vmov 0  ;;  %v1321_v52 = vadd.f32 %v1300_v4, %v1234_v23  ;;  %v1228_v53 = vsel %vm5055_vm12, %v4874_v21, 0.0  ;;  %v5136_v30 = vld [vmem:[%s7168_s9] ss:$0 sm:$0xff] }
 0x217   :  { %v7310_v49 = vsel %vm5072_vm1, 4294967295, %v7309_v49  ;;  %vm7312_vm9 = vcmp.ge.s32.totalorder %v319_v11, 0  ;;  %v7313_v39 = vmov 0  ;;  %vm471_vm6 = vcmp.lt.s32.totalorder %v457_v16, 7 }
 0x218   :  { %7311 = vst [vmem:[#allocation9_spill] sm:$0xff] %v7310_v49  ;;  %vm5081_vm11 = vmand %vm7312_vm9, %vm333_vm10  ;;  %v402_v8 = vadd.s32 1, %v4953_v0  ;;  %v1141_v40 = vadd.f32 %v1134_v5, %v1047_v19  ;;  %vm7315_vm2 = vcmp.ge.s32.totalorder %v429_v10, 0  ;;  %v7316_v21 = vmov 0 }
 0x219   :  { %v4893_v48 = vpop.f32.mrf.mxu0  ;;  %v7314_v39 = vsel %vm5081_vm11, 4294967295, %v7313_v39  ;;  %vm5088_vm5 = vmand %vm7315_vm2, %vm443_vm4  ;;  %vm7318_vm10 = vcmp.lt.s32.totalorder %v347_v61, 7  ;;  %vm7319_vm9 = vcmp.ge.s32.totalorder %v347_v61, 0  ;;  %v7320_v58 = vmov 0 }
 0x21a   :  { %v7317_v21 = vsel %vm5088_vm5, 4294967295, %v7316_v21  ;;  %vm5094_vm12 = vmand %vm7319_vm9, %vm7318_vm10  ;;  %v5101_v51 = vadd.s32 4294967295, %v5070_v43  ;;  %v430_v12 = vadd.s32 2, %v4953_v0  ;;  %v5107_v32 = vadd.s32 4294967293, %v5070_v43 }
 0x21b   :  { %v7321_v58 = vsel %vm5094_vm12, 4294967295, %v7320_v58  ;;  %v247_v61 = vsub.s32 %v4889_v41, %v246_v44  ;;  %v277_v14 = vshrl.u32 %v276_v47, 2  ;;  %vm7322_vm2 = vcmp.ge.s32.totalorder %v457_v16, 0 }
 0x21c   :  { %vm5112_vm4 = vmand %vm7322_vm2, %vm471_vm6  ;;  %v7323_v55 = vmov 0  ;;  %v458_v23 = vadd.s32 3, %v4953_v0  ;;  %v1235_v13 = vadd.f32 %v1228_v53, %v1141_v40  ;;  %vm7325_vm15 = vcmp.lt.s32.totalorder %v5011_v60, 7 }
 0x21d   :  { %v4902_v2 = vpop.f32.mrf.mxu3  ;;  %v7324_v55 = vsel %vm5112_vm4, 4294967295, %v7323_v55  ;;  %vm7326_vm0 = vcmp.ge.s32.totalorder %v5011_v60, 0  ;;  %v7327_v41 = vmov 0  ;;  %v349_v28 = vadd.s32 4294967294, %v5070_v43 }
 0x21e   :  { %v4904_v3 = vpop.f32.mrf.mxu2  ;;  %vm5125_vm3 = vmand %vm7326_vm0, %vm7325_vm15  ;;  %v1048_v26 = vsel %vm5081_vm11, %v4902_v2, 0.0  ;;  %vm7329_vm6 = vcmp.lt.s32.totalorder %v320_v42, 7  ;;  %vm7330_vm15 = vcmp.ge.s32.totalorder %v320_v42, 0  ;;  %v7331_v16 = vmov 0 }
 0x21f   :  { %v7328_v41 = vsel %vm5125_vm3, 4294967295, %v7327_v41  ;;  %v1135_v60 = vsel %vm5094_vm12, %v4904_v3, 0.0  ;;  %vm5143_vm0 = vmand %vm7330_vm15, %vm7329_vm6  ;;  %v278_v19 = vmul.u32 7, %v277_v14  ;;  %vm7333_vm11 = vcmp.lt.s32.totalorder %v402_v8, 7  ;;  %v1306_v3 = vpop.f32.mrf.mxu1 }
 0x220   :  { %v7332_v16 = vsel %vm5143_vm0, 4294967295, %v7331_v16  ;;  %v7335_v44 = vmov 0  ;;  %vm7337_vm6 = vcmp.lt.s32.totalorder %v348_v29, 7  ;;  %vm7338_vm15 = vcmp.ge.s32.totalorder %v348_v29, 0 }
 0x221   :  { %v4913_v15 = vpop.f32.mrf.mxu0  ;;  %vm5157_vm12 = vmand %vm7338_vm15, %vm7337_vm6  ;;  %v7339_v42 = vmov 0  ;;  %v1142_v47 = vadd.f32 %v1135_v60, %v1048_v26  ;;  %v7344_v29 = vmov 0  ;;  %vm7346_vm2 = vcmp.ne.s32.totalorder %v247_v61, 0 }
 0x222   :  { %v7340_v42 = vsel %vm5157_vm12, 4294967295, %v7339_v42  ;;  %vm7347_vm14 = vcmp.lt.s32.totalorder %v247_v61, 0  ;;  %v279_v14 = vsub.s32 %v4910_v6, %v278_v19  ;;  %vm7350_vm15 = vcmask 130048  }
 0x223   :  { %vm5175_vm10 = vmand %vm7347_vm14, %vm7346_vm2  ;;  %vm7351_vm14 = vcmp.lt.s32.totalorder %v458_v23, 7  ;;  %vm7352_vm2 = vcmp.ge.s32.totalorder %v458_v23, 0  ;;  %v459_v6 = vadd.s32 3, %v4992_v46  ;;  %v7357_v26 = vmov 0 }
 0x224   :  { %vm5191_vm6 = vmand %vm7352_vm2, %vm7351_vm14  ;;  %vm7355_vm2 = vcmp.lt.s32.totalorder %v5060_v37, 7 }
 0x225   :  { %v4925_v34 = vpop.f32.mrf.mxu3  ;;  %vm466_vm14 = vcmp.ge.s32.totalorder %v459_v6, 0 }
 0x226   :  { %v4927_v35 = vpop.f32.mrf.mxu2 }
 0x229   :  { %v4934_v45 = vpop.f32.mrf.mxu0 }
 0x22d   :  { %v4947_v63 = vpop.f32.mrf.mxu3 }
 0x22e   :  { %v4949_v1 = vpop.f32.mrf.mxu2 }
 0x231   :  { %v4956_v22 = vpop.f32.mrf.mxu0 }
 0x235   :  { %v4981_v27 = vpop.f32.mrf.mxu3 }
 0x236   :  { %v4983_v20 = vpop.f32.mrf.mxu2 }
 0x239   :  { %v5000_v54 = vpop.f32.mrf.mxu0 }
 0x23d   :  { %v5023_v17 = vpop.f32.mrf.mxu3 }
 0x23e   :  { %v5025_v18 = vpop.f32.mrf.mxu2 }
 0x241   :  { %v1575_v33 = vpop.f32.mrf.mxu0 }
 0x242   :  { %v1596_v2 = vsel %vm5112_vm4, %v1575_v33, 0.0  ;;  %v403_v33 = vadd.s32 1, %v4992_v46  ;;  %vm7368_vm4 = vcmp.ge.s32.totalorder %v349_v28, 0 }
 0x245   :  { %v1387_v57 = vpop.f32.mrf.mxu3 }
 0x246   :  { %v1481_v11 = vpop.f32.mrf.mxu2  ;;  %v1408_v62 = vsel %vm5072_vm1, %v1387_v57, 0.0 }
 0x247   :  { %v1415_v4 = vadd.f32 %v1408_v62, %v1321_v52  ;;  %v1502_v7 = vsel %vm5088_vm5, %v1481_v11, 0.0  ;;  %vm7334_vm5 = vcmp.ge.s32.totalorder %v402_v8, 0  ;;  %v308_v52 = vadd.s32 7, %v247_v61 }
 0x248   :  { %vm5151_vm1 = vmand %vm7334_vm5, %vm7333_vm11  ;;  %v1322_v8 = vadd.f32 %v1303_v38, %v1235_v13  ;;  %vm7342_vm5 = vcmp.lt.s32.totalorder %v430_v12, 7  ;;  %vm7343_vm11 = vcmp.ge.s32.totalorder %v430_v12, 0  ;;  %v431_v62 = vadd.s32 2, %v4992_v46 }
 0x249   :  { %v5119_v10 = vpop.f32.mrf.mxu0  ;;  %v1509_v0 = vadd.f32 %v1502_v7, %v1415_v4  ;;  %v7336_v44 = vsel %vm5151_vm1, 4294967295, %v7335_v44  ;;  %vm5168_vm9 = vmand %vm7343_vm11, %vm7342_vm5  ;;  %v1229_v12 = vsel %vm5125_vm3, %v4893_v48, 0.0  ;;  %v7353_v4 = vmov 0 }
 0x24a   :  { %v7345_v29 = vsel %vm5168_vm9, 4294967295, %v7344_v29  ;;  %v7354_v4 = vsel %vm5191_vm6, 4294967295, %v7353_v4  ;;  %v1236_v23 = vadd.f32 %v1229_v12, %v1142_v47  ;;  %vm7356_vm5 = vcmp.ge.s32.totalorder %v5060_v37, 0 }
 0x24b   :  { %v1603_v5 = vadd.f32 %v1596_v2, %v1509_v0  ;;  %vm5210_vm11 = vmand %vm7356_vm5, %vm7355_vm2  ;;  %v1049_v46 = vsel %vm5143_vm0, %v4925_v34, 0.0  ;;  %v5219_v0 = vsel %vm5175_vm10, %v308_v52, %v247_v61  ;;  %v1136_v2 = vsel %vm5157_vm12, %v4927_v35, 0.0 }
 0x24c   :  { %v7358_v26 = vsel %vm5210_vm11, 4294967295, %v7357_v26  ;;  %vm7360_vm5 = vcmp.ge.s32.totalorder %v5107_v32, 0  ;;  %v7361_v37 = vmov 0  ;;  %v1597_v34 = vsel %vm5191_vm6, %v5119_v10, 0.0 }
 0x24d   :  { %v5164_v53 = vadd.f32 %v5136_v30, %v1603_v5  ;;  %v1390_v40 = vpop.f32.mrf.mxu3  ;;  %v322_v61 = vadd.s32 4294967293, %v5219_v0  ;;  %vm288_vm0 = vcmp.ne.s32.totalorder %v279_v14, 0  ;;  %vm7363_vm12 = vcmp.lt.s32.totalorder %v403_v33, 7 }
 0x24e   :  { %v1484_v57 = vpop.f32.mrf.mxu2  ;;  %v1409_v38 = vsel %vm5151_vm1, %v1390_v40, 0.0  ;;  %vm7364_vm3 = vcmp.ge.s32.totalorder %v403_v33, 0  ;;  %v7365_v35 = vmov 0  ;;  %vm473_vm10 = vcmp.lt.s32.totalorder %v459_v6, 7 }
 0x24f   :  { %7341 = vst [vmem:[#allocation10_spill] sm:$0xff] %v5164_v53  ;;  %v1416_v7 = vadd.f32 %v1409_v38, %v1322_v8  ;;  %1691 = vrot.lane.b32.xlu2 %v5164_v53, %s3977_s1  ;;  %1663 = vrot.lane.b32.xlu0 %v5164_v53, %s3976_s23  ;;  %v1503_v48 = vsel %vm5168_vm9, %v1484_v57, 0.0  ;;  %vm295_vm9 = vcmp.lt.s32.totalorder %v279_v14, 0  ;;  %vm5238_vm1 = vmand %vm7364_vm3, %vm7363_vm12  ;;  %v404_v10 = vadd.s32 1, %v5037_v59  ;;  %v1309_v57 = vpop.f32.mrf.mxu1 }
 0x250   :  { %1621 = vst.msk [vmem:[#allocation2 + $0x2d] sm:$0xff] %vm7350_vm15, %v5164_v53  ;;  %1635 = vrot.lane.b32.xlu1 %v5164_v53, %s3975_s22  ;;  %vm7359_vm15 = vcmp.lt.s32.totalorder %v5107_v32, 7  ;;  %v7366_v35 = vsel %vm5238_vm1, 4294967295, %v7365_v35  ;;  %v7369_v32 = vmov 0  ;;  %v1143_v5 = vadd.f32 %v1136_v2, %v1049_v46 }
 0x251   :  { %v5202_v13 = vpop.f32.mrf.mxu0  ;;  %v1510_v60 = vadd.f32 %v1503_v48, %v1416_v7  ;;  %vm5228_vm2 = vmand %vm7360_vm5, %vm7359_vm15  ;;  %vm7367_vm5 = vcmp.lt.s32.totalorder %v349_v28, 7  ;;  %v309_v47 = vadd.s32 7, %v279_v14  ;;  %v1323_v52 = vadd.f32 %v1306_v3, %v1236_v23 }
 0x252   :  { %v7362_v37 = vsel %vm5228_vm2, 4294967295, %v7361_v37  ;;  %vm5245_vm13 = vmand %vm7368_vm4, %vm7367_vm5  ;;  %vm7372_vm12 = vcmp.lt.s32.totalorder %v431_v62, 7  ;;  %vm7373_vm3 = vcmp.ge.s32.totalorder %v431_v62, 0  ;;  %v7374_v40 = vmov 0 }
 0x253   :  { %v1604_v19 = vadd.f32 %v1597_v34, %v1510_v60  ;;  %v7370_v32 = vsel %vm5245_vm13, 4294967295, %v7369_v32  ;;  %vm5255_vm15 = vmand %vm7373_vm3, %vm7372_vm12  ;;  %v5260_v11 = vadd.s32 4294967295, %v5219_v0  ;;  %v350_v38 = vadd.s32 4294967294, %v5219_v0 }
 0x254   :  { %v7375_v40 = vsel %vm5255_vm15, 4294967295, %v7374_v40  ;;  %vm5265_vm4 = vmand %vm295_vm9, %vm288_vm0  ;;  %v432_v62 = vadd.s32 2, %v5037_v59  ;;  %v1230_v7 = vsel %vm5210_vm11, %v4913_v15, 0.0  ;;  %vm7378_vm3 = vcmask 130048  }
 0x255   :  { %v5251_v33 = vadd.f32 %v5136_v30, %v1604_v19  ;;  %v1393_v8 = vpop.f32.mrf.mxu3  ;;  %vm5279_vm9 = vmand %vm466_vm14, %vm473_vm10  ;;  %v7379_v48 = vmov 0  ;;  %v460_v46 = vadd.s32 3, %v5037_v59  ;;  %vm418_vm14 = vcmp.lt.s32.totalorder %v404_v10, 7 }
 0x256   :  { %v1487_v28 = vpop.f32.mrf.mxu2  ;;  %v1410_v3 = vsel %vm5238_vm1, %v1393_v8, 0.0  ;;  %v7380_v48 = vsel %vm5279_vm9, 4294967295, %v7379_v48  ;;  %v1237_v6 = vadd.f32 %v1230_v7, %v1143_v5  ;;  %v1050_v2 = vsel %vm5228_vm2, %v4947_v63, 0.0 }
 0x257   :  { %7371 = vst [vmem:[#allocation11_spill] sm:$0xff] %v5251_v33  ;;  %v1417_v23 = vadd.f32 %v1410_v3, %v1323_v52  ;;  %1719 = vrot.lane.b32.xlu0 %v5164_v53, %s3978_s24  ;;  %1637 = vrot.lane.b32.xlu2 %v5251_v33, %s3975_s22  ;;  %v1504_v15 = vsel %vm5255_vm15, %v1487_v28, 0.0  ;;  %v5297_v34 = vsel %vm5265_vm4, %v309_v47, %v279_v14  ;;  %vm7381_vm10 = vcmp.lt.s32.totalorder %v5101_v51, 7 }
 0x258   :  { %1622 = vst.msk [vmem:[#allocation2 + $0x35] sm:$0xff] %vm7378_vm3, %v5251_v33  ;;  %1665 = vrot.lane.b32.xlu1 %v5251_v33, %s3976_s23  ;;  %vm7382_vm3 = vcmp.ge.s32.totalorder %v5101_v51, 0  ;;  %v7383_v59 = vmov 0  ;;  %v1137_v5 = vsel %vm5245_vm13, %v4949_v1, 0.0  ;;  %v1598_v63 = vsel %vm5279_vm9, %v5202_v13, 0.0 }
 0x259   :  { %v1584_v60 = vpop.f32.mrf.mxu0  ;;  %v1511_v19 = vadd.f32 %v1504_v15, %v1417_v23  ;;  %vm5303_vm5 = vmand %vm7382_vm3, %vm7381_vm10  ;;  %vm439_vm12 = vcmp.ge.s32.totalorder %v432_v62, 0  ;;  %vm446_vm4 = vcmp.lt.s32.totalorder %v432_v62, 7  ;;  %vm357_vm0 = vcmp.ge.s32.totalorder %v350_v38, 0 }
 0x25a   :  { %v7384_v59 = vsel %vm5303_vm5, 4294967295, %v7383_v59  ;;  %vm364_vm2 = vcmp.lt.s32.totalorder %v350_v38, 7  ;;  %v323_v14 = vadd.s32 4294967293, %v5297_v34  ;;  %vm7385_vm15 = vcmp.ge.s32.totalorder %v404_v10, 0 }
 0x25b   :  { %v1605_v47 = vadd.f32 %v1598_v63, %v1511_v19  ;;  %vm5315_vm10 = vmand %vm7385_vm15, %vm418_vm14  ;;  %v7386_v51 = vmov 0  ;;  %vm7388_vm3 = vcmp.lt.s32.totalorder %v322_v61, 7  ;;  %vm7389_vm11 = vcmp.ge.s32.totalorder %v322_v61, 0 }
 0x25c   :  { %v7387_v51 = vsel %vm5315_vm10, 4294967295, %v7386_v51  ;;  %vm5321_vm1 = vmand %vm7389_vm11, %vm7388_vm3  ;;  %v7390_v1 = vmov 0  ;;  %vm467_vm13 = vcmp.ge.s32.totalorder %v460_v46, 0  ;;  %vm474_vm9 = vcmp.lt.s32.totalorder %v460_v46, 7 }
 0x25d   :  { %v7391_v1 = vsel %vm5321_vm1, 4294967295, %v7390_v1  ;;  %v405_v13 = vadd.s32 1, %v5070_v43  ;;  %v1144_v52 = vadd.f32 %v1137_v5, %v1050_v2  ;;  %v5327_v8 = vadd.f32 %v5136_v30, %v1605_v47  ;;  %v1396_v10 = vpop.f32.mrf.mxu3  ;;  %vm5330_vm15 = vmand %vm439_vm12, %vm446_vm4 }
 0x25e   :  { %v1324_v28 = vadd.f32 %v1309_v57, %v1237_v6  ;;  %v7393_v12 = vmov 0  ;;  %v1490_v61 = vpop.f32.mrf.mxu2  ;;  %vm385_vm11 = vcmp.ge.s32.totalorder %v5260_v11, 0  ;;  %vm392_vm14 = vcmp.lt.s32.totalorder %v5260_v11, 7  ;;  %vm5338_vm3 = vmand %vm357_vm0, %vm364_vm2 }
 0x25f   :  { %7392 = vst [vmem:[#allocation12_spill] sm:$0xff] %v5327_v8  ;;  %v7394_v12 = vsel %vm5330_vm15, 4294967295, %v7393_v12  ;;  %v7395_v3 = vmov 0  ;;  %v1411_v57 = vsel %vm5315_vm10, %v1396_v10, 0.0  ;;  %v433_v62 = vadd.s32 2, %v5070_v43  ;;  %vm5353_vm2 = vmand %vm467_vm13, %vm474_vm9  ;;  %1693 = vrot.lane.b32.xlu0 %v5251_v33, %s3977_s1  ;;  %1667 = vrot.lane.b32.xlu2 %v5327_v8, %s3976_s23 }
 0x260   :  { %v7396_v3 = vsel %vm5338_vm3, 4294967295, %v7395_v3  ;;  %v1231_v7 = vsel %vm5303_vm5, %v4934_v45, 0.0  ;;  %v351_v23 = vadd.s32 4294967294, %v5297_v34  ;;  %vm7397_vm4 = vcmask 130048   ;;  %v1312_v45 = vpop.f32.mrf.mxu1  ;;  %1721 = vrot.lane.b32.xlu1 %v5251_v33, %s3978_s24 }
 0x261   :  { %1623 = vst.msk [vmem:[#allocation2 + $0x3d] sm:$0xff] %vm7397_vm4, %v5327_v8  ;;  %v7398_v38 = vmov 0  ;;  %v1418_v15 = vadd.f32 %v1411_v57, %v1324_v28  ;;  %v1505_v6 = vsel %vm5330_vm15, %v1490_v61, 0.0  ;;  %v461_v2 = vadd.s32 3, %v5070_v43  ;;  %vm5373_vm4 = vmand %vm385_vm11, %vm392_vm14 }
 0x262   :  { %v7399_v38 = vsel %vm5353_vm2, 4294967295, %v7398_v38  ;;  %v1238_v46 = vadd.f32 %v1231_v7, %v1144_v52  ;;  %v1051_v19 = vsel %vm5321_vm1, %v4981_v27, 0.0  ;;  %vm337_vm0 = vcmp.lt.s32.totalorder %v323_v14, 7  ;;  %v1587_v52 = vpop.f32.mrf.mxu0 }
 0x263   :  { %v1512_v5 = vadd.f32 %v1505_v6, %v1418_v15  ;;  %v7400_v63 = vmov 0  ;;  %v1138_v43 = vsel %vm5338_vm3, %v4983_v20, 0.0  ;;  %v1599_v47 = vsel %vm5353_vm2, %v1584_v60, 0.0 }
 0x264   :  { %v7401_v63 = vsel %vm5373_vm4, 4294967295, %v7400_v63  ;;  %vm440_vm12 = vcmp.ge.s32.totalorder %v433_v62, 0  ;;  %vm447_vm13 = vcmp.lt.s32.totalorder %v433_v62, 7  ;;  %v379_v27 = vadd.s32 4294967295, %v5297_v34 }
 0x265   :  { %vm358_vm9 = vcmp.ge.s32.totalorder %v351_v23, 0  ;;  %vm365_vm1 = vcmp.lt.s32.totalorder %v351_v23, 7  ;;  %v1606_v28 = vadd.f32 %v1599_v47, %v1512_v5  ;;  %vm7402_vm15 = vcmp.lt.s32.totalorder %v405_v13, 7  ;;  %v1399_v7 = vpop.f32.mrf.mxu3 }
 0x266   :  { %vm7403_vm11 = vcmp.ge.s32.totalorder %v405_v13, 0  ;;  %v7404_v11 = vmov 0  ;;  %vm7406_vm5 = vcmp.ge.s32.totalorder %v323_v14, 0  ;;  %v7407_v20 = vmov 0  ;;  %v1493_v14 = vpop.f32.mrf.mxu2 }
 0x267   :  { %vm5385_vm14 = vmand %vm7403_vm11, %vm7402_vm15  ;;  %vm468_vm2 = vcmp.ge.s32.totalorder %v461_v2, 0  ;;  %vm475_vm3 = vcmp.lt.s32.totalorder %v461_v2, 7  ;;  %v406_v60 = vadd.s32 1, %v5219_v0  ;;  %v1145_v10 = vadd.f32 %v1138_v43, %v1051_v19  ;;  %1723 = vrot.lane.b32.xlu2 %v5327_v8, %s3978_s24  ;;  %1639 = vrot.lane.b32.xlu0 %v5327_v8, %s3975_s22 }
 0x268   :  { %v7405_v11 = vsel %vm5385_vm14, 4294967295, %v7404_v11  ;;  %vm5390_vm10 = vmand %vm7406_vm5, %vm337_vm0  ;;  %v5396_v61 = vadd.f32 %v5136_v30, %v1606_v28  ;;  %v1325_v57 = vadd.f32 %v1312_v45, %v1238_v46  ;;  %v7411_v13 = vmov 0  ;;  %1749 = vrot.lane.b32.xlu1 %v5251_v33, %s3979_s25  ;;  %v1315_v47 = vpop.f32.mrf.mxu1 }
 0x269   :  { %v7408_v20 = vsel %vm5390_vm10, 4294967295, %v7407_v20  ;;  %vm5399_vm15 = vmand %vm440_vm12, %vm447_vm13  ;;  %v7413_v23 = vmov 0  ;;  %v1412_v15 = vsel %vm5385_vm14, %v1399_v7, 0.0  ;;  %v434_v6 = vadd.s32 2, %v5219_v0 }
 0x26a   :  { %7409 = vst [vmem:[#allocation13_spill] sm:$0xff] %v7408_v20  ;;  %v7412_v13 = vsel %vm5399_vm15, 4294967295, %v7411_v13  ;;  %vm5403_vm5 = vmand %vm358_vm9, %vm365_vm1  ;;  %v1232_v45 = vsel %vm5373_vm4, %v4956_v22, 0.0  ;;  %vm386_vm0 = vcmp.ge.s32.totalorder %v379_v27, 0  ;;  %vm7415_vm12 = vcmask 130048  }
 0x26b   :  { %7410 = vst [vmem:[#allocation14_spill] sm:$0xff] %v5396_v61  ;;  %v7414_v23 = vsel %vm5403_vm5, 4294967295, %v7413_v23  ;;  %vm5416_vm13 = vmand %vm468_vm2, %vm475_vm3  ;;  %v7416_v62 = vmov 0  ;;  %v1419_v46 = vadd.f32 %v1412_v15, %v1325_v57  ;;  %v1506_v19 = vsel %vm5399_vm15, %v1493_v14, 0.0 }
 0x26c   :  { %1624 = vst.msk [vmem:[#allocation2 + $0x45] sm:$0xff] %vm7415_vm12, %v5396_v61  ;;  %v7417_v62 = vsel %vm5416_vm13, 4294967295, %v7416_v62  ;;  %v462_v22 = vadd.s32 3, %v5219_v0  ;;  %vm413_vm1 = vcmp.ge.s32.totalorder %v406_v60, 0  ;;  %vm420_vm3 = vcmp.lt.s32.totalorder %v406_v60, 7 }
 0x26d   :  { %7418 = vst [vmem:[#allocation15_spill] sm:$0xff] %v7417_v62  ;;  %v1239_v2 = vadd.f32 %v1232_v45, %v1145_v10  ;;  %vm393_vm2 = vcmp.lt.s32.totalorder %v379_v27, 7  ;;  %v1052_v5 = vsel %vm5390_vm10, %v5023_v17, 0.0  ;;  %v1513_v43 = vadd.f32 %v1506_v19, %v1419_v46  ;;  %vm5437_vm12 = vmand %vm413_vm1, %vm420_vm3  ;;  %v1590_v17 = vpop.f32.mrf.mxu0  ;;  %v1402_v15 = vpop.f32.mrf.mxu3 }
 0x26e   :  { %v1139_v28 = vsel %vm5403_vm5, %v5025_v18, 0.0  ;;  %v1600_v0 = vsel %vm5416_vm13, %v1587_v52, 0.0  ;;  %vm441_vm9 = vcmp.ge.s32.totalorder %v434_v6, 0  ;;  %vm448_vm11 = vcmp.lt.s32.totalorder %v434_v6, 7  ;;  %vm5442_vm15 = vmand %vm386_vm0, %vm393_vm2  ;;  %v1496_v27 = vpop.f32.mrf.mxu2 }
 0x26f   :  { %v1607_v57 = vadd.f32 %v1600_v0, %v1513_v43  ;;  %v7419_v60 = vmov 0  ;;  %v7422_v10 = vmov 0  ;;  %vm469_vm10 = vcmp.ge.s32.totalorder %v462_v22, 0  ;;  %vm5450_vm1 = vmand %vm441_vm9, %vm448_vm11  ;;  %1751 = vrot.lane.b32.xlu2 %v5327_v8, %s3979_s25  ;;  %1669 = vrot.lane.b32.xlu0 %v5396_v61, %s3976_s23 }
 0x270   :  { %v7420_v60 = vsel %vm5437_vm12, 4294967295, %v7419_v60  ;;  %v7423_v10 = vsel %vm5442_vm15, 4294967295, %v7422_v10  ;;  %vm476_vm4 = vcmp.lt.s32.totalorder %v462_v22, 7  ;;  %v407_v18 = vadd.s32 1, %v5297_v34  ;;  %1695 = vrot.lane.b32.xlu1 %v5327_v8, %s3977_s1 }
 0x271   :  { %7421 = vst [vmem:[#allocation16_spill] sm:$0xff] %v7420_v60  ;;  %v1146_v7 = vadd.f32 %v1139_v28, %v1052_v5  ;;  %v5448_v52 = vadd.f32 %v5136_v30, %v1607_v57  ;;  %v1326_v14 = vadd.f32 %v1315_v47, %v1239_v2  ;;  %v7426_v6 = vmov 0  ;;  %vm5460_vm0 = vmand %vm469_vm10, %vm476_vm4 }
 0x272   :  { %7424 = vst [vmem:[#allocation17_spill] sm:$0xff] %v7423_v10  ;;  %v7427_v6 = vsel %vm5450_vm1, 4294967295, %v7426_v6  ;;  %v1413_v45 = vsel %vm5437_vm12, %v1402_v15, 0.0  ;;  %v435_v46 = vadd.s32 2, %v5297_v34  ;;  %v1233_v19 = vsel %vm5442_vm15, %v5000_v54, 0.0 }
 0x273   :  { %7425 = vst [vmem:[#allocation18_spill] sm:$0xff] %v5448_v52  ;;  %v7429_v22 = vmov 0  ;;  %v1420_v2 = vadd.f32 %v1413_v45, %v1326_v14  ;;  %v1507_v5 = vsel %vm5450_vm1, %v1496_v27, 0.0  ;;  %v463_v43 = vadd.s32 3, %v5297_v34  ;;  %v1318_v14 = vpop.f32.mrf.mxu1 }
 0x274   :  { %7428 = vst [vmem:[#allocation19_spill] sm:$0xff] %v7427_v6  ;;  %v7430_v22 = vsel %vm5460_vm0, 4294967295, %v7429_v22  ;;  %vm414_vm3 = vcmp.ge.s32.totalorder %v407_v18, 0  ;;  %vm421_vm10 = vcmp.lt.s32.totalorder %v407_v18, 7  ;;  %v1240_v54 = vadd.f32 %v1233_v19, %v1146_v7 }
 0x275   :  { %7431 = vst [vmem:[#allocation20_spill] sm:$0xff] %v7430_v22  ;;  %v1514_v47 = vadd.f32 %v1507_v5, %v1420_v2  ;;  %v1601_v28 = vsel %vm5460_vm0, %v1590_v17, 0.0  ;;  %vm442_vm4 = vcmp.ge.s32.totalorder %v435_v46, 0  ;;  %vm449_vm2 = vcmp.lt.s32.totalorder %v435_v46, 7  ;;  %vm5475_vm9 = vmand %vm414_vm3, %vm421_vm10  ;;  %v1405_v18 = vpop.f32.mrf.mxu3  ;;  %v1593_v46 = vpop.f32.mrf.mxu0 }
 0x276   :  { %v7432_v57 = vmov 0  ;;  %vm470_vm11 = vcmp.ge.s32.totalorder %v463_v43, 0  ;;  %vm477_vm1 = vcmp.lt.s32.totalorder %v463_v43, 7  ;;  %v1327_v15 = vadd.f32 %v1318_v14, %v1240_v54  ;;  %vm5482_vm15 = vmand %vm442_vm4, %vm449_vm2  ;;  %v1499_v17 = vpop.f32.mrf.mxu2  ;;  %v2004_v14 = vld [vmem:[%s7164_s5 + $0x148] sm:$0xff] }
 0x277   :  { %v1608_v0 = vadd.f32 %v1601_v28, %v1514_v47  ;;  %v7433_v57 = vsel %vm5475_vm9, 4294967295, %v7432_v57  ;;  %v7436_v7 = vmov 0  ;;  %v1414_v27 = vsel %vm5475_vm9, %v1405_v18, 0.0  ;;  %vm5488_vm3 = vmand %vm470_vm11, %vm477_vm1  ;;  %1697 = vrot.lane.b32.xlu2 %v5396_v61, %s3977_s1  ;;  %1725 = vrot.lane.b32.xlu0 %v5396_v61, %s3978_s24  ;;  %v2003_v18 = vld [vmem:[%s7164_s5 + $0x140] sm:$0xff] }
 0x278   :  { %7434 = vst [vmem:[#allocation21_spill] sm:$0xff] %v7433_v57  ;;  %v7437_v7 = vsel %vm5482_vm15, 4294967295, %v7436_v7  ;;  %v7439_v45 = vmov 0  ;;  %v1421_v19 = vadd.f32 %v1414_v27, %v1327_v15  ;;  %v1508_v2 = vsel %vm5482_vm15, %v1499_v17, 0.0  ;;  %1779 = vrot.lane.b32.xlu1 %v5327_v8, %s3980_s26  ;;  %2028 = vmatpush.msra.mxu2 %v2004_v14  ;;  %v1909_v15 = vld [vmem:[%s7164_s5 + $0xd0] sm:$0xff]  ;;  %v1822_v27 = vld [vmem:[%s7164_s5 + $0x60] sm:$0xff] }
 0x279   :  { %v5480_v34 = vadd.f32 %v5136_v30, %v1608_v0  ;;  %7438 = vst [vmem:[#allocation23_spill] sm:$0xff] %v7437_v7  ;;  %v7440_v45 = vsel %vm5488_vm3, 4294967295, %v7439_v45  ;;  %v1602_v43 = vsel %vm5488_vm3, %v1593_v46, 0.0  ;;  %vm7443_vm1 = vcmask 261248   ;;  %v1910_v0 = vld [vmem:[%s7164_s5 + $0xd8] sm:$0xff]  ;;  %v1908_v46 = vld [vmem:[%s7164_s5 + $0xc8] sm:$0xff] }
 0x27a   :  { %7441 = vst [vmem:[#allocation24_spill] sm:$0xff] %v7440_v45  ;;  %v1515_v5 = vadd.f32 %v1508_v2, %v1421_v19  ;;  %1934 = vmatpush.msrb.mxu3 %v1910_v0  ;;  %2029 = vmatpush.msra.mxu2 %v2003_v18  ;;  %v2002_v19 = vld [vmem:[%s7164_s5 + $0x138] sm:$0xff]  ;;  %vm7444_vm10 = vmmov %vm7443_vm1  ;;  %vm7445_vm4 = vcmask 392448   ;;  %vm7446_vm2 = vcmask 523648   ;;  %v1820_v14 = vld [vmem:[%s7164_s5 + $0x50] sm:$0xff]  ;;  %vm7447_vm11 = vcmask 654848  }
 0x27b   :  { %7435 = vst [vmem:[#allocation22_spill] sm:$0xff] %v5480_v34  ;;  %v1821_v2 = vld [vmem:[%s7164_s5 + $0x58] sm:$0xff]  ;;  %v2000_v18 = vld [vmem:[%s7164_s5 + $0x128] sm:$0xff] }
 0x27c   :  { %v1609_v54 = vadd.f32 %v1602_v43, %v1515_v5  ;;  %1935 = vmatpush.msrb.mxu3 %v1909_v15  ;;  %v1907_v5 = vld [vmem:[%s7164_s5 + $0xc0] sm:$0xff]  ;;  %v2001_v43 = vld [vmem:[%s7164_s5 + $0x130] sm:$0xff]  ;;  %2030 = vmatpush.msra.mxu2 %v2002_v19  ;;  %v2098_v15 = vld [vmem:[%s7164_s5 + $0x1b8] sm:$0xff] }
 0x27d   :  { %2122 = vmatpush.msra.mxu0 %v2098_v15  ;;  %v1999_v19 = vld [vmem:[%s7164_s5 + $0x120] sm:$0xff]  ;;  %v2094_v15 = vld [vmem:[%s7164_s5 + $0x198] sm:$0xff] }
 0x27e   :  { %v5503_v47 = vadd.f32 %v5136_v30, %v1609_v54  ;;  %1936 = vmatpush.msrb.mxu3 %v1908_v46  ;;  %2031 = vmatpush.msra.mxu2 %v2001_v43  ;;  %v1905_v46 = vld [vmem:[%s7164_s5 + $0xb0] sm:$0xff] }
 0x27f   :  { %1781 = vrot.lane.b32.xlu2 %v5396_v61, %s3980_s26  ;;  %1753 = vrot.lane.b32.xlu0 %v5396_v61, %s3979_s25 }
 0x280   :  { %7442 = vst [vmem:[#allocation25_spill] sm:$0xff] %v5503_v47  ;;  %1641 = vrot.lane.b32.xlu1 %v5396_v61, %s3975_s22  ;;  %1937 = vmatpush.msrb.mxu3 %v1907_v5 }
 0x281   :  { %2032 = vmatpush.msra.mxu2 %v2000_v18  ;;  %v1998_v18 = vld [vmem:[%s7164_s5 + $0x118] sm:$0xff] }
 0x283   :  { %2033 = vmatpush.msra.mxu2 %v1999_v19  ;;  %v1997_v19 = vld [vmem:[%s7164_s5 + $0x110] sm:$0xff] }
 0x285   :  { %2034 = vmatpush.msra.mxu2 %v1998_v18  ;;  %v1815_v18 = vld [vmem:[%s7164_s5 + $0x28] sm:$0xff] }
 0x287   :  { %1699 = vrot.lane.b32.xlu0 %v5448_v52, %s3977_s1  ;;  %1671 = vrot.lane.b32.xlu2 %v5448_v52, %s3976_s23 }
 0x288   :  { %1643 = vrot.lane.b32.xlu1 %v5448_v52, %s3975_s22  ;;  %2035 = vmatpush.msra.mxu2 %v1997_v19  ;;  %v2090_v19 = vld [vmem:[%s7164_s5 + $0x178] sm:$0xff] }
 0x28f   :  { %1783 = vrot.lane.b32.xlu0 %v5448_v52, %s3980_s26  ;;  %1755 = vrot.lane.b32.xlu2 %v5448_v52, %s3979_s25 }
 0x290   :  { %1727 = vrot.lane.b32.xlu1 %v5448_v52, %s3978_s24 }
 0x297   :  { %1673 = vrot.lane.b32.xlu0 %v5480_v34, %s3976_s23  ;;  %1645 = vrot.lane.b32.xlu2 %v5480_v34, %s3975_s22 }
 0x298   :  { %1701 = vrot.lane.b32.xlu1 %v5480_v34, %s3977_s1 }
 0x29f   :  { %1757 = vrot.lane.b32.xlu0 %v5480_v34, %s3979_s25  ;;  %1729 = vrot.lane.b32.xlu2 %v5480_v34, %s3978_s24 }
 0x2a0   :  { %1785 = vrot.lane.b32.xlu1 %v5480_v34, %s3980_s26 }
 0x2a7   :  { %1759 = vrot.lane.b32.xlu0 %v5503_v47, %s3979_s25  ;;  %1787 = vrot.lane.b32.xlu2 %v5503_v47, %s3980_s26 }
 0x2a8   :  { %1731 = vrot.lane.b32.xlu1 %v5503_v47, %s3978_s24 }
 0x2a9   :  { %v1692_v30 = vpop.permute.xlu2 %1691 }
 0x2af   :  { %936 = vrot.lane.b32.xlu0 %v4377_v9, %s3980_s26  ;;  %1703 = vrot.lane.b32.xlu2 %v5503_v47, %s3977_s1  ;;  %v1823_v9 = vld [vmem:[%s7164_s5 + $0x68] sm:$0xff] }
 0x2b0   :  { %1777 = vrot.lane.b32.xlu1 %v5251_v33, %s3980_s26  ;;  %1847 = vmatpush.msrb.mxu1 %v1823_v9  ;;  %v1906_v9 = vld [vmem:[%s7164_s5 + $0xb8] sm:$0xff] }
 0x2b1   :  { %v1638_v28 = vpop.permute.xlu2 %1637  ;;  %1938 = vmatpush.msrb.mxu3 %v1906_v9  ;;  %v1904_v9 = vld [vmem:[%s7164_s5 + $0xa8] sm:$0xff] }
 0x2b2   :  { %1657 = vst.msk [vmem:[#allocation2 + $0x2e] sm:$0xff] %vm7443_vm1, %v1638_v28  ;;  %1848 = vmatpush.msrb.mxu1 %v1822_v27  ;;  %v1819_v27 = vld [vmem:[%s7164_s5 + $0x48] sm:$0xff]  ;;  %vm7448_vm1 = vmmov %vm7445_vm4 }
 0x2b3   :  { %1939 = vmatpush.msrb.mxu3 %v1905_v46  ;;  %v2093_v46 = vld [vmem:[%s7164_s5 + $0x190] sm:$0xff] }
 0x2b4   :  { %1849 = vmatpush.msrb.mxu1 %v1821_v2  ;;  %v2096_v2 = vld [vmem:[%s7164_s5 + $0x1a8] sm:$0xff] }
 0x2b5   :  { %1940 = vmatpush.msrb.mxu3 %v1904_v9  ;;  %v2091_v9 = vld [vmem:[%s7164_s5 + $0x180] sm:$0xff] }
 0x2b6   :  { %1850 = vmatpush.msrb.mxu1 %v1820_v14  ;;  %v1818_v14 = vld [vmem:[%s7164_s5 + $0x40] sm:$0xff] }
 0x2b7   :  { %1675 = vrot.lane.b32.xlu0 %v5503_v47, %s3976_s23  ;;  %1747 = vrot.lane.b32.xlu2 %v5164_v53, %s3979_s25 }
 0x2b8   :  { %1647 = vrot.lane.b32.xlu1 %v5503_v47, %s3975_s22  ;;  %1851 = vmatpush.msrb.mxu1 %v1819_v27  ;;  %v1903_v27 = vld [vmem:[%s7164_s5 + $0xa0] sm:$0xff] }
 0x2b9   :  { %v5569_v17 = vpop.permute.xlu2 %1667  ;;  %1941 = vmatpush.msrb.mxu3 %v1903_v27 }
 0x2ba   :  { %1852 = vmatpush.msrb.mxu1 %v1818_v14  ;;  %v1816_v14 = vld [vmem:[%s7164_s5 + $0x30] sm:$0xff] }
 0x2c1   :  { %v1664_v54 = vpop.permute.xlu0 %1663  ;;  %v5589_v28 = vpop.permute.xlu2 %1723 }
 0x2c2   :  { %v1636_v0 = vpop.permute.xlu1 %1635 }
 0x2c3   :  { %1656 = vst.msk [vmem:[#allocation2 + $0x26] sm:$0xff] %vm7444_vm10, %v1636_v0  ;;  %v2095_v0 = vld [vmem:[%s7164_s5 + $0x1a0] sm:$0xff]  ;;  %vm7449_vm10 = vmmov %vm7446_vm2 }
 0x2c4   :  { %1684 = vst.msk [vmem:[#allocation2 + $0x1f] sm:$0xff] %vm7445_vm4, %v1664_v54  ;;  %vm7450_vm4 = vmmov %vm7447_vm11 }
 0x2c5   :  { %1712 = vst.msk [vmem:[#allocation2 + $0x18] sm:$0xff] %vm7446_vm2, %v1692_v30  ;;  %v2097_v30 = vld [vmem:[%s7164_s5 + $0x1b0] sm:$0xff]  ;;  %vm7451_vm2 = vcmask 261248  }
 0x2c6   :  { %2123 = vmatpush.msra.mxu0 %v2097_v30  ;;  %v1817_v30 = vld [vmem:[%s7164_s5 + $0x38] sm:$0xff] }
 0x2c7   :  { %1853 = vmatpush.msrb.mxu1 %v1817_v30  ;;  %v1996_v30 = vld [vmem:[%s7164_s5 + $0x108] sm:$0xff] }
 0x2c8   :  { %2124 = vmatpush.msra.mxu0 %v2096_v2  ;;  %v2092_v2 = vld [vmem:[%s7164_s5 + $0x188] sm:$0xff]  ;;  %2036 = vmatpush.msra.mxu2 %v1996_v30  ;;  %v1994_v30 = vld [vmem:[%s7164_s5 + $0xf8] sm:$0xff] }
 0x2c9   :  { %v1720_v5 = vpop.permute.xlu0 %1719  ;;  %v5621_v43 = vpop.permute.xlu2 %1751  ;;  %1854 = vmatpush.msrb.mxu1 %v1816_v14  ;;  %v1995_v14 = vld [vmem:[%s7164_s5 + $0x100] sm:$0xff] }
 0x2ca   :  { %1740 = vst.msk [vmem:[#allocation2 + $0x11] sm:$0xff] %vm7447_vm11, %v1720_v5  ;;  %v1666_v54 = vpop.permute.xlu1 %1665  ;;  %2125 = vmatpush.msra.mxu0 %v2095_v0  ;;  %vm7452_vm11 = vcmask 786048   ;;  %2037 = vmatpush.msra.mxu2 %v1995_v14  ;;  %v1898_v14 = vld [vmem:[%s7164_s5 + $0x78] sm:$0xff] }
 0x2cb   :  { %1685 = vst.msk [vmem:[#allocation2 + $0x27] sm:$0xff] %vm7448_vm1, %v1666_v54  ;;  %1855 = vmatpush.msrb.mxu1 %v1815_v18  ;;  %v1900_v18 = vld [vmem:[%s7164_s5 + $0x88] sm:$0xff] }
 0x2cc   :  { %2126 = vmatpush.msra.mxu0 %v2094_v15  ;;  %v1902_v15 = vld [vmem:[%s7164_s5 + $0x98] sm:$0xff]  ;;  %2038 = vmatpush.msra.mxu2 %v1994_v30  ;;  %v1897_v30 = vld [vmem:[%s7164_s5 + $0x70] sm:$0xff] }
 0x2cd   :  { %1942 = vmatpush.msrb.mxu3 %v1902_v15  ;;  %v1813_v15 = vld [vmem:[%s7164_s5 + $0x18] sm:$0xff] }
 0x2ce   :  { %2127 = vmatpush.msra.mxu0 %v2093_v46 }
 0x2d0   :  { %2128 = vmatpush.msra.mxu0 %v2092_v2  ;;  %v1814_v2 = vld [vmem:[%s7164_s5 + $0x20] sm:$0xff] }
 0x2d1   :  { %v1694_v5 = vpop.permute.xlu0 %1693  ;;  %v5655_v54 = vpop.permute.xlu2 %1697  ;;  %1856 = vmatpush.msrb.mxu1 %v1814_v2  ;;  %v1899_v2 = vld [vmem:[%s7164_s5 + $0x80] sm:$0xff] }
 0x2d2   :  { %1713 = vst.msk [vmem:[#allocation2 + $0x20] sm:$0xff] %vm7449_vm10, %v1694_v5  ;;  %v1722_v0 = vpop.permute.xlu1 %1721  ;;  %2129 = vmatpush.msra.mxu0 %v2091_v9  ;;  %v1901_v5 = vld [vmem:[%s7164_s5 + $0x90] sm:$0xff] }
 0x2d3   :  { %1741 = vst.msk [vmem:[#allocation2 + $0x19] sm:$0xff] %vm7450_vm4, %v1722_v0  ;;  %v2089_v9 = vld [vmem:[%s7164_s5 + $0x170] sm:$0xff]  ;;  %1943 = vmatpush.msrb.mxu3 %v1901_v5  ;;  %1857 = vmatpush.msrb.mxu1 %v1813_v15  ;;  %v2086_v15 = vld [vmem:[%s7164_s5 + $0x158] sm:$0xff] }
 0x2d4   :  { %2130 = vmatpush.msra.mxu0 %v2090_v19  ;;  %v1812_v19 = vld [vmem:[%s7164_s5 + $0x10] sm:$0xff] }
 0x2d5   :  { %1944 = vmatpush.msrb.mxu3 %v1900_v18  ;;  %v1993_v5 = vld [vmem:[%s7164_s5 + $0xf0] sm:$0xff]  ;;  %1858 = vmatpush.msrb.mxu1 %v1812_v19  ;;  %v1810_v18 = vld [vmem:[%s7164_s5] sm:$0xff] }
 0x2d6   :  { %2131 = vmatpush.msra.mxu0 %v2089_v9  ;;  %v1992_v9 = vld [vmem:[%s7164_s5 + $0xe8] sm:$0xff]  ;;  %2039 = vmatpush.msra.mxu2 %v1993_v5  ;;  %v2085_v5 = vld [vmem:[%s7164_s5 + $0x150] sm:$0xff] }
 0x2d7   :  { %1945 = vmatpush.msrb.mxu3 %v1899_v2  ;;  %v1991_v2 = vld [vmem:[%s7164_s5 + $0xe0] sm:$0xff] }
 0x2d8   :  { %2040 = vmatpush.msra.mxu2 %v1992_v9 }
 0x2d9   :  { %v1640_v27 = vpop.permute.xlu0 %1639  ;;  %v5674_v46 = vpop.permute.xlu2 %1781  ;;  %1946 = vmatpush.msrb.mxu3 %v1898_v14 }
 0x2da   :  { %v1750_v0 = vpop.permute.xlu1 %1749  ;;  %1658 = vst.msk [vmem:[#allocation2 + $0x36] sm:$0xff] %vm7451_vm2, %v1640_v27  ;;  %v2088_v27 = vld [vmem:[%s7164_s5 + $0x168] sm:$0xff]  ;;  %2041 = vmatpush.msra.mxu2 %v1991_v2  ;;  %vm7453_vm2 = vmmov %vm7452_vm11 }
 0x2db   :  { %1769 = vst.msk [vmem:[#allocation2 + $0x12] sm:$0xff] %vm7452_vm11, %v1750_v0  ;;  %2132 = vmatpush.msra.mxu0 %v2088_v27  ;;  %v1811_v0 = vld [vmem:[%s7164_s5 + $0x8] sm:$0xff]  ;;  %1947 = vmatpush.msrb.mxu3 %v1897_v30  ;;  %vm7454_vm11 = vcmask 917248   ;;  %v2372_v30 = vld [vmem:[%s7164_s5 + $0x300] sm:$0xff] }
 0x2dc   :  { %1686 = vst.msk [vmem:[#allocation2 + $0x2f] sm:$0xff] %vm7448_vm1, %v5569_v17  ;;  %v2087_v17 = vld [vmem:[%s7164_s5 + $0x160] sm:$0xff]  ;;  %1859 = vmatpush.msrb.mxu1 %v1811_v0  ;;  %vm7455_vm1 = vcmask 261248  }
 0x2dd   :  { %2133 = vmatpush.msra.mxu0 %v2087_v17 }
 0x2de   :  { %1860 = vmatpush.msrb.mxu1 %v1810_v18  ;;  %v2185_v18 = vld [vmem:[%s7164_s5 + $0x228] sm:$0xff] }
 0x2df   :  { %2134 = vmatpush.msra.mxu0 %v2086_v15 }
 0x2e0   :  { %2209 = vmatpush.msra.mxu1 %v2185_v18 }
 0x2e1   :  { %v1670_v27 = vpop.permute.xlu0 %1669  ;;  %v1672_v19 = vpop.permute.xlu2 %1671  ;;  %2135 = vmatpush.msra.mxu0 %v2085_v5  ;;  %v2184_v5 = vld [vmem:[%s7164_s5 + $0x220] sm:$0xff] }
 0x2e2   :  { %v1696_v17 = vpop.permute.xlu1 %1695  ;;  %2210 = vmatpush.msra.mxu1 %v2184_v5  ;;  %v2369_v5 = vld [vmem:[%s7164_s5 + $0x2e8] sm:$0xff] }
 0x2e3   :  { %1714 = vst.msk [vmem:[#allocation2 + $0x28] sm:$0xff] %vm7449_vm10, %v1696_v17  ;;  %vm7456_vm10 = vcmask 392448   ;;  %v2277_v17 = vld [vmem:[%s7164_s5 + $0x288] sm:$0xff] }
 0x2e4   :  { %1742 = vst.msk [vmem:[#allocation2 + $0x21] sm:$0xff] %vm7450_vm4, %v5589_v28  ;;  %v2279_v28 = vld [vmem:[%s7164_s5 + $0x298] sm:$0xff]  ;;  %vm7457_vm4 = vcmask 523648  }
 0x2e5   :  { %1770 = vst.msk [vmem:[#allocation2 + $0x1a] sm:$0xff] %vm7453_vm2, %v5621_v43  ;;  %v2373_v43 = vld [vmem:[%s7164_s5 + $0x308] sm:$0xff]  ;;  %2303 = vmatpush.msra.mxu3 %v2279_v28  ;;  %vm7458_vm2 = vcmask 654848  }
 0x2e6   :  { %2397 = vmatpush.msrb.mxu2 %v2373_v43 }
 0x2e8   :  { %2398 = vmatpush.msrb.mxu2 %v2372_v30 }
 0x2e9   :  { %v1726_v0 = vpop.permute.xlu0 %1725  ;;  %v1756_v14 = vpop.permute.xlu2 %1755 }
 0x2ea   :  { %v1780_v47 = vpop.permute.xlu1 %1779 }
 0x2eb   :  { %1798 = vst.msk [vmem:[#allocation2 + $0x13] sm:$0xff] %vm7454_vm11, %v1780_v47  ;;  %v2278_v47 = vld [vmem:[%s7164_s5 + $0x290] sm:$0xff]  ;;  %vm7459_vm11 = vcmask 786048  }
 0x2ec   :  { %2304 = vmatpush.msra.mxu3 %v2278_v47 }
 0x2ee   :  { %2305 = vmatpush.msra.mxu3 %v2277_v17  ;;  %v2181_v17 = vld [vmem:[%s7164_s5 + $0x208] sm:$0xff] }
 0x2f1   :  { %v1754_v34 = vpop.permute.xlu0 %1753  ;;  %v1646_v9 = vpop.permute.xlu2 %1645 }
 0x2f2   :  { %v1642_v15 = vpop.permute.xlu1 %1641  ;;  %v2370_v9 = vld [vmem:[%s7164_s5 + $0x2f0] sm:$0xff] }
 0x2f3   :  { %1659 = vst.msk [vmem:[#allocation2 + $0x3e] sm:$0xff] %vm7455_vm1, %v1642_v15  ;;  %vm7460_vm1 = vcmask 917248  }
 0x2f4   :  { %1687 = vst.msk [vmem:[#allocation2 + $0x37] sm:$0xff] %vm7456_vm10, %v1670_v27  ;;  %vm7461_vm10 = vcmask 261248  }
 0x2f5   :  { %1715 = vst.msk [vmem:[#allocation2 + $0x30] sm:$0xff] %vm7457_vm4, %v5655_v54  ;;  %vm7462_vm4 = vcmask 392448  }
 0x2f6   :  { %1743 = vst.msk [vmem:[#allocation2 + $0x29] sm:$0xff] %vm7458_vm2, %v1726_v0  ;;  %v2276_v0 = vld [vmem:[%s7164_s5 + $0x280] sm:$0xff]  ;;  %vm7463_vm2 = vcmask 523648  }
 0x2f7   :  { %1771 = vst.msk [vmem:[#allocation2 + $0x22] sm:$0xff] %vm7459_vm11, %v1754_v34  ;;  %v2371_v34 = vld [vmem:[%s7164_s5 + $0x2f8] sm:$0xff]  ;;  %2306 = vmatpush.msra.mxu3 %v2276_v0  ;;  %vm7464_vm11 = vcmask 916480   ;;  %v2180_v0 = vld [vmem:[%s7164_s5 + $0x200] sm:$0xff] }
 0x2f8   :  { %1799 = vst.msk [vmem:[#allocation2 + $0x1b] sm:$0xff] %vm7460_vm1, %v5674_v46  ;;  %v2183_v46 = vld [vmem:[%s7164_s5 + $0x218] sm:$0xff]  ;;  %2399 = vmatpush.msrb.mxu2 %v2371_v34  ;;  %vm7465_vm1 = vmmov %vm7464_vm11  ;;  %v2274_v34 = vld [vmem:[%s7164_s5 + $0x270] sm:$0xff] }
 0x2f9   :  { %v1700_v54 = vpop.permute.xlu0 %1699  ;;  %v1730_v27 = vpop.permute.xlu2 %1729  ;;  %2211 = vmatpush.msra.mxu1 %v2183_v46  ;;  %vm7467_vm3 = vmmov %vm7465_vm1  ;;  %v2368_v46 = vld [vmem:[%s7164_s5 + $0x2e0] sm:$0xff] }
 0x2fa   :  { %v1644_v2 = vpop.permute.xlu1 %1643  ;;  %2400 = vmatpush.msrb.mxu2 %v2370_v9  ;;  %v2273_v9 = vld [vmem:[%s7164_s5 + $0x268] sm:$0xff] }
 0x2fb   :  { %1660 = vst.msk [vmem:[#allocation2 + $0x46] sm:$0xff] %vm7461_vm10, %v1644_v2  ;;  %vm7466_vm10 = vmmov %vm7465_vm1  ;;  %v2275_v2 = vld [vmem:[%s7164_s5 + $0x278] sm:$0xff] }
 0x2fc   :  { %1688 = vst.msk [vmem:[#allocation2 + $0x3f] sm:$0xff] %vm7462_vm4, %v1672_v19  ;;  %vm7468_vm4 = vcmask 654848   ;;  %2307 = vmatpush.msra.mxu3 %v2275_v2  ;;  %2401 = vmatpush.msrb.mxu2 %v2369_v5 }
 0x2fd   :  { %1716 = vst.msk [vmem:[#allocation2 + $0x38] sm:$0xff] %vm7463_vm2, %v1700_v54  ;;  %v2182_v54 = vld [vmem:[%s7164_s5 + $0x210] sm:$0xff]  ;;  %vm7470_vm2 = vcmask 917248  }
 0x2fe   :  { %2212 = vmatpush.msra.mxu1 %v2182_v54  ;;  %2308 = vmatpush.msra.mxu3 %v2274_v34  ;;  %v2178_v34 = vld [vmem:[%s7164_s5 + $0x1f0] sm:$0xff] }
 0x2ff   :  { %v1803_v15 = vld [vmem:[#allocation2 + $0x15] sm:$0xff]  ;;  %2402 = vmatpush.msrb.mxu2 %v2368_v46 }
 0x300   :  { %v1890_v28 = vld [vmem:[#allocation2 + $0x16] sm:$0xff]  ;;  %3831 = vmatmul.msk.f32.vlgmr.msrb.gmra.mxu1 %vm7464_vm11, %v1803_v15  ;;  %2309 = vmatpush.msra.mxu3 %v2273_v9  ;;  %vm7471_vm11 = vcmask 392448  }
 0x301   :  { %v1984_v43 = vld [vmem:[#allocation2 + $0x17] sm:$0xff]  ;;  %3838 = vmatmul.msk.f32.vlgmr.msrb.gmra.mxu3 %vm7465_vm1, %v1890_v28  ;;  %v1784_v47 = vpop.permute.xlu0 %1783  ;;  %v1788_v19 = vpop.permute.xlu2 %1787  ;;  %2213 = vmatpush.msra.mxu1 %v2181_v17  ;;  %v2272_v28 = vld [vmem:[%s7164_s5 + $0x260] sm:$0xff]  ;;  %vm7472_vm1 = vcmask 523648  }
 0x302   :  { %v2078_v18 = vld [vmem:[#allocation2 + $0x18] sm:$0xff]  ;;  %3845 = vmatmul.msk.f32.vlgmr.msra.gmra.mxu2 %vm7466_vm10, %v1984_v43  ;;  %v1728_v30 = vpop.permute.xlu1 %1727  ;;  %v2366_v43 = vld [vmem:[%s7164_s5 + $0x2d0] sm:$0xff]  ;;  %2310 = vmatpush.msra.mxu3 %v2272_v28  ;;  %vm7473_vm10 = vmmov %vm7468_vm4 }
 0x303   :  { %3852 = vmatmul.msk.f32.vlgmr.msra.gmra.mxu0 %vm7467_vm3, %v2078_v18  ;;  %1744 = vst.msk [vmem:[#allocation2 + $0x31] sm:$0xff] %vm7468_vm4, %v1728_v30  ;;  %vm7469_vm3 = vcmask 786048   ;;  %v2367_v15 = vld [vmem:[%s7164_s5 + $0x2d8] sm:$0xff]  ;;  %2214 = vmatpush.msra.mxu1 %v2180_v0  ;;  %vm7474_vm4 = vcmask 516480   ;;  %v2177_v0 = vld [vmem:[%s7164_s5 + $0x1e8] sm:$0xff]  ;;  %v2270_v9 = vld [vmem:[%s7164_s5 + $0x250] sm:$0xff] }
 0x304   :  { %1772 = vst.msk [vmem:[#allocation2 + $0x2a] sm:$0xff] %vm7469_vm3, %v1756_v14  ;;  %v2179_v14 = vld [vmem:[%s7164_s5 + $0x1f8] sm:$0xff]  ;;  %2403 = vmatpush.msrb.mxu2 %v2367_v15  ;;  %vm7475_vm3 = vcmask 916480   ;;  %v2364_v15 = vld [vmem:[%s7164_s5 + $0x2c0] sm:$0xff] }
 0x305   :  { %1800 = vst.msk [vmem:[#allocation2 + $0x23] sm:$0xff] %vm7470_vm2, %v1784_v47  ;;  %2215 = vmatpush.msra.mxu1 %v2179_v14  ;;  %vm7476_vm2 = vmmov %vm7475_vm3  ;;  %v2271_v46 = vld [vmem:[%s7164_s5 + $0x258] sm:$0xff] }
 0x306   :  { %2404 = vmatpush.msrb.mxu2 %v2366_v43  ;;  %2311 = vmatpush.msra.mxu3 %v2271_v46  ;;  %v2176_v43 = vld [vmem:[%s7164_s5 + $0x1e0] sm:$0xff] }
 0x307   :  { %2216 = vmatpush.msra.mxu1 %v2178_v34 }
 0x308   :  { %2312 = vmatpush.msra.mxu3 %v2270_v9  ;;  %v2267_v9 = vld [vmem:[%s7164_s5 + $0x238] sm:$0xff] }
 0x309   :  { %v1674_v18 = vpop.permute.xlu0 %1673  ;;  %v1704_v30 = vpop.permute.xlu2 %1703  ;;  %2217 = vmatpush.msra.mxu1 %v2177_v0  ;;  %v2174_v0 = vld [vmem:[%s7164_s5 + $0x1d0] sm:$0xff] }
 0x30a   :  { %v1702_v47 = vpop.permute.xlu1 %1701  ;;  %1689 = vst.msk [vmem:[#allocation2 + $0x47] sm:$0xff] %vm7471_vm11, %v1674_v18  ;;  %vm7477_vm11 = vmmov %vm7476_vm2  ;;  %v2269_v18 = vld [vmem:[%s7164_s5 + $0x248] sm:$0xff] }
 0x30b   :  { %1717 = vst.msk [vmem:[#allocation2 + $0x40] sm:$0xff] %vm7472_vm1, %v1702_v47  ;;  %vm7478_vm1 = vmmov %vm7476_vm2  ;;  %2218 = vmatpush.msra.mxu1 %v2176_v43  ;;  %v2363_v47 = vld [vmem:[%s7164_s5 + $0x2b8] sm:$0xff]  ;;  %2313 = vmatpush.msra.mxu3 %v2269_v18  ;;  %v2360_v43 = vld [vmem:[%s7164_s5 + $0x2a0] sm:$0xff] }
 0x30c   :  { %v1804_v54 = vld [vmem:[#allocation2 + $0x1d] sm:$0xff]  ;;  %1745 = vst.msk [vmem:[#allocation2 + $0x39] sm:$0xff] %vm7473_vm10, %v1730_v27  ;;  %v2365_v27 = vld [vmem:[%s7164_s5 + $0x2c8] sm:$0xff]  ;;  %vm7479_vm10 = vcmask 786048   ;;  %vm7492_vm15 = vmmov %vm7478_vm1 }
 0x30d   :  { %v1891_v2 = vld [vmem:[#allocation2 + $0x1e] sm:$0xff]  ;;  %1718 = vst.msk [vmem:[#allocation2 + $0x48] sm:$0x1] %vm7474_vm4, %v1704_v30  ;;  %3832 = vmatmul.msk.f32.gmra.mxu1 %vm7475_vm3, %v1804_v54  ;;  %2405 = vmatpush.msrb.mxu2 %v2365_v27  ;;  %vm7480_vm4 = vcmask 917248   ;;  %vm7481_vm3 = vcmask 910080   ;;  %v2362_v54 = vld [vmem:[%s7164_s5 + $0x2b0] sm:$0xff]  ;;  %vm7496_vm9 = vmmov %vm7478_vm1 }
 0x30e   :  { %v1985_v5 = vld [vmem:[#allocation2 + $0x1f] sm:$0xff]  ;;  %3839 = vmatmul.msk.f32.gmra.mxu3 %vm7476_vm2, %v1891_v2  ;;  %vm7482_vm2 = vcmask 778880  }
 0x30f   :  { %v2079_v17 = vld [vmem:[#allocation2 + $0x20] sm:$0xff]  ;;  %3846 = vmatmul.msk.f32.gmra.mxu2 %vm7477_vm11, %v1985_v5  ;;  %v2175_v30 = vld [vmem:[%s7164_s5 + $0x1d8] sm:$0xff]  ;;  %vm7483_vm11 = vcmask 647680  }
 0x310   :  { %3853 = vmatmul.msk.f32.gmra.mxu0 %vm7478_vm1, %v2079_v17  ;;  %2406 = vmatpush.msrb.mxu2 %v2364_v15  ;;  %v2361_v15 = vld [vmem:[%s7164_s5 + $0x2a8] sm:$0xff]  ;;  %v2172_v18 = vld [vmem:[%s7164_s5 + $0x1c0] sm:$0xff] }
 0x311   :  { %v1758_v14 = vpop.permute.xlu0 %1757  ;;  %2219 = vmatpush.msra.mxu1 %v2175_v30  ;;  %v1748_v30 = vpop.permute.xlu2 %1747 }
 0x312   :  { %v1786_v28 = vpop.permute.xlu1 %1785  ;;  %1773 = vst.msk [vmem:[#allocation2 + $0x32] sm:$0xff] %vm7479_vm10, %v1758_v14  ;;  %2407 = vmatpush.msrb.mxu2 %v2363_v47  ;;  %vm7484_vm10 = vmmov %vm7478_vm1  ;;  %v2173_v14 = vld [vmem:[%s7164_s5 + $0x1c8] sm:$0xff]  ;;  %v1896_v30 = vld [vmem:[#allocation2 + $0x46] sm:$0x1] }
 0x313   :  { %1801 = vst.msk [vmem:[#allocation2 + $0x2b] sm:$0xff] %vm7480_vm4, %v1786_v28  ;;  %vm7485_vm4 = vmmov %vm7478_vm1  ;;  %2220 = vmatpush.msra.mxu1 %v2174_v0  ;;  %v2266_v28 = vld [vmem:[%s7164_s5 + $0x230] sm:$0xff] }
 0x314   :  { %1802 = vst.msk [vmem:[#allocation2 + $0x33] sm:$0x1] %vm7481_vm3, %v1788_v19  ;;  %v2268_v19 = vld [vmem:[%s7164_s5 + $0x240] sm:$0xff]  ;;  %2408 = vmatpush.msrb.mxu2 %v2362_v54  ;;  %vm7486_vm3 = vmmov %vm7478_vm1 }
 0x315   :  { %2314 = vmatpush.msra.mxu3 %v2268_v19  ;;  %2221 = vmatpush.msra.mxu1 %v2173_v14 }
 0x316   :  { %2409 = vmatpush.msrb.mxu2 %v2361_v15 }
 0x317   :  { %2315 = vmatpush.msra.mxu3 %v2267_v9  ;;  %2222 = vmatpush.msra.mxu1 %v2172_v18 }
 0x318   :  { %2410 = vmatpush.msrb.mxu2 %v2360_v43 }
 0x319   :  { %v1760_v2 = vpop.permute.xlu0 %1759  ;;  %2316 = vmatpush.msra.mxu3 %v2266_v28 }
 0x31a   :  { %v1805_v5 = vld [vmem:[#allocation2 + $0x25] sm:$0xff]  ;;  %v1732_v17 = vpop.permute.xlu1 %1731  ;;  %1774 = vst.msk [vmem:[#allocation2 + $0x3a] sm:$0x1] %vm7482_vm2, %v1760_v2  ;;  %vm7487_vm2 = vmmov %vm7478_vm1 }
 0x31b   :  { %v1892_v34 = vld [vmem:[#allocation2 + $0x26] sm:$0xff]  ;;  %1746 = vst.msk [vmem:[#allocation2 + $0x41] sm:$0x1] %vm7483_vm11, %v1732_v17  ;;  %3833 = vmatmul.msk.f32.gmra.mxu1 %vm7478_vm1, %v1805_v5  ;;  %v1893_v2 = vld [vmem:[#allocation2 + $0x2e] sm:$0xff]  ;;  %vm7488_vm11 = vmmov %vm7478_vm1 }
 0x31c   :  { %v1986_v46 = vld [vmem:[#allocation2 + $0x27] sm:$0xff]  ;;  %3840 = vmatmul.msk.f32.gmra.mxu3 %vm7484_vm10, %v1892_v34  ;;  %v1987_v5 = vld [vmem:[#allocation2 + $0x2f] sm:$0xff]  ;;  %vm7489_vm10 = vmmov %vm7478_vm1 }
 0x31d   :  { %v2080_v27 = vld [vmem:[#allocation2 + $0x28] sm:$0xff]  ;;  %3847 = vmatmul.msk.f32.gmra.mxu2 %vm7485_vm4, %v1986_v46  ;;  %v2081_v17 = vld [vmem:[#allocation2 + $0x30] sm:$0xff]  ;;  %vm7490_vm4 = vmmov %vm7478_vm1 }
 0x31e   :  { %3854 = vmatmul.msk.f32.gmra.mxu0 %vm7486_vm3, %v2080_v27  ;;  %v1806_v54 = vld [vmem:[#allocation2 + $0x2d] sm:$0xff]  ;;  %vm7491_vm3 = vmmov %vm7478_vm1 }
 0x321   :  { %v937_v47 = vpop.permute.xlu0 %936  ;;  %v1807_v27 = vld [vmem:[#allocation2 + $0x35] sm:$0xff] }
 0x322   :  { %v1778_v19 = vpop.permute.xlu1 %1777  ;;  %v1894_v0 = vld [vmem:[#allocation2 + $0x36] sm:$0xff]  ;;  %v1895_v28 = vld [vmem:[#allocation2 + $0x3e] sm:$0xff] }
 0x323   :  { %3834 = vmatmul.msk.f32.gmra.mxu1 %vm7487_vm2, %v1806_v54  ;;  %v1988_v9 = vld [vmem:[#allocation2 + $0x37] sm:$0xff]  ;;  %vm7493_vm2 = vmmov %vm7478_vm1  ;;  %v1989_v43 = vld [vmem:[#allocation2 + $0x3f] sm:$0xff] }
 0x324   :  { %3841 = vmatmul.msk.f32.gmra.mxu3 %vm7488_vm11, %v1893_v2  ;;  %v2082_v15 = vld [vmem:[#allocation2 + $0x38] sm:$0xff]  ;;  %vm7494_vm11 = vmmov %vm7478_vm1  ;;  %v2083_v18 = vld [vmem:[#allocation2 + $0x40] sm:$0xff] }
 0x325   :  { %3848 = vmatmul.msk.f32.gmra.mxu2 %vm7478_vm1, %v1987_v5  ;;  %v1808_v14 = vld [vmem:[#allocation2 + $0x3d] sm:$0xff]  ;;  %v1809_v47 = vld [vmem:[#allocation2 + $0x45] sm:$0x1]  ;;  %v1990_v19 = vld [vmem:[#allocation2 + $0x47] sm:$0x1] }
 0x326   :  { %3855 = vmatmul.msk.f32.gmra.mxu0 %vm7489_vm10, %v2081_v17  ;;  %vm7495_vm10 = vmmov %vm7478_vm1  ;;  %v2084_v54 = vld [vmem:[#allocation2 + $0x48] sm:$0x1]  ;;  %v2165_v2 = vld [vmem:[#allocation2 + $0x19] sm:$0xff] }
 0x327   :  { %v2259_v5 = vld [vmem:[#allocation2 + $0x1a] sm:$0xff] }
 0x328   :  { %v2353_v17 = vld [vmem:[#allocation2 + $0x1b] sm:$0xff] }
 0x329   :  { %v1676_v34 = vpop.permute.xlu0 %1675 }
 0x32a   :  { %v1648_v46 = vpop.permute.xlu1 %1647  ;;  %v2166_v34 = vld [vmem:[#allocation2 + $0x21] sm:$0xff] }
 0x32b   :  { %3835 = vmatmul.msk.f32.gmra.mxu1 %vm7490_vm4, %v1807_v27  ;;  %vm7497_vm4 = vmmov %vm7478_vm1  ;;  %v2260_v46 = vld [vmem:[#allocation2 + $0x22] sm:$0xff] }
 0x32c   :  { %3842 = vmatmul.msk.f32.gmra.mxu3 %vm7491_vm3, %v1894_v0  ;;  %vm7498_vm3 = vmmov %vm7478_vm1  ;;  %v2354_v27 = vld [vmem:[#allocation2 + $0x23] sm:$0xff] }
 0x32d   :  { %3849 = vmatmul.msk.f32.gmra.mxu2 %vm7492_vm15, %v1988_v9  ;;  %vm7499_vm15 = vmmov %vm7478_vm1  ;;  %v2167_v0 = vld [vmem:[#allocation2 + $0x29] sm:$0xff] }
 0x32e   :  { %3856 = vmatmul.msk.f32.gmra.mxu0 %vm7493_vm2, %v2082_v15  ;;  %vm7500_vm2 = vmmov %vm7478_vm1  ;;  %v2261_v9 = vld [vmem:[#allocation2 + $0x2a] sm:$0xff] }
 0x32f   :  { %v2355_v15 = vld [vmem:[#allocation2 + $0x2b] sm:$0xff] }
 0x333   :  { %3836 = vmatmul.msk.f32.gmra.mxu1 %vm7494_vm11, %v1808_v14  ;;  %vm7501_vm11 = vmmov %vm7478_vm1  ;;  %v2168_v14 = vld [vmem:[#allocation2 + $0x31] sm:$0xff] }
 0x334   :  { %3843 = vmatmul.msk.f32.gmra.mxu3 %vm7478_vm1, %v1895_v28  ;;  %v2262_v28 = vld [vmem:[#allocation2 + $0x32] sm:$0xff] }
 0x335   :  { %3850 = vmatmul.msk.f32.gmra.mxu2 %vm7495_vm10, %v1989_v43  ;;  %vm7503_vm10 = vmmov %vm7478_vm1  ;;  %v2356_v43 = vld [vmem:[#allocation2 + $0x33] sm:$0xff] }
 0x336   :  { %3857 = vmatmul.msk.f32.gmra.mxu0 %vm7496_vm9, %v2083_v18  ;;  %vm7502_vm9 = vmmov %vm7478_vm1  ;;  %v2263_v18 = vld [vmem:[#allocation2 + $0x3a] sm:$0xff] }
 0x33b   :  { %3837 = vmatmul.msk.f32.gmra.mxu1 %vm7497_vm4, %v1809_v47  ;;  %vm7504_vm4 = vmmov %vm7478_vm1  ;;  %v2169_v47 = vld [vmem:[#allocation2 + $0x39] sm:$0xff] }
 0x33c   :  { %3844 = vmatmul.msk.f32.gmra.mxu3 %vm7498_vm3, %v1896_v30  ;;  %vm7505_vm3 = vmmov %vm7478_vm1  ;;  %v2357_v30 = vld [vmem:[#allocation2 + $0x3b] sm:$0xff] }
 0x33d   :  { %3851 = vmatmul.msk.f32.gmra.mxu2 %vm7499_vm15, %v1990_v19  ;;  %vm7506_vm15 = vmmov %vm7478_vm1  ;;  %v2264_v19 = vld [vmem:[#allocation2 + $0x42] sm:$0xff] }
 0x33e   :  { %3858 = vmatmul.msk.f32.gmra.mxu0 %vm7500_vm2, %v2084_v54  ;;  %vm7507_vm2 = vmmov %vm7478_vm1  ;;  %v2170_v54 = vld [vmem:[#allocation2 + $0x41] sm:$0xff] }
 0x343   :  { %3859 = vmatmul.msk.f32.vlgmr.msra.gmra.mxu1 %vm7501_vm11, %v2165_v2  ;;  %vm7508_vm11 = vmmov %vm7478_vm1  ;;  %v2358_v2 = vld [vmem:[#allocation2 + $0x43] sm:$0xff] }
 0x344   :  { %3866 = vmatmul.msk.f32.vlgmr.msra.gmra.mxu3 %vm7478_vm1, %v2259_v5  ;;  %v2171_v5 = vld [vmem:[#allocation2 + $0x49] sm:$0x1] }
 0x345   :  { %3873 = vmatmul.msk.f32.vlgmr.msrb.gmra.mxu2 %vm7502_vm9, %v2353_v17  ;;  %vm7509_vm9 = vmmov %vm7478_vm1  ;;  %v2265_v17 = vld [vmem:[#allocation2 + $0x4a] sm:$0x1] }
 0x34b   :  { %3860 = vmatmul.msk.f32.gmra.mxu1 %vm7503_vm10, %v2166_v34  ;;  %vm7510_vm10 = vmmov %vm7478_vm1  ;;  %v2359_v34 = vld [vmem:[#allocation2 + $0x4b] sm:$0x1] }
 0x34c   :  { %3867 = vmatmul.msk.f32.gmra.mxu3 %vm7504_vm4, %v2260_v46  ;;  %vm7511_vm4 = vmmov %vm7478_vm1 }
 0x34d   :  { %3874 = vmatmul.msk.f32.gmra.mxu2 %vm7505_vm3, %v2354_v27  ;;  %vm7512_vm3 = vmmov %vm7478_vm1 }
 0x353   :  { %3861 = vmatmul.msk.f32.gmra.mxu1 %vm7506_vm15, %v2167_v0  ;;  %vm7513_vm15 = vmmov %vm7478_vm1 }
 0x354   :  { %3868 = vmatmul.msk.f32.gmra.mxu3 %vm7507_vm2, %v2261_v9  ;;  %vm7514_vm2 = vmmov %vm7478_vm1 }
 0x355   :  { %3875 = vmatmul.msk.f32.gmra.mxu2 %vm7508_vm11, %v2355_v15  ;;  %vm7515_vm11 = vmmov %vm7478_vm1 }
 0x35b   :  { %3862 = vmatmul.msk.f32.gmra.mxu1 %vm7478_vm1, %v2168_v14 }
 0x35c   :  { %3869 = vmatmul.msk.f32.gmra.mxu3 %vm7509_vm9, %v2262_v28  ;;  %vm7516_vm9 = vmmov %vm7478_vm1 }
 0x35d   :  { %3876 = vmatmul.msk.f32.gmra.mxu2 %vm7510_vm10, %v2356_v43  ;;  %vm7517_vm10 = vmmov %vm7478_vm1 }
 0x363   :  { %3863 = vmatmul.msk.f32.gmra.mxu1 %vm7511_vm4, %v2169_v47  ;;  %vm7518_vm4 = vmmov %vm7478_vm1 }
 0x364   :  { %3870 = vmatmul.msk.f32.gmra.mxu3 %vm7512_vm3, %v2263_v18  ;;  %vm7519_vm3 = vnez %v7297_v56 }
 0x365   :  { %3877 = vmatmul.msk.f32.gmra.mxu2 %vm7513_vm15, %v2357_v30  ;;  %vm7520_vm15 = vnez %v7303_v24 }
 0x36b   :  { %3864 = vmatmul.msk.f32.gmra.mxu1 %vm7514_vm2, %v2170_v54  ;;  %vm7521_vm2 = vnez %v7301_v50 }
 0x36c   :  { %3871 = vmatmul.msk.f32.gmra.mxu3 %vm7515_vm11, %v2264_v19  ;;  %vm7522_vm11 = vnez %v7310_v49 }
 0x36d   :  { %3878 = vmatmul.msk.f32.gmra.mxu2 %vm7478_vm1, %v2358_v2  ;;  %vm7523_vm1 = vnez %v7308_v36 }
 0x373   :  { %3865 = vmatmul.msk.f32.gmra.mxu1 %vm7516_vm9, %v2171_v5  ;;  %vm7524_vm9 = vnez %v7317_v21 }
 0x374   :  { %3872 = vmatmul.msk.f32.gmra.mxu3 %vm7517_vm10, %v2265_v17  ;;  %vm7525_vm10 = vnez %v7321_v58 }
 0x375   :  { %3879 = vmatmul.msk.f32.gmra.mxu2 %vm7518_vm4, %v2359_v34  ;;  %vm7526_vm4 = vnez %v7324_v55 }
 0x37d   :  { %v1862_v46 = vpop.f32.mrf.mxu1 }
 0x37e   :  { %v1883_v33 = vsel %vm4961_vm8, %v1862_v46, 0.0 }
 0x380   :  { %v2137_v53 = vpop.f32.mrf.mxu0 }
 0x384   :  { %v1949_v27 = vpop.f32.mrf.mxu3 }
 0x385   :  { %v2043_v0 = vpop.f32.mrf.mxu2  ;;  %v1970_v8 = vsel %vm4974_vm7, %v1949_v27, 0.0 }
 0x386   :  { %v1977_v45 = vadd.f32 %v1970_v8, %v1883_v33  ;;  %v2064_v57 = vsel %vm7519_vm3, %v2043_v0, 0.0 }
 0x388   :  { %v2071_v6 = vadd.f32 %v2064_v57, %v1977_v45 }
 0x38a   :  { %v1865_v9 = vpop.f32.mrf.mxu1  ;;  %v2158_v8 = vadd.f32 %v2137_v53, %v2071_v6 }
 0x38b   :  { %v1884_v27 = vsel %vm7521_vm2, %v1865_v9, 0.0  ;;  %v5986_v9 = vld [vmem:[%s7167_s8] ss:$0 sm:$0xff] }
 0x38d   :  { %v2140_v31 = vpop.f32.mrf.mxu0 }
 0x391   :  { %v1952_v15 = vpop.f32.mrf.mxu3 }
 0x392   :  { %v2046_v14 = vpop.f32.mrf.mxu2  ;;  %v1971_v60 = vsel %vm7520_vm15, %v1952_v15, 0.0 }
 0x393   :  { %v1978_v33 = vadd.f32 %v1971_v60, %v1884_v27  ;;  %v2065_v0 = vsel %vm7523_vm1, %v2046_v14, 0.0  ;;  %vm7527_vm1 = vnez %v7314_v39 }
 0x395   :  { %v2072_v24 = vadd.f32 %v2065_v0, %v1978_v33 }
 0x398   :  { %v1868_v28 = vpop.f32.mrf.mxu1 }
 0x399   :  { %v1885_v6 = vsel %vm7527_vm1, %v1868_v28, 0.0 }
 0x39f   :  { %v1955_v43 = vpop.f32.mrf.mxu3 }
 0x3a0   :  { %v2049_v18 = vpop.f32.mrf.mxu2  ;;  %v1871_v47 = vpop.f32.mrf.mxu1  ;;  %v1972_v53 = vsel %vm7525_vm10, %v1955_v43, 0.0  ;;  %vm7534_vm10 = vnez %v7332_v16 }
 0x3a1   :  { %v1979_v14 = vadd.f32 %v1972_v53, %v1885_v6 }
 0x3a7   :  { %v1958_v30 = vpop.f32.mrf.mxu3 }
 0x3a8   :  { %v5947_v19 = vpop.f32.mrf.mxu2  ;;  %v5949_v54 = vpop.f32.mrf.mxu1 }
 0x3af   :  { %v5951_v2 = vpop.f32.mrf.mxu3 }
 0x3b0   :  { %v5953_v5 = vpop.f32.mrf.mxu2  ;;  %v5955_v17 = vpop.f32.mrf.mxu1 }
 0x3b7   :  { %v5957_v34 = vpop.f32.mrf.mxu3 }
 0x3b8   :  { %v5959_v52 = vpop.f32.mrf.mxu2  ;;  %v5961_v61 = vpop.f32.mrf.mxu1 }
 0x3bf   :  { %v5967_v7 = vpop.f32.mrf.mxu3 }
 0x3c0   :  { %v5971_v22 = vpop.f32.mrf.mxu2  ;;  %v2224_v10 = vpop.f32.mrf.mxu1 }
 0x3c1   :  { %v2245_v46 = vsel %vm7522_vm11, %v2224_v10, 0.0  ;;  %vm7530_vm11 = vcmask 130048  }
 0x3c2   :  { %v2252_v25 = vadd.f32 %v2245_v46, %v2158_v8  ;;  %v2159_v46 = vadd.f32 %v2140_v31, %v2072_v24 }
 0x3c7   :  { %v2318_v20 = vpop.f32.mrf.mxu3 }
 0x3c8   :  { %v2339_v57 = vsel %vm7524_vm9, %v2318_v20, 0.0  ;;  %v2412_v45 = vpop.f32.mrf.mxu2  ;;  %v2227_v49 = vpop.f32.mrf.mxu1  ;;  %vm7528_vm9 = vnez %v7336_v44 }
 0x3c9   :  { %v2346_v15 = vadd.f32 %v2339_v57, %v2252_v25  ;;  %v2433_v60 = vsel %vm7526_vm4, %v2412_v45, 0.0  ;;  %v2143_v20 = vpop.f32.mrf.mxu0  ;;  %v2246_v25 = vsel %vm7528_vm9, %v2227_v49, 0.0  ;;  %vm7531_vm4 = vnez %v7328_v41 }
 0x3ca   :  { %v2253_v43 = vadd.f32 %v2246_v25, %v2159_v46  ;;  %v2066_v28 = vsel %vm7531_vm4, %v2049_v18, 0.0  ;;  %vm7532_vm9 = vnez %v7345_v29  ;;  %v1886_v18 = vsel %vm7534_vm10, %v1871_v47, 0.0 }
 0x3cb   :  { %v2440_v10 = vadd.f32 %v2433_v60, %v2346_v15  ;;  %v2073_v31 = vadd.f32 %v2066_v28, %v1979_v14  ;;  %vm7535_vm4 = vnez %v7366_v35  ;;  %vm7544_vm10 = vcmask 130048  }
 0x3cd   :  { %v5997_v27 = vadd.f32 %v5986_v9, %v2440_v10  ;;  %v2160_v6 = vadd.f32 %v2143_v20, %v2073_v31 }
 0x3cf   :  { %7529 = vst [vmem:[#allocation26_spill] sm:$0xff] %v5997_v27  ;;  %v2321_v33 = vpop.f32.mrf.mxu3  ;;  %2528 = vrot.lane.b32.xlu2 %v5997_v27, %s3977_s1  ;;  %2500 = vrot.lane.b32.xlu0 %v5997_v27, %s3976_s23 }
 0x3d0   :  { %2458 = vst.msk [vmem:[#allocation2 + $0x2d] sm:$0xff] %vm7530_vm11, %v5997_v27  ;;  %v2340_v49 = vsel %vm7532_vm9, %v2321_v33, 0.0  ;;  %v2415_v8 = vpop.f32.mrf.mxu2  ;;  %2472 = vrot.lane.b32.xlu1 %v5997_v27, %s3975_s22  ;;  %v2230_v0 = vpop.f32.mrf.mxu1  ;;  %vm7533_vm11 = vnez %v7340_v42  ;;  %vm7537_vm9 = vcmask 130048  }
 0x3d1   :  { %v2347_v24 = vadd.f32 %v2340_v49, %v2253_v43  ;;  %v1973_v57 = vsel %vm7533_vm11, %v1958_v30, 0.0  ;;  %v2434_v45 = vsel %vm5191_vm6, %v2415_v8, 0.0  ;;  %v2247_v53 = vsel %vm7535_vm4, %v2230_v0, 0.0  ;;  %v2146_v25 = vpop.f32.mrf.mxu0 }
 0x3d2   :  { %v1980_v60 = vadd.f32 %v1973_v57, %v1886_v18  ;;  %v2254_v30 = vadd.f32 %v2247_v53, %v2160_v6  ;;  %vm7538_vm4 = vnez %v7358_v26  ;;  %vm7539_vm6 = vnez %v7375_v40 }
 0x3d3   :  { %v2441_v15 = vadd.f32 %v2434_v45, %v2347_v24  ;;  %v2067_v47 = vsel %vm7538_vm4, %v5947_v19, 0.0  ;;  %vm7541_vm11 = vnez %v7380_v48  ;;  %vm7542_vm4 = vnez %v7362_v37 }
 0x3d4   :  { %v2074_v43 = vadd.f32 %v2067_v47, %v1980_v60  ;;  %v1887_v19 = vsel %vm7542_vm4, %v5949_v54, 0.0 }
 0x3d5   :  { %v6020_v10 = vadd.f32 %v5986_v9, %v2441_v15 }
 0x3d6   :  { %v2161_v45 = vadd.f32 %v2146_v25, %v2074_v43 }
 0x3d7   :  { %7536 = vst [vmem:[#allocation27_spill] sm:$0xff] %v6020_v10  ;;  %v2324_v14 = vpop.f32.mrf.mxu3  ;;  %2556 = vrot.lane.b32.xlu0 %v5997_v27, %s3978_s24  ;;  %2474 = vrot.lane.b32.xlu2 %v6020_v10, %s3975_s22 }
 0x3d8   :  { %2459 = vst.msk [vmem:[#allocation2 + $0x35] sm:$0xff] %vm7537_vm9, %v6020_v10  ;;  %v2341_v46 = vsel %vm7539_vm6, %v2324_v14, 0.0  ;;  %v2418_v20 = vpop.f32.mrf.mxu2  ;;  %2502 = vrot.lane.b32.xlu1 %v6020_v10, %s3976_s23  ;;  %v2233_v28 = vpop.f32.mrf.mxu1  ;;  %vm7540_vm9 = vnez %v7370_v32  ;;  %vm7543_vm6 = vnez %v7387_v51 }
 0x3d9   :  { %v2348_v33 = vadd.f32 %v2341_v46, %v2254_v30  ;;  %v1974_v49 = vsel %vm7540_vm9, %v5951_v2, 0.0  ;;  %v2435_v8 = vsel %vm7541_vm11, %v2418_v20, 0.0  ;;  %v2248_v24 = vsel %vm7543_vm6, %v2233_v28, 0.0  ;;  %v2149_v54 = vpop.f32.mrf.mxu0 }
 0x3da   :  { %v1981_v0 = vadd.f32 %v1974_v49, %v1887_v19  ;;  %v2255_v2 = vadd.f32 %v2248_v24, %v2161_v45  ;;  %vm7545_vm6 = vnez %v7384_v59  ;;  %vm7546_vm11 = vnez %v7394_v12 }
 0x3db   :  { %v2442_v31 = vadd.f32 %v2435_v8, %v2348_v33  ;;  %v2068_v18 = vsel %vm7545_vm6, %v5953_v5, 0.0  ;;  %vm7548_vm9 = vnez %v7399_v38  ;;  %vm7549_vm6 = vnez %v7391_v1 }
 0x3dc   :  { %v2075_v6 = vadd.f32 %v2068_v18, %v1981_v0  ;;  %v1888_v5 = vsel %vm7549_vm6, %v5955_v17, 0.0 }
 0x3dd   :  { %v6046_v57 = vadd.f32 %v5986_v9, %v2442_v31 }
 0x3de   :  { %v2162_v28 = vadd.f32 %v2149_v54, %v2075_v6 }
 0x3df   :  { %2460 = vst.msk [vmem:[#allocation2 + $0x3d] sm:$0xff] %vm7544_vm10, %v6046_v57  ;;  %v2327_v15 = vpop.f32.mrf.mxu3  ;;  %2530 = vrot.lane.b32.xlu0 %v6020_v10, %s3977_s1  ;;  %2504 = vrot.lane.b32.xlu2 %v6046_v57, %s3976_s23  ;;  %vm7547_vm10 = vnez %v7396_v3 }
 0x3e0   :  { %v2342_v53 = vsel %vm7546_vm11, %v2327_v15, 0.0  ;;  %v2421_v60 = vpop.f32.mrf.mxu2  ;;  %2558 = vrot.lane.b32.xlu1 %v6020_v10, %s3978_s24  ;;  %v2236_v30 = vpop.f32.mrf.mxu1  ;;  %v1975_v14 = vsel %vm7547_vm10, %v5957_v34, 0.0  ;;  %vm7550_vm11 = vcmask 130048  }
 0x3e1   :  { %v2349_v25 = vadd.f32 %v2342_v53, %v2255_v2  ;;  %v2436_v47 = vsel %vm7548_vm9, %v2421_v60, 0.0  ;;  %v2249_v20 = vsel %vm5385_vm14, %v2236_v30, 0.0  ;;  %v1982_v43 = vadd.f32 %v1975_v14, %v1888_v5  ;;  %v2152_v45 = vpop.f32.mrf.mxu0  ;;  %v7558_v5 = vld [vmem:[#allocation19_spill] sm:$0xff]  ;;  %v7647_v53 = vld [vmem:[#allocation9_spill] sm:$0xff] }
 0x3e2   :  { %v2256_v49 = vadd.f32 %v2249_v20, %v2162_v28  ;;  %vm7551_vm9 = vnez %v7401_v63  ;;  %vm7552_vm14 = vnez %v7412_v13  ;;  %v1976_v2 = vsel %vm5403_vm5, %v5967_v7, 0.0  ;;  %v7556_v7 = vld [vmem:[#allocation17_spill] sm:$0xff] }
 0x3e3   :  { %v2443_v46 = vadd.f32 %v2436_v47, %v2349_v25  ;;  %v2069_v17 = vsel %vm7551_vm9, %v5959_v52, 0.0  ;;  %v7553_v52 = vld [vmem:[#allocation13_spill] sm:$0xff]  ;;  %vm7559_vm5 = vnez %v7558_v5 }
 0x3e4   :  { %v2076_v19 = vadd.f32 %v2069_v17, %v1982_v43 }
 0x3e5   :  { %v2454_v33 = vadd.f32 %v5986_v9, %v2443_v46 }
 0x3e6   :  { %v2163_v30 = vadd.f32 %v2152_v45, %v2076_v19  ;;  %v7561_v19 = vld [vmem:[#allocation21_spill] sm:$0xff] }
 0x3e7   :  { %2461 = vst.msk [vmem:[#allocation2 + $0x45] sm:$0xff] %vm7550_vm11, %v2454_v33  ;;  %v2330_v8 = vpop.f32.mrf.mxu3  ;;  %2560 = vrot.lane.b32.xlu2 %v6046_v57, %s3978_s24  ;;  %2476 = vrot.lane.b32.xlu0 %v6046_v57, %s3975_s22  ;;  %vm7554_vm11 = vnez %v7553_v52 }
 0x3e8   :  { %v2343_v34 = vsel %vm7552_vm14, %v2330_v8, 0.0  ;;  %v2424_v31 = vpop.f32.mrf.mxu2  ;;  %2586 = vrot.lane.b32.xlu1 %v6020_v10, %s3979_s25  ;;  %v2239_v0 = vpop.f32.mrf.mxu1  ;;  %v1889_v18 = vsel %vm7554_vm11, %v5961_v61, 0.0  ;;  %vm7587_vm11 = vcmask 392448   ;;  %vm7594_vm14 = vcmask 786048  }
 0x3e9   :  { %v2350_v24 = vadd.f32 %v2343_v34, %v2256_v49  ;;  %v2437_v15 = vsel %vm5416_vm13, %v2424_v31, 0.0  ;;  %v2250_v60 = vsel %vm5437_vm12, %v2239_v0, 0.0  ;;  %v1983_v6 = vadd.f32 %v1976_v2, %v1889_v18  ;;  %v2155_v31 = vpop.f32.mrf.mxu0 }
 0x3ea   :  { %v2257_v14 = vadd.f32 %v2250_v60, %v2163_v30  ;;  %vm7557_vm13 = vnez %v7556_v7  ;;  %vm7562_vm12 = vnez %v7561_v19 }
 0x3eb   :  { %v2444_v54 = vadd.f32 %v2437_v15, %v2350_v24  ;;  %v2070_v46 = vsel %vm7557_vm13, %v5971_v22, 0.0  ;;  %v7563_v15 = vld [vmem:[#allocation23_spill] sm:$0xff]  ;;  %vm7579_vm13 = vcmask 917248  }
 0x3ec   :  { %v2077_v43 = vadd.f32 %v2070_v46, %v1983_v6  ;;  %v7565_v6 = vld [vmem:[#allocation24_spill] sm:$0xff] }
 0x3ed   :  { %v2455_v25 = vadd.f32 %v5986_v9, %v2444_v54  ;;  %v2747_v46 = vld [vmem:[%s7165_s6 + $0xd8] sm:$0xff] }
 0x3ee   :  { %v2164_v0 = vadd.f32 %v2155_v31, %v2077_v43  ;;  %2771 = vmatpush.msrb.mxu1 %v2747_v46  ;;  %v2838_v31 = vld [vmem:[%s7165_s6 + $0x130] sm:$0xff] }
 0x3ef   :  { %v2333_v47 = vpop.f32.mrf.mxu3  ;;  %2588 = vrot.lane.b32.xlu2 %v6046_v57, %s3979_s25  ;;  %2506 = vrot.lane.b32.xlu0 %v2454_v33, %s3976_s23 }
 0x3f0   :  { %v2344_v61 = vsel %vm7559_vm5, %v2333_v47, 0.0  ;;  %v2427_v20 = vpop.f32.mrf.mxu2  ;;  %2532 = vrot.lane.b32.xlu1 %v6046_v57, %s3977_s1  ;;  %v2242_v49 = vpop.f32.mrf.mxu1  ;;  %vm7564_vm5 = vnez %v7563_v15 }
 0x3f1   :  { %v2351_v28 = vadd.f32 %v2344_v61, %v2257_v14  ;;  %v2438_v17 = vsel %vm5460_vm0, %v2427_v20, 0.0  ;;  %v2251_v24 = vsel %vm7562_vm12, %v2242_v49, 0.0  ;;  %vm7566_vm0 = vnez %v7565_v6  ;;  %v2840_v61 = vld [vmem:[%s7165_s6 + $0x140] sm:$0xff]  ;;  %v2839_v49 = vld [vmem:[%s7165_s6 + $0x138] sm:$0xff] }
 0x3f2   :  { %v2258_v45 = vadd.f32 %v2251_v24, %v2164_v0  ;;  %v2659_v20 = vld [vmem:[%s7165_s6 + $0x60] sm:$0xff]  ;;  %v2657_v24 = vld [vmem:[%s7165_s6 + $0x50] sm:$0xff]  ;;  %vm7569_vm12 = vcmask 523648  }
 0x3f3   :  { %v2445_v34 = vadd.f32 %v2438_v17, %v2351_v28  ;;  %v2746_v28 = vld [vmem:[%s7165_s6 + $0xd0] sm:$0xff]  ;;  %v2658_v17 = vld [vmem:[%s7165_s6 + $0x58] sm:$0xff] }
 0x3f4   :  { %2772 = vmatpush.msrb.mxu1 %v2746_v28  ;;  %v2835_v28 = vld [vmem:[%s7165_s6 + $0x118] sm:$0xff] }
 0x3f5   :  { %v2456_v22 = vadd.f32 %v5986_v9, %v2445_v34  ;;  %v2745_v34 = vld [vmem:[%s7165_s6 + $0xc8] sm:$0xff] }
 0x3f6   :  { %2773 = vmatpush.msrb.mxu1 %v2745_v34  ;;  %v2741_v34 = vld [vmem:[%s7165_s6 + $0xa8] sm:$0xff] }
 0x3f7   :  { %v2336_v2 = vpop.f32.mrf.mxu3  ;;  %2534 = vrot.lane.b32.xlu2 %v2454_v33, %s3977_s1  ;;  %2562 = vrot.lane.b32.xlu0 %v2454_v33, %s3978_s24 }
 0x3f8   :  { %v2345_v54 = vsel %vm7564_vm5, %v2336_v2, 0.0  ;;  %v2430_v18 = vpop.f32.mrf.mxu2  ;;  %2616 = vrot.lane.b32.xlu1 %v6046_v57, %s3980_s26  ;;  %vm7568_vm5 = vcmask 392448   ;;  %v2744_v2 = vld [vmem:[%s7165_s6 + $0xc0] sm:$0xff] }
 0x3f9   :  { %v2352_v60 = vadd.f32 %v2345_v54, %v2258_v45  ;;  %v2439_v30 = vsel %vm7566_vm0, %v2430_v18, 0.0  ;;  %vm7567_vm0 = vcmask 261248   ;;  %v2837_v54 = vld [vmem:[%s7165_s6 + $0x128] sm:$0xff]  ;;  %v2935_v18 = vld [vmem:[%s7165_s6 + $0x1b8] sm:$0xff]  ;;  %2774 = vmatpush.msrb.mxu1 %v2744_v2 }
 0x3fa   :  { %2959 = vmatpush.msra.mxu2 %v2935_v18 }
 0x3fb   :  { %v2446_v14 = vadd.f32 %v2439_v30, %v2352_v60  ;;  %v2656_v60 = vld [vmem:[%s7165_s6 + $0x48] sm:$0xff]  ;;  %v2934_v30 = vld [vmem:[%s7165_s6 + $0x1b0] sm:$0xff] }
 0x3fc   :  { %2960 = vmatpush.msra.mxu2 %v2934_v30  ;;  %v2928_v30 = vld [vmem:[%s7165_s6 + $0x180] sm:$0xff] }
 0x3fd   :  { %v2457_v47 = vadd.f32 %v5986_v9, %v2446_v14  ;;  %v2743_v14 = vld [vmem:[%s7165_s6 + $0xb8] sm:$0xff] }
 0x3fe   :  { %2775 = vmatpush.msrb.mxu1 %v2743_v14  ;;  %v2833_v14 = vld [vmem:[%s7165_s6 + $0x108] sm:$0xff] }
 0x3ff   :  { %2618 = vrot.lane.b32.xlu2 %v2454_v33, %s3980_s26  ;;  %2590 = vrot.lane.b32.xlu0 %v2454_v33, %s3979_s25 }
 0x400   :  { %2478 = vrot.lane.b32.xlu1 %v2454_v33, %s3975_s22  ;;  %v2841_v33 = vld [vmem:[%s7165_s6 + $0x148] sm:$0xff] }
 0x401   :  { %2865 = vmatpush.msrb.mxu3 %v2841_v33 }
 0x403   :  { %2866 = vmatpush.msrb.mxu3 %v2840_v61  ;;  %v2932_v61 = vld [vmem:[%s7165_s6 + $0x1a0] sm:$0xff] }
 0x405   :  { %2867 = vmatpush.msrb.mxu3 %v2839_v49  ;;  %v2931_v49 = vld [vmem:[%s7165_s6 + $0x198] sm:$0xff] }
 0x407   :  { %2536 = vrot.lane.b32.xlu0 %v2455_v25, %s3977_s1  ;;  %2508 = vrot.lane.b32.xlu2 %v2455_v25, %s3976_s23 }
 0x408   :  { %2480 = vrot.lane.b32.xlu1 %v2455_v25, %s3975_s22  ;;  %2868 = vmatpush.msrb.mxu3 %v2838_v31  ;;  %v2834_v31 = vld [vmem:[%s7165_s6 + $0x110] sm:$0xff] }
 0x40a   :  { %2869 = vmatpush.msrb.mxu3 %v2837_v54 }
 0x40f   :  { %2620 = vrot.lane.b32.xlu0 %v2455_v25, %s3980_s26  ;;  %2592 = vrot.lane.b32.xlu2 %v2455_v25, %s3979_s25 }
 0x410   :  { %2564 = vrot.lane.b32.xlu1 %v2455_v25, %s3978_s24  ;;  %v2660_v25 = vld [vmem:[%s7165_s6 + $0x68] sm:$0xff] }
 0x411   :  { %2684 = vmatpush.msrb.mxu0 %v2660_v25 }
 0x413   :  { %2685 = vmatpush.msrb.mxu0 %v2659_v20  ;;  %v2742_v20 = vld [vmem:[%s7165_s6 + $0xb0] sm:$0xff] }
 0x414   :  { %2776 = vmatpush.msrb.mxu1 %v2742_v20  ;;  %v2738_v20 = vld [vmem:[%s7165_s6 + $0x90] sm:$0xff] }
 0x415   :  { %2686 = vmatpush.msrb.mxu0 %v2658_v17  ;;  %v2654_v17 = vld [vmem:[%s7165_s6 + $0x38] sm:$0xff] }
 0x416   :  { %2777 = vmatpush.msrb.mxu1 %v2741_v34  ;;  %v2650_v34 = vld [vmem:[%s7165_s6 + $0x18] sm:$0xff] }
 0x417   :  { %2510 = vrot.lane.b32.xlu0 %v2456_v22, %s3976_s23  ;;  %2482 = vrot.lane.b32.xlu2 %v2456_v22, %s3975_s22 }
 0x418   :  { %2538 = vrot.lane.b32.xlu1 %v2456_v22, %s3977_s1  ;;  %2687 = vmatpush.msrb.mxu0 %v2657_v24  ;;  %v2930_v24 = vld [vmem:[%s7165_s6 + $0x190] sm:$0xff] }
 0x41a   :  { %2688 = vmatpush.msrb.mxu0 %v2656_v60  ;;  %v2740_v60 = vld [vmem:[%s7165_s6 + $0xa0] sm:$0xff] }
 0x41b   :  { %2778 = vmatpush.msrb.mxu1 %v2740_v60  ;;  %v2648_v60 = vld [vmem:[%s7165_s6 + $0x8] sm:$0xff] }
 0x41f   :  { %2594 = vrot.lane.b32.xlu0 %v2456_v22, %s3979_s25  ;;  %2566 = vrot.lane.b32.xlu2 %v2456_v22, %s3978_s24 }
 0x420   :  { %2622 = vrot.lane.b32.xlu1 %v2456_v22, %s3980_s26 }
 0x427   :  { %2596 = vrot.lane.b32.xlu0 %v2457_v47, %s3979_s25  ;;  %2624 = vrot.lane.b32.xlu2 %v2457_v47, %s3980_s26 }
 0x428   :  { %2568 = vrot.lane.b32.xlu1 %v2457_v47, %s3978_s24 }
 0x429   :  { %v2529_v9 = vpop.permute.xlu2 %2528 }
 0x42f   :  { %2484 = vrot.lane.b32.xlu0 %v2457_v47, %s3975_s22  ;;  %2540 = vrot.lane.b32.xlu2 %v2457_v47, %s3977_s1 }
 0x430   :  { %2512 = vrot.lane.b32.xlu1 %v2457_v47, %s3976_s23  ;;  %v2836_v47 = vld [vmem:[%s7165_s6 + $0x120] sm:$0xff] }
 0x431   :  { %v2475_v57 = vpop.permute.xlu2 %2474  ;;  %2870 = vmatpush.msrb.mxu3 %v2836_v47  ;;  %v2652_v47 = vld [vmem:[%s7165_s6 + $0x28] sm:$0xff] }
 0x432   :  { %2494 = vst.msk [vmem:[#allocation2 + $0x2e] sm:$0xff] %vm7567_vm0, %v2475_v57  ;;  %v2933_v57 = vld [vmem:[%s7165_s6 + $0x1a8] sm:$0xff] }
 0x433   :  { %2961 = vmatpush.msra.mxu2 %v2933_v57  ;;  %2871 = vmatpush.msrb.mxu3 %v2835_v28 }
 0x435   :  { %2962 = vmatpush.msra.mxu2 %v2932_v61  ;;  %2872 = vmatpush.msrb.mxu3 %v2834_v31  ;;  %v2651_v61 = vld [vmem:[%s7165_s6 + $0x20] sm:$0xff]  ;;  %v2737_v31 = vld [vmem:[%s7165_s6 + $0x88] sm:$0xff] }
 0x437   :  { %2963 = vmatpush.msra.mxu2 %v2931_v49  ;;  %2873 = vmatpush.msrb.mxu3 %v2833_v14  ;;  %v2832_v49 = vld [vmem:[%s7165_s6 + $0x100] sm:$0xff]  ;;  %v2829_v14 = vld [vmem:[%s7165_s6 + $0xe8] sm:$0xff] }
 0x439   :  { %v6156_v43 = vpop.permute.xlu2 %2504  ;;  %2964 = vmatpush.msra.mxu2 %v2930_v24  ;;  %2874 = vmatpush.msrb.mxu3 %v2832_v49  ;;  %v2831_v24 = vld [vmem:[%s7165_s6 + $0xf8] sm:$0xff] }
 0x43b   :  { %2875 = vmatpush.msrb.mxu3 %v2831_v24  ;;  %v3210_v24 = vld [vmem:[%s7165_s6 + $0x308] sm:$0xff] }
 0x441   :  { %v2501_v22 = vpop.permute.xlu0 %2500  ;;  %v6176_v0 = vpop.permute.xlu2 %2560 }
 0x442   :  { %v2473_v45 = vpop.permute.xlu1 %2472 }
 0x443   :  { %2493 = vst.msk [vmem:[#allocation2 + $0x26] sm:$0xff] %vm7567_vm0, %v2473_v45  ;;  %v2929_v45 = vld [vmem:[%s7165_s6 + $0x188] sm:$0xff]  ;;  %vm7572_vm0 = vcmask 523648  }
 0x444   :  { %2521 = vst.msk [vmem:[#allocation2 + $0x1f] sm:$0xff] %vm7568_vm5, %v2501_v22  ;;  %vm7570_vm5 = vcmask 654848   ;;  %v2653_v22 = vld [vmem:[%s7165_s6 + $0x30] sm:$0xff]  ;;  %2965 = vmatpush.msra.mxu2 %v2929_v45 }
 0x445   :  { %2549 = vst.msk [vmem:[#allocation2 + $0x18] sm:$0xff] %vm7569_vm12, %v2529_v9  ;;  %v2655_v9 = vld [vmem:[%s7165_s6 + $0x40] sm:$0xff]  ;;  %vm7571_vm12 = vcmask 392448   ;;  %v2649_v45 = vld [vmem:[%s7165_s6 + $0x10] sm:$0xff] }
 0x446   :  { %2689 = vmatpush.msrb.mxu0 %v2655_v9  ;;  %2966 = vmatpush.msra.mxu2 %v2928_v30  ;;  %v2739_v9 = vld [vmem:[%s7165_s6 + $0x98] sm:$0xff] }
 0x447   :  { %2779 = vmatpush.msrb.mxu1 %v2739_v9  ;;  %v2735_v30 = vld [vmem:[%s7165_s6 + $0x78] sm:$0xff]  ;;  %v2647_v9 = vld [vmem:[%s7165_s6] sm:$0xff] }
 0x448   :  { %2690 = vmatpush.msrb.mxu0 %v2654_v17  ;;  %v2926_v17 = vld [vmem:[%s7165_s6 + $0x170] sm:$0xff] }
 0x449   :  { %v2557_v33 = vpop.permute.xlu0 %2556  ;;  %v6208_v25 = vpop.permute.xlu2 %2588  ;;  %2780 = vmatpush.msrb.mxu1 %v2738_v20  ;;  %v2734_v20 = vld [vmem:[%s7165_s6 + $0x70] sm:$0xff] }
 0x44a   :  { %2577 = vst.msk [vmem:[#allocation2 + $0x11] sm:$0xff] %vm7570_vm5, %v2557_v33  ;;  %v2503_v46 = vpop.permute.xlu1 %2502  ;;  %2691 = vmatpush.msrb.mxu0 %v2653_v22  ;;  %v2925_v22 = vld [vmem:[%s7165_s6 + $0x168] sm:$0xff] }
 0x44b   :  { %2522 = vst.msk [vmem:[#allocation2 + $0x27] sm:$0xff] %vm7571_vm12, %v2503_v46  ;;  %v2927_v46 = vld [vmem:[%s7165_s6 + $0x178] sm:$0xff]  ;;  %vm7573_vm12 = vcmask 261248   ;;  %2781 = vmatpush.msrb.mxu1 %v2737_v31 }
 0x44c   :  { %2692 = vmatpush.msrb.mxu0 %v2652_v47  ;;  %2967 = vmatpush.msra.mxu2 %v2927_v46  ;;  %v2923_v47 = vld [vmem:[%s7165_s6 + $0x158] sm:$0xff] }
 0x44e   :  { %2693 = vmatpush.msrb.mxu0 %v2651_v61  ;;  %2968 = vmatpush.msra.mxu2 %v2926_v17 }
 0x450   :  { %2694 = vmatpush.msrb.mxu0 %v2650_v34  ;;  %2969 = vmatpush.msra.mxu2 %v2925_v22  ;;  %v3116_v22 = vld [vmem:[%s7165_s6 + $0x298] sm:$0xff] }
 0x451   :  { %v2531_v2 = vpop.permute.xlu0 %2530  ;;  %v6242_v54 = vpop.permute.xlu2 %2534 }
 0x452   :  { %2550 = vst.msk [vmem:[#allocation2 + $0x20] sm:$0xff] %vm7572_vm0, %v2531_v2  ;;  %v2559_v18 = vpop.permute.xlu1 %2558  ;;  %vm7574_vm0 = vcmask 786048   ;;  %v2736_v2 = vld [vmem:[%s7165_s6 + $0x80] sm:$0xff]  ;;  %2695 = vmatpush.msrb.mxu0 %v2649_v45 }
 0x453   :  { %2578 = vst.msk [vmem:[#allocation2 + $0x19] sm:$0xff] %vm7570_vm5, %v2559_v18  ;;  %vm7575_vm5 = vcmask 392448   ;;  %v2830_v18 = vld [vmem:[%s7165_s6 + $0xf0] sm:$0xff]  ;;  %2782 = vmatpush.msrb.mxu1 %v2736_v2  ;;  %v3021_v45 = vld [vmem:[%s7165_s6 + $0x220] sm:$0xff] }
 0x454   :  { %2876 = vmatpush.msrb.mxu3 %v2830_v18  ;;  %2696 = vmatpush.msrb.mxu0 %v2648_v60  ;;  %v3115_v60 = vld [vmem:[%s7165_s6 + $0x290] sm:$0xff] }
 0x455   :  { %2783 = vmatpush.msrb.mxu1 %v2735_v30  ;;  %v3208_v30 = vld [vmem:[%s7165_s6 + $0x2f8] sm:$0xff] }
 0x456   :  { %2877 = vmatpush.msrb.mxu3 %v2829_v14  ;;  %2697 = vmatpush.msrb.mxu0 %v2647_v9  ;;  %v3020_v14 = vld [vmem:[%s7165_s6 + $0x218] sm:$0xff]  ;;  %v3207_v9 = vld [vmem:[%s7165_s6 + $0x2f0] sm:$0xff] }
 0x457   :  { %2784 = vmatpush.msrb.mxu1 %v2734_v20 }
 0x459   :  { %v2477_v57 = vpop.permute.xlu0 %2476  ;;  %v6261_v33 = vpop.permute.xlu2 %2618  ;;  %3140 = vmatpush.msra.mxu1 %v3116_v22 }
 0x45a   :  { %v2587_v28 = vpop.permute.xlu1 %2586  ;;  %2495 = vst.msk [vmem:[#allocation2 + $0x36] sm:$0xff] %vm7573_vm12, %v2477_v57  ;;  %v2828_v57 = vld [vmem:[%s7165_s6 + $0xe0] sm:$0xff]  ;;  %vm7576_vm12 = vcmask 523648  }
 0x45b   :  { %2606 = vst.msk [vmem:[#allocation2 + $0x12] sm:$0xff] %vm7574_vm0, %v2587_v28  ;;  %v2922_v28 = vld [vmem:[%s7165_s6 + $0x150] sm:$0xff]  ;;  %2878 = vmatpush.msrb.mxu3 %v2828_v57  ;;  %vm7577_vm0 = vcmask 654848   ;;  %3141 = vmatpush.msra.mxu1 %v3115_v60  ;;  %v3204_v60 = vld [vmem:[%s7165_s6 + $0x2d8] sm:$0xff] }
 0x45c   :  { %2523 = vst.msk [vmem:[#allocation2 + $0x2f] sm:$0xff] %vm7575_vm5, %v6156_v43  ;;  %v2924_v43 = vld [vmem:[%s7165_s6 + $0x160] sm:$0xff]  ;;  %vm7578_vm5 = vcmask 786048   ;;  %v3019_v57 = vld [vmem:[%s7165_s6 + $0x210] sm:$0xff] }
 0x45d   :  { %2970 = vmatpush.msra.mxu2 %v2924_v43  ;;  %3234 = vmatpush.msra.mxu3 %v3210_v24 }
 0x45f   :  { %2971 = vmatpush.msra.mxu2 %v2923_v47  ;;  %v3114_v47 = vld [vmem:[%s7165_s6 + $0x288] sm:$0xff] }
 0x460   :  { %3142 = vmatpush.msra.mxu1 %v3114_v47  ;;  %v3015_v47 = vld [vmem:[%s7165_s6 + $0x1f0] sm:$0xff] }
 0x461   :  { %v2507_v46 = vpop.permute.xlu0 %2506  ;;  %v2509_v61 = vpop.permute.xlu2 %2508  ;;  %2972 = vmatpush.msra.mxu2 %v2922_v28  ;;  %v3113_v28 = vld [vmem:[%s7165_s6 + $0x280] sm:$0xff] }
 0x462   :  { %v2533_v49 = vpop.permute.xlu1 %2532  ;;  %3143 = vmatpush.msra.mxu1 %v3113_v28 }
 0x463   :  { %2551 = vst.msk [vmem:[#allocation2 + $0x28] sm:$0xff] %vm7576_vm12, %v2533_v49  ;;  %vm7581_vm12 = vcmask 392448   ;;  %v3206_v49 = vld [vmem:[%s7165_s6 + $0x2e8] sm:$0xff] }
 0x464   :  { %2579 = vst.msk [vmem:[#allocation2 + $0x21] sm:$0xff] %vm7577_vm0, %v6176_v0  ;;  %v3022_v0 = vld [vmem:[%s7165_s6 + $0x228] sm:$0xff]  ;;  %vm7582_vm0 = vcmask 523648  }
 0x465   :  { %2607 = vst.msk [vmem:[#allocation2 + $0x1a] sm:$0xff] %vm7578_vm5, %v6208_v25  ;;  %v3209_v25 = vld [vmem:[%s7165_s6 + $0x300] sm:$0xff]  ;;  %3046 = vmatpush.msra.mxu0 %v3022_v0  ;;  %vm7583_vm5 = vcmask 654848  }
 0x466   :  { %3235 = vmatpush.msra.mxu3 %v3209_v25 }
 0x467   :  { %3047 = vmatpush.msra.mxu0 %v3021_v45 }
 0x468   :  { %3236 = vmatpush.msra.mxu3 %v3208_v30  ;;  %v3016_v30 = vld [vmem:[%s7165_s6 + $0x1f8] sm:$0xff] }
 0x469   :  { %v2563_v17 = vpop.permute.xlu0 %2562  ;;  %v6335_v34 = vpop.permute.xlu2 %2592  ;;  %3048 = vmatpush.msra.mxu0 %v3020_v14  ;;  %v3203_v14 = vld [vmem:[%s7165_s6 + $0x2d0] sm:$0xff] }
 0x46a   :  { %v2617_v31 = vpop.permute.xlu1 %2616  ;;  %3237 = vmatpush.msra.mxu3 %v3207_v9 }
 0x46b   :  { %2635 = vst.msk [vmem:[#allocation2 + $0x13] sm:$0xff] %vm7579_vm13, %v2617_v31  ;;  %vm7580_vm13 = vcmask 261248   ;;  %3049 = vmatpush.msra.mxu0 %v3019_v57  ;;  %v3017_v31 = vld [vmem:[%s7165_s6 + $0x200] sm:$0xff] }
 0x46c   :  { %3238 = vmatpush.msra.mxu3 %v3206_v49 }
 0x471   :  { %v2591_v2 = vpop.permute.xlu0 %2590  ;;  %v2483_v18 = vpop.permute.xlu2 %2482 }
 0x472   :  { %v2479_v43 = vpop.permute.xlu1 %2478 }
 0x473   :  { %2496 = vst.msk [vmem:[#allocation2 + $0x3e] sm:$0xff] %vm7580_vm13, %v2479_v43  ;;  %vm7584_vm13 = vcmask 786048   ;;  %v3111_v43 = vld [vmem:[%s7165_s6 + $0x270] sm:$0xff] }
 0x474   :  { %2524 = vst.msk [vmem:[#allocation2 + $0x37] sm:$0xff] %vm7581_vm12, %v2507_v46  ;;  %vm7585_vm12 = vcmask 917248  }
 0x475   :  { %2552 = vst.msk [vmem:[#allocation2 + $0x30] sm:$0xff] %vm7582_vm0, %v6242_v54  ;;  %vm7586_vm0 = vcmask 261248  }
 0x476   :  { %2580 = vst.msk [vmem:[#allocation2 + $0x29] sm:$0xff] %vm7583_vm5, %v2563_v17  ;;  %vm7588_vm5 = vcmask 523648   ;;  %v3205_v17 = vld [vmem:[%s7165_s6 + $0x2e0] sm:$0xff] }
 0x477   :  { %2608 = vst.msk [vmem:[#allocation2 + $0x22] sm:$0xff] %vm7584_vm13, %v2591_v2  ;;  %3239 = vmatpush.msra.mxu3 %v3205_v17  ;;  %v3202_v17 = vld [vmem:[%s7165_s6 + $0x2c8] sm:$0xff] }
 0x478   :  { %2636 = vst.msk [vmem:[#allocation2 + $0x1b] sm:$0xff] %vm7585_vm12, %v6261_v33  ;;  %v3018_v33 = vld [vmem:[%s7165_s6 + $0x208] sm:$0xff] }
 0x479   :  { %v2537_v54 = vpop.permute.xlu0 %2536  ;;  %v2567_v46 = vpop.permute.xlu2 %2566  ;;  %3050 = vmatpush.msra.mxu0 %v3018_v33  ;;  %3240 = vmatpush.msra.mxu3 %v3204_v60  ;;  %v3106_v60 = vld [vmem:[%s7165_s6 + $0x248] sm:$0xff] }
 0x47a   :  { %v2481_v20 = vpop.permute.xlu1 %2480 }
 0x47b   :  { %2497 = vst.msk [vmem:[#allocation2 + $0x46] sm:$0xff] %vm7586_vm0, %v2481_v20  ;;  %3051 = vmatpush.msra.mxu0 %v3017_v31  ;;  %3241 = vmatpush.msra.mxu3 %v3203_v14  ;;  %v3108_v31 = vld [vmem:[%s7165_s6 + $0x258] sm:$0xff] }
 0x47c   :  { %2525 = vst.msk [vmem:[#allocation2 + $0x3f] sm:$0xff] %vm7587_vm11, %v2509_v61  ;;  %v3112_v61 = vld [vmem:[%s7165_s6 + $0x278] sm:$0xff]  ;;  %vm7589_vm11 = vcmask 916480  }
 0x47d   :  { %2553 = vst.msk [vmem:[#allocation2 + $0x38] sm:$0xff] %vm7588_vm5, %v2537_v54  ;;  %3144 = vmatpush.msra.mxu1 %v3112_v61  ;;  %vm7590_vm13 = vmmov %vm7589_vm11  ;;  %vm7593_vm5 = vcmask 654848   ;;  %3052 = vmatpush.msra.mxu0 %v3016_v30  ;;  %v3109_v61 = vld [vmem:[%s7165_s6 + $0x260] sm:$0xff]  ;;  %v3011_v30 = vld [vmem:[%s7165_s6 + $0x1d0] sm:$0xff] }
 0x47e   :  { %vm7591_vm12 = vmmov %vm7589_vm11  ;;  %3242 = vmatpush.msra.mxu3 %v3202_v17  ;;  %v3009_v17 = vld [vmem:[%s7165_s6 + $0x1c0] sm:$0xff] }
 0x47f   :  { %v2640_v24 = vld [vmem:[#allocation2 + $0x15] sm:$0xff]  ;;  %vm7592_vm0 = vmmov %vm7589_vm11  ;;  %3145 = vmatpush.msra.mxu1 %v3111_v43  ;;  %3053 = vmatpush.msra.mxu0 %v3015_v47 }
 0x480   :  { %v2727_v0 = vld [vmem:[#allocation2 + $0x16] sm:$0xff]  ;;  %3880 = vmatmul.msk.f32.vlgmr.msrb.gmra.mxu0 %vm7589_vm11, %v2640_v24  ;;  %vm7595_vm11 = vcmask 917248   ;;  %v3201_v24 = vld [vmem:[%s7165_s6 + $0x2c0] sm:$0xff] }
 0x481   :  { %v2821_v22 = vld [vmem:[#allocation2 + $0x17] sm:$0xff]  ;;  %3887 = vmatmul.msk.f32.vlgmr.msrb.gmra.mxu1 %vm7590_vm13, %v2727_v0  ;;  %v2621_v45 = vpop.permute.xlu0 %2620  ;;  %v2625_v2 = vpop.permute.xlu2 %2624  ;;  %vm7597_vm13 = vcmask 516480   ;;  %v3013_v0 = vld [vmem:[%s7165_s6 + $0x1e0] sm:$0xff]  ;;  %3243 = vmatpush.msra.mxu3 %v3201_v24 }
 0x482   :  { %v2915_v25 = vld [vmem:[#allocation2 + $0x18] sm:$0xff]  ;;  %3894 = vmatmul.msk.f32.vlgmr.msrb.gmra.mxu3 %vm7591_vm12, %v2821_v22  ;;  %v2565_v18 = vpop.permute.xlu1 %2564  ;;  %vm7598_vm12 = vcmask 523648  }
 0x483   :  { %3901 = vmatmul.msk.f32.vlgmr.msra.gmra.mxu2 %vm7592_vm0, %v2915_v25  ;;  %2581 = vst.msk [vmem:[#allocation2 + $0x31] sm:$0xff] %vm7593_vm5, %v2565_v18  ;;  %vm7599_vm0 = vmmov %vm7593_vm5  ;;  %vm7600_vm5 = vcmask 916480   ;;  %v3200_v18 = vld [vmem:[%s7165_s6 + $0x2b8] sm:$0xff] }
 0x484   :  { %2609 = vst.msk [vmem:[#allocation2 + $0x2a] sm:$0xff] %vm7594_vm14, %v6335_v34  ;;  %v3110_v34 = vld [vmem:[%s7165_s6 + $0x268] sm:$0xff]  ;;  %vm7596_vm14 = vcmask 392448   ;;  %v3012_v43 = vld [vmem:[%s7165_s6 + $0x1d8] sm:$0xff]  ;;  %3244 = vmatpush.msra.mxu3 %v3200_v18 }
 0x485   :  { %2637 = vst.msk [vmem:[#allocation2 + $0x23] sm:$0xff] %vm7595_vm11, %v2621_v45  ;;  %3146 = vmatpush.msra.mxu1 %v3110_v34  ;;  %vm7601_vm11 = vmmov %vm7600_vm5  ;;  %v3107_v45 = vld [vmem:[%s7165_s6 + $0x250] sm:$0xff] }
 0x487   :  { %3147 = vmatpush.msra.mxu1 %v3109_v61  ;;  %v3197_v61 = vld [vmem:[%s7165_s6 + $0x2a0] sm:$0xff] }
 0x489   :  { %v2511_v9 = vpop.permute.xlu0 %2510  ;;  %v2541_v57 = vpop.permute.xlu2 %2540  ;;  %3148 = vmatpush.msra.mxu1 %v3108_v31 }
 0x48a   :  { %v2539_v54 = vpop.permute.xlu1 %2538  ;;  %2526 = vst.msk [vmem:[#allocation2 + $0x47] sm:$0xff] %vm7596_vm14, %v2511_v9  ;;  %vm7602_vm14 = vmmov %vm7600_vm5 }
 0x48b   :  { %2555 = vst.msk [vmem:[#allocation2 + $0x48] sm:$0x1] %vm7597_vm13, %v2541_v57  ;;  %vm7603_vm13 = vmmov %vm7600_vm5  ;;  %3149 = vmatpush.msra.mxu1 %v3107_v45 }
 0x48c   :  { %2554 = vst.msk [vmem:[#allocation2 + $0x40] sm:$0xff] %vm7598_vm12, %v2539_v54  ;;  %v2641_v20 = vld [vmem:[#allocation2 + $0x1d] sm:$0xff]  ;;  %vm7604_vm12 = vcmask 786048  }
 0x48d   :  { %v2728_v28 = vld [vmem:[#allocation2 + $0x1e] sm:$0xff]  ;;  %2582 = vst.msk [vmem:[#allocation2 + $0x39] sm:$0xff] %vm7599_vm0, %v2567_v46  ;;  %3881 = vmatmul.msk.f32.gmra.mxu0 %vm7600_vm5, %v2641_v20  ;;  %v3014_v46 = vld [vmem:[%s7165_s6 + $0x1e8] sm:$0xff]  ;;  %vm7605_vm0 = vcmask 917248   ;;  %vm7606_vm5 = vcmask 910080   ;;  %3150 = vmatpush.msra.mxu1 %v3106_v60 }
 0x48e   :  { %v2822_v49 = vld [vmem:[#allocation2 + $0x1f] sm:$0xff]  ;;  %3888 = vmatmul.msk.f32.gmra.mxu1 %vm7601_vm11, %v2728_v28  ;;  %3054 = vmatpush.msra.mxu0 %v3014_v46  ;;  %vm7607_vm11 = vcmask 778880   ;;  %v3198_v28 = vld [vmem:[%s7165_s6 + $0x2a8] sm:$0xff]  ;;  %v3103_v46 = vld [vmem:[%s7165_s6 + $0x230] sm:$0xff] }
 0x48f   :  { %v2916_v33 = vld [vmem:[#allocation2 + $0x20] sm:$0xff]  ;;  %3895 = vmatmul.msk.f32.gmra.mxu3 %vm7602_vm14, %v2822_v49  ;;  %vm7608_vm14 = vcmask 647680   ;;  %v3010_v49 = vld [vmem:[%s7165_s6 + $0x1c8] sm:$0xff] }
 0x490   :  { %3902 = vmatmul.msk.f32.gmra.mxu2 %vm7603_vm13, %v2916_v33  ;;  %3055 = vmatpush.msra.mxu0 %v3013_v0  ;;  %v3105_v20 = vld [vmem:[%s7165_s6 + $0x240] sm:$0xff]  ;;  %v3104_v33 = vld [vmem:[%s7165_s6 + $0x238] sm:$0xff] }
 0x491   :  { %v2595_v22 = vpop.permute.xlu0 %2594  ;;  %3151 = vmatpush.msra.mxu1 %v3105_v20 }
 0x492   :  { %v2623_v25 = vpop.permute.xlu1 %2622  ;;  %2610 = vst.msk [vmem:[#allocation2 + $0x32] sm:$0xff] %vm7604_vm12, %v2595_v22  ;;  %3056 = vmatpush.msra.mxu0 %v3012_v43  ;;  %vm7609_vm12 = vmmov %vm7603_vm13  ;;  %v2921_v20 = vld [vmem:[#allocation2 + $0x48] sm:$0x1] }
 0x493   :  { %2638 = vst.msk [vmem:[#allocation2 + $0x2b] sm:$0xff] %vm7605_vm0, %v2623_v25  ;;  %vm7610_vm0 = vmmov %vm7609_vm12  ;;  %3152 = vmatpush.msra.mxu1 %v3104_v33  ;;  %v3190_v33 = vld [vmem:[#allocation2 + $0x1b] sm:$0xff] }
 0x494   :  { %2639 = vst.msk [vmem:[#allocation2 + $0x33] sm:$0x1] %vm7606_vm5, %v2625_v2  ;;  %v3199_v2 = vld [vmem:[%s7165_s6 + $0x2b0] sm:$0xff]  ;;  %3057 = vmatpush.msra.mxu0 %v3011_v30  ;;  %vm7611_vm5 = vmmov %vm7610_vm0 }
 0x495   :  { %3245 = vmatpush.msra.mxu3 %v3199_v2  ;;  %3153 = vmatpush.msra.mxu1 %v3103_v46  ;;  %vm7617_vm9 = vmmov %vm7610_vm0  ;;  %v3191_v46 = vld [vmem:[#allocation2 + $0x23] sm:$0xff] }
 0x496   :  { %3058 = vmatpush.msra.mxu0 %v3010_v49  ;;  %vm7618_vm10 = vmmov %vm7610_vm0  ;;  %v3096_v49 = vld [vmem:[#allocation2 + $0x1a] sm:$0xff] }
 0x497   :  { %3246 = vmatpush.msra.mxu3 %v3198_v28  ;;  %v3002_v28 = vld [vmem:[#allocation2 + $0x19] sm:$0xff] }
 0x498   :  { %3059 = vmatpush.msra.mxu0 %v3009_v17  ;;  %v3097_v17 = vld [vmem:[#allocation2 + $0x22] sm:$0xff] }
 0x499   :  { %v2597_v34 = vpop.permute.xlu0 %2596  ;;  %3247 = vmatpush.msra.mxu3 %v3197_v61  ;;  %v3003_v61 = vld [vmem:[#allocation2 + $0x21] sm:$0xff] }
 0x49a   :  { %v2569_v14 = vpop.permute.xlu1 %2568  ;;  %2611 = vst.msk [vmem:[#allocation2 + $0x3a] sm:$0x1] %vm7607_vm11, %v2597_v34  ;;  %v2642_v47 = vld [vmem:[#allocation2 + $0x25] sm:$0xff]  ;;  %vm7612_vm11 = vmmov %vm7610_vm0 }
 0x49b   :  { %v2729_v9 = vld [vmem:[#allocation2 + $0x26] sm:$0xff]  ;;  %2583 = vst.msk [vmem:[#allocation2 + $0x41] sm:$0x1] %vm7608_vm14, %v2569_v14  ;;  %3882 = vmatmul.msk.f32.gmra.mxu0 %vm7603_vm13, %v2642_v47  ;;  %v2730_v22 = vld [vmem:[#allocation2 + $0x2e] sm:$0xff]  ;;  %vm7613_vm14 = vmmov %vm7610_vm0 }
 0x49c   :  { %v2823_v57 = vld [vmem:[#allocation2 + $0x27] sm:$0xff]  ;;  %3889 = vmatmul.msk.f32.gmra.mxu1 %vm7609_vm12, %v2729_v9  ;;  %v2824_v25 = vld [vmem:[#allocation2 + $0x2f] sm:$0xff]  ;;  %vm7614_vm13 = vmmov %vm7610_vm0 }
 0x49d   :  { %v2917_v54 = vld [vmem:[#allocation2 + $0x28] sm:$0xff]  ;;  %3896 = vmatmul.msk.f32.gmra.mxu3 %vm7610_vm0, %v2823_v57  ;;  %v2918_v45 = vld [vmem:[#allocation2 + $0x30] sm:$0xff]  ;;  %vm7615_vm12 = vmmov %vm7610_vm0 }
 0x49e   :  { %3903 = vmatmul.msk.f32.gmra.mxu2 %vm7611_vm5, %v2917_v54  ;;  %v2643_v0 = vld [vmem:[#allocation2 + $0x2d] sm:$0xff]  ;;  %vm7616_vm5 = vmmov %vm7610_vm0  ;;  %v2646_v9 = vld [vmem:[#allocation2 + $0x45] sm:$0x1] }
 0x49f   :  { %v2733_v57 = vld [vmem:[#allocation2 + $0x46] sm:$0x1]  ;;  %v2827_v54 = vld [vmem:[#allocation2 + $0x47] sm:$0x1] }
 0x4a1   :  { %v2485_v31 = vpop.permute.xlu0 %2484  ;;  %v2644_v18 = vld [vmem:[#allocation2 + $0x35] sm:$0xff] }
 0x4a2   :  { %v2513_v24 = vpop.permute.xlu1 %2512  ;;  %v2731_v43 = vld [vmem:[#allocation2 + $0x36] sm:$0xff]  ;;  %v2732_v34 = vld [vmem:[#allocation2 + $0x3e] sm:$0xff]  ;;  %v3004_v31 = vld [vmem:[#allocation2 + $0x29] sm:$0xff] }
 0x4a3   :  { %3883 = vmatmul.msk.f32.gmra.mxu0 %vm7612_vm11, %v2643_v0  ;;  %v2825_v60 = vld [vmem:[#allocation2 + $0x37] sm:$0xff]  ;;  %vm7619_vm11 = vmmov %vm7610_vm0  ;;  %v2826_v14 = vld [vmem:[#allocation2 + $0x3f] sm:$0xff] }
 0x4a4   :  { %3890 = vmatmul.msk.f32.gmra.mxu1 %vm7613_vm14, %v2730_v22  ;;  %v2919_v2 = vld [vmem:[#allocation2 + $0x38] sm:$0xff]  ;;  %vm7620_vm14 = vmmov %vm7610_vm0  ;;  %v2920_v47 = vld [vmem:[#allocation2 + $0x40] sm:$0xff] }
 0x4a5   :  { %3897 = vmatmul.msk.f32.gmra.mxu3 %vm7614_vm13, %v2824_v25  ;;  %v2645_v30 = vld [vmem:[#allocation2 + $0x3d] sm:$0xff]  ;;  %vm7621_vm13 = vmmov %vm7610_vm0  ;;  %v3098_v24 = vld [vmem:[#allocation2 + $0x2a] sm:$0xff] }
 0x4a6   :  { %3904 = vmatmul.msk.f32.gmra.mxu2 %vm7615_vm12, %v2918_v45  ;;  %vm7622_vm12 = vmmov %vm7610_vm0  ;;  %v3192_v0 = vld [vmem:[#allocation2 + $0x2b] sm:$0xff]  ;;  %v3193_v45 = vld [vmem:[#allocation2 + $0x33] sm:$0xff] }
 0x4a7   :  { %v3005_v22 = vld [vmem:[#allocation2 + $0x31] sm:$0xff] }
 0x4a8   :  { %v3099_v25 = vld [vmem:[#allocation2 + $0x32] sm:$0xff] }
 0x4ab   :  { %3884 = vmatmul.msk.f32.gmra.mxu0 %vm7610_vm0, %v2644_v18  ;;  %v3006_v18 = vld [vmem:[#allocation2 + $0x39] sm:$0xff] }
 0x4ac   :  { %3891 = vmatmul.msk.f32.gmra.mxu1 %vm7616_vm5, %v2731_v43  ;;  %vm7623_vm5 = vmmov %vm7610_vm0  ;;  %v3100_v43 = vld [vmem:[#allocation2 + $0x3a] sm:$0xff] }
 0x4ad   :  { %3898 = vmatmul.msk.f32.gmra.mxu3 %vm7617_vm9, %v2825_v60  ;;  %vm7624_vm9 = vmmov %vm7610_vm0  ;;  %v3194_v60 = vld [vmem:[#allocation2 + $0x3b] sm:$0xff] }
 0x4ae   :  { %3905 = vmatmul.msk.f32.gmra.mxu2 %vm7618_vm10, %v2919_v2  ;;  %vm7625_vm10 = vmmov %vm7610_vm0  ;;  %v3007_v2 = vld [vmem:[#allocation2 + $0x41] sm:$0xff] }
 0x4b3   :  { %3885 = vmatmul.msk.f32.gmra.mxu0 %vm7619_vm11, %v2645_v30  ;;  %vm7626_vm11 = vmmov %vm7610_vm0  ;;  %v3101_v30 = vld [vmem:[#allocation2 + $0x42] sm:$0xff] }
 0x4b4   :  { %3892 = vmatmul.msk.f32.gmra.mxu1 %vm7620_vm14, %v2732_v34  ;;  %vm7627_vm14 = vmmov %vm7610_vm0  ;;  %v3195_v34 = vld [vmem:[#allocation2 + $0x43] sm:$0xff] }
 0x4b5   :  { %3899 = vmatmul.msk.f32.gmra.mxu3 %vm7621_vm13, %v2826_v14  ;;  %vm7628_vm13 = vmmov %vm7610_vm0  ;;  %v3008_v14 = vld [vmem:[#allocation2 + $0x49] sm:$0x1] }
 0x4b6   :  { %3906 = vmatmul.msk.f32.gmra.mxu2 %vm7622_vm12, %v2920_v47  ;;  %vm7629_vm12 = vmmov %vm7610_vm0  ;;  %v3102_v47 = vld [vmem:[#allocation2 + $0x4a] sm:$0x1] }
 0x4bb   :  { %3886 = vmatmul.msk.f32.gmra.mxu0 %vm7610_vm0, %v2646_v9  ;;  %v3196_v9 = vld [vmem:[#allocation2 + $0x4b] sm:$0x1] }
 0x4bc   :  { %3893 = vmatmul.msk.f32.gmra.mxu1 %vm7623_vm5, %v2733_v57  ;;  %vm7630_vm5 = vmmov %vm7610_vm0 }
 0x4bd   :  { %3900 = vmatmul.msk.f32.gmra.mxu3 %vm7624_vm9, %v2827_v54  ;;  %vm7631_vm9 = vmmov %vm7610_vm0 }
 0x4be   :  { %3907 = vmatmul.msk.f32.gmra.mxu2 %vm7625_vm10, %v2921_v20  ;;  %vm7632_vm10 = vmmov %vm7610_vm0 }
 0x4c3   :  { %3908 = vmatmul.msk.f32.vlgmr.msra.gmra.mxu0 %vm7626_vm11, %v3002_v28  ;;  %vm7633_vm11 = vmmov %vm7610_vm0 }
 0x4c4   :  { %3915 = vmatmul.msk.f32.vlgmr.msra.gmra.mxu1 %vm7627_vm14, %v3096_v49  ;;  %vm7634_vm14 = vmmov %vm7610_vm0 }
 0x4c5   :  { %3922 = vmatmul.msk.f32.vlgmr.msra.gmra.mxu3 %vm7628_vm13, %v3190_v33  ;;  %vm7635_vm13 = vmmov %vm7610_vm0 }
 0x4cb   :  { %3909 = vmatmul.msk.f32.gmra.mxu0 %vm7629_vm12, %v3003_v61  ;;  %vm7636_vm12 = vmmov %vm7610_vm0 }
 0x4cc   :  { %3916 = vmatmul.msk.f32.gmra.mxu1 %vm7610_vm0, %v3097_v17 }
 0x4cd   :  { %3923 = vmatmul.msk.f32.gmra.mxu3 %vm7630_vm5, %v3191_v46  ;;  %vm7637_vm5 = vmmov %vm7610_vm0 }
 0x4d3   :  { %3910 = vmatmul.msk.f32.gmra.mxu0 %vm7631_vm9, %v3004_v31  ;;  %vm7638_vm9 = vmmov %vm7610_vm0 }
 0x4d4   :  { %3917 = vmatmul.msk.f32.gmra.mxu1 %vm7632_vm10, %v3098_v24  ;;  %vm7639_vm10 = vmmov %vm7610_vm0 }
 0x4d5   :  { %3924 = vmatmul.msk.f32.gmra.mxu3 %vm7633_vm11, %v3192_v0  ;;  %vm7640_vm11 = vmmov %vm7610_vm0 }
 0x4db   :  { %3911 = vmatmul.msk.f32.gmra.mxu0 %vm7634_vm14, %v3005_v22  ;;  %vm7641_vm14 = vmmov %vm7610_vm0 }
 0x4dc   :  { %3918 = vmatmul.msk.f32.gmra.mxu1 %vm7635_vm13, %v3099_v25  ;;  %vm7642_vm13 = vmmov %vm7610_vm0 }
 0x4dd   :  { %3925 = vmatmul.msk.f32.gmra.mxu3 %vm7636_vm12, %v3193_v45  ;;  %vm7643_vm12 = vmmov %vm7610_vm0 }
 0x4e3   :  { %3912 = vmatmul.msk.f32.gmra.mxu0 %vm7610_vm0, %v3006_v18 }
 0x4e4   :  { %3919 = vmatmul.msk.f32.gmra.mxu1 %vm7637_vm5, %v3100_v43  ;;  %vm7653_vm5 = vnez %v7336_v44 }
 0x4e5   :  { %3926 = vmatmul.msk.f32.gmra.mxu3 %vm7638_vm9, %v3194_v60  ;;  %vm7654_vm9 = vnez %v7328_v41 }
 0x4eb   :  { %3913 = vmatmul.msk.f32.gmra.mxu0 %vm7639_vm10, %v3007_v2  ;;  %vm7657_vm10 = vnez %v7332_v16 }
 0x4ec   :  { %3920 = vmatmul.msk.f32.gmra.mxu1 %vm7640_vm11, %v3101_v30  ;;  %vm7658_vm11 = vnez %v7340_v42 }
 0x4ed   :  { %3927 = vmatmul.msk.f32.gmra.mxu3 %vm7641_vm14, %v3195_v34  ;;  %vm7659_vm14 = vnez %v7354_v4 }
 0x4f3   :  { %3914 = vmatmul.msk.f32.gmra.mxu0 %vm7642_vm13, %v3008_v14  ;;  %vm7660_vm13 = vcmask 130048  }
 0x4f4   :  { %3921 = vmatmul.msk.f32.gmra.mxu1 %vm7643_vm12, %v3102_v47  ;;  %vm7661_vm12 = vnez %v7366_v35 }
 0x4f5   :  { %3928 = vmatmul.msk.f32.gmra.mxu3 %vm7610_vm0, %v3196_v9  ;;  %vm7662_vm0 = vnez %v7358_v26 }
 0x4fd   :  { %v2699_v57 = vpop.f32.mrf.mxu0 }
 0x4fe   :  { %v2786_v54 = vpop.f32.mrf.mxu1  ;;  %v2720_v34 = vsel %vm4961_vm8, %v2699_v57, 0.0  ;;  %vm7649_vm8 = vnez %v7308_v36 }
 0x4ff   :  { %v2807_v47 = vsel %vm4974_vm7, %v2786_v54, 0.0  ;;  %vm7648_vm7 = vnez %v7647_v53 }
 0x500   :  { %v2814_v6 = vadd.f32 %v2807_v47, %v2720_v34 }
 0x505   :  { %v2880_v20 = vpop.f32.mrf.mxu3 }
 0x506   :  { %v2974_v60 = vpop.f32.mrf.mxu2  ;;  %v2901_v27 = vsel %vm7519_vm3, %v2880_v20, 0.0  ;;  %vm7650_vm3 = vnez %v7317_v21 }
 0x507   :  { %v2908_v15 = vadd.f32 %v2901_v27, %v2814_v6 }
 0x509   :  { %v2995_v7 = vadd.f32 %v2974_v60, %v2908_v15 }
 0x50a   :  { %v2702_v28 = vpop.f32.mrf.mxu0 }
 0x50b   :  { %v2789_v49 = vpop.f32.mrf.mxu1  ;;  %v2721_v5 = vsel %vm7521_vm2, %v2702_v28, 0.0  ;;  %vm7652_vm2 = vnez %v7324_v55 }
 0x50c   :  { %v2808_v57 = vsel %vm7520_vm15, %v2789_v49, 0.0  ;;  %v6580_v49 = vld [vmem:[%s7168_s9] ss:$0 sm:$0xff]  ;;  %vm7651_vm15 = vnez %v7321_v58 }
 0x50d   :  { %v2815_v20 = vadd.f32 %v2808_v57, %v2721_v5  ;;  %v492_v58 = vld [vmem:[%s7161_s2] sm:$0xff] }
 0x512   :  { %v2883_v33 = vpop.f32.mrf.mxu3 }
 0x513   :  { %v2977_v19 = vpop.f32.mrf.mxu2  ;;  %v2902_v56 = vsel %vm7649_vm8, %v2883_v33, 0.0  ;;  %vm7665_vm8 = vnez %v7370_v32 }
 0x514   :  { %v2909_v6 = vadd.f32 %v2902_v56, %v2815_v20 }
 0x516   :  { %v2996_v5 = vadd.f32 %v2977_v19, %v2909_v6 }
 0x518   :  { %v2705_v61 = vpop.f32.mrf.mxu0 }
 0x519   :  { %v2792_v17 = vpop.f32.mrf.mxu1  ;;  %v2722_v53 = vsel %vm7527_vm1, %v2705_v61, 0.0  ;;  %vm7656_vm1 = vnez %v7345_v29 }
 0x51a   :  { %v2809_v36 = vsel %vm7651_vm15, %v2792_v17, 0.0  ;;  %v7655_v17 = vld [vmem:[#allocation10_spill] sm:$0xff]  ;;  %vm7667_vm15 = vmmov %vm7660_vm13 }
 0x51b   :  { %v2816_v30 = vadd.f32 %v2809_v36, %v2722_v53 }
 0x520   :  { %v2886_v46 = vpop.f32.mrf.mxu3  ;;  %v6537_v31 = vpop.f32.mrf.mxu0 }
 0x521   :  { %v6539_v24 = vpop.f32.mrf.mxu1  ;;  %v2980_v50 = vpop.f32.mrf.mxu2  ;;  %v2903_v60 = vsel %vm7654_vm9, %v2886_v46, 0.0  ;;  %v2723_v41 = vsel %vm7657_vm10, %v6537_v31, 0.0  ;;  %vm7672_vm9 = vnez %v7396_v3  ;;  %vm7674_vm10 = vmmov %vm7660_vm13 }
 0x522   :  { %v2910_v55 = vadd.f32 %v2903_v60, %v2816_v30  ;;  %v2810_v46 = vsel %vm7658_vm11, %v6539_v24, 0.0  ;;  %v494_v30 = vld [vmem:[%s7161_s2 + $0x10] sm:$0xff]  ;;  %vm7676_vm11 = vnez %v7401_v63 }
 0x523   :  { %v2817_v4 = vadd.f32 %v2810_v46, %v2723_v41 }
 0x524   :  { %v2997_v6 = vadd.f32 %v2980_v50, %v2910_v55  ;;  %v493_v50 = vld [vmem:[%s7161_s2 + $0x8] sm:$0xff] }
 0x528   :  { %v6541_v0 = vpop.f32.mrf.mxu3  ;;  %v6543_v22 = vpop.f32.mrf.mxu0 }
 0x529   :  { %v6545_v25 = vpop.f32.mrf.mxu1  ;;  %v2904_v42 = vsel %vm7662_vm0, %v6541_v0, 0.0  ;;  %v2983_v31 = vpop.f32.mrf.mxu2  ;;  %v2724_v0 = vsel %vm7542_vm4, %v6543_v22, 0.0  ;;  %vm7668_vm4 = vnez %v7387_v51 }
 0x530   :  { %v6547_v45 = vpop.f32.mrf.mxu3  ;;  %v6549_v18 = vpop.f32.mrf.mxu0 }
 0x531   :  { %v6551_v43 = vpop.f32.mrf.mxu1  ;;  %v2986_v60 = vpop.f32.mrf.mxu2 }
 0x538   :  { %v6553_v2 = vpop.f32.mrf.mxu3  ;;  %v6559_v9 = vpop.f32.mrf.mxu0 }
 0x539   :  { %v6561_v10 = vpop.f32.mrf.mxu1  ;;  %v2906_v3 = vsel %vm7676_vm11, %v6553_v2, 0.0  ;;  %vm7706_vm11 = vcmask 392448  }
 0x540   :  { %v6565_v8 = vpop.f32.mrf.mxu3  ;;  %v3061_v14 = vpop.f32.mrf.mxu0 }
 0x541   :  { %v3155_v54 = vpop.f32.mrf.mxu1  ;;  %v3082_v62 = vsel %vm7648_vm7, %v3061_v14, 0.0  ;;  %vm7664_vm7 = vnez %v7375_v40 }
 0x542   :  { %v3089_v27 = vadd.f32 %v3082_v62, %v2995_v7  ;;  %v3176_v34 = vsel %vm7650_vm3, %v3155_v54, 0.0  ;;  %vm7666_vm3 = vnez %v7380_v48 }
 0x544   :  { %v3183_v28 = vadd.f32 %v3176_v34, %v3089_v27 }
 0x548   :  { %v3249_v47 = vpop.f32.mrf.mxu3  ;;  %v3064_v7 = vpop.f32.mrf.mxu0 }
 0x549   :  { %v3270_v62 = vsel %vm7652_vm2, %v3249_v47, 0.0  ;;  %v3158_v21 = vpop.f32.mrf.mxu1  ;;  %v3083_v33 = vsel %vm7653_vm5, %v3064_v7, 0.0  ;;  %v7663_v47 = vld [vmem:[#allocation11_spill] sm:$0xff]  ;;  %v2811_v7 = vsel %vm7665_vm8, %v6545_v25, 0.0  ;;  %vm7669_vm2 = vnez %v7384_v59 }
 0x54a   :  { %v3277_v15 = vadd.f32 %v3270_v62, %v3183_v28  ;;  %v3090_v61 = vadd.f32 %v3083_v33, %v2996_v5  ;;  %v3177_v19 = vsel %vm7656_vm1, %v3158_v21, 0.0  ;;  %v2911_v28 = vadd.f32 %v2904_v42, %v2817_v4  ;;  %v7681_v4 = vld [vmem:[#allocation15_spill] sm:$0xff] }
 0x54b   :  { %v2905_v32 = vsel %vm7669_vm2, %v6547_v45, 0.0  ;;  %v2818_v48 = vadd.f32 %v2811_v7, %v2724_v0  ;;  %vm7671_vm5 = vnez %v7394_v12  ;;  %v2725_v45 = vsel %vm7549_vm6, %v6549_v18, 0.0  ;;  %v7688_v0 = vld [vmem:[#allocation18_spill] sm:$0xff] }
 0x54c   :  { %v3288_v39 = vadd.f32 %v6580_v49, %v3277_v15  ;;  %v3184_v44 = vadd.f32 %v3177_v19, %v3090_v61  ;;  %v2998_v33 = vadd.f32 %v2983_v31, %v2911_v28  ;;  %v7670_v61 = vld [vmem:[#allocation12_spill] sm:$0xff]  ;;  %v2812_v19 = vsel %vm7672_vm9, %v6551_v43, 0.0 }
 0x54d   :  { %vm7673_vm1 = vnez %v7399_v38  ;;  %vm7675_vm6 = vnez %v7405_v11  ;;  %v2819_v38 = vadd.f32 %v2812_v19, %v2725_v45  ;;  %vm7682_vm0 = vnez %v7681_v4  ;;  %v7696_v45 = vld [vmem:[#allocation23_spill] sm:$0xff]  ;;  %v3504_v4 = vld [vmem:[%s7163_s4 + $0x60] sm:$0xff] }
 0x54e   :  { %v3295_v57 = vadd.f32 %v3288_v39, %v7655_v17  ;;  %v2912_v39 = vadd.f32 %v2905_v32, %v2818_v48 }
 0x550   :  { %v6599_v14 = vadd.f32 %v3295_v57, %v492_v58  ;;  %v3252_v54 = vpop.f32.mrf.mxu3  ;;  %v3067_v27 = vpop.f32.mrf.mxu0  ;;  %v2999_v46 = vadd.f32 %v2986_v60, %v2912_v39  ;;  %v7693_v60 = vld [vmem:[#allocation21_spill] sm:$0xff] }
 0x551   :  { %v3271_v56 = vsel %vm7659_vm14, %v3252_v54, 0.0  ;;  %v3161_v20 = vpop.f32.mrf.mxu1  ;;  %v3084_v16 = vsel %vm7661_vm12, %v3067_v27, 0.0  ;;  %v7677_v27 = vld [vmem:[#allocation14_spill] sm:$0xff]  ;;  %vm7678_vm14 = vnez %v7412_v13  ;;  %vm7680_vm12 = vnez %v7414_v23 }
 0x552   :  { %3309 = vst.msk [vmem:[#allocation2 + $0x2d] sm:$0xff] %vm7660_vm13, %v6599_v14  ;;  %v3278_v29 = vadd.f32 %v3271_v56, %v3184_v44  ;;  %3323 = vrot.lane.b32.xlu2 %v6599_v14, %s3975_s22  ;;  %v3091_v34 = vadd.f32 %v3084_v16, %v2997_v6  ;;  %v3178_v35 = vsel %vm7664_vm7, %v3161_v20, 0.0  ;;  %v495_v56 = vld [vmem:[%s7161_s2 + $0x18] sm:$0xff]  ;;  %v2913_v20 = vadd.f32 %v2906_v3, %v2819_v38  ;;  %vm7683_vm7 = vmmov %vm7674_vm10  ;;  %v498_v38 = vld [vmem:[%s7161_s2 + $0x30] sm:$0x1] }
 0x553   :  { %vm7679_vm13 = vnez %v7553_v52  ;;  %v2813_v31 = vsel %vm7680_vm12, %v6561_v10, 0.0  ;;  %v7684_v52 = vld [vmem:[#allocation16_spill] sm:$0xff]  ;;  %v7686_v10 = vld [vmem:[#allocation17_spill] sm:$0xff]  ;;  %vm7694_vm2 = vnez %v7693_v60  ;;  %vm7709_vm12 = vcmask 523648  }
 0x554   :  { %v3289_v24 = vadd.f32 %v6580_v49, %v3278_v29  ;;  %v3185_v62 = vadd.f32 %v3178_v35, %v3091_v34  ;;  %v2989_v29 = vpop.f32.mrf.mxu2  ;;  %v2726_v2 = vsel %vm7679_vm13, %v6559_v9, 0.0  ;;  %vm7685_vm8 = vnez %v7684_v52  ;;  %v3516_v52 = vld [vmem:[%s7163_s4 + $0xb8] sm:$0xff]  ;;  %vm7708_vm13 = vmmov %vm7706_vm11 }
 0x556   :  { %v3296_v53 = vadd.f32 %v3289_v24, %v7663_v47  ;;  %v2820_v47 = vadd.f32 %v2813_v31, %v2726_v2  ;;  %v3659_v2 = vld [vmem:[%s7163_s4 + $0x228] sm:$0xff]  ;;  %v3517_v31 = vld [vmem:[%s7163_s4 + $0xc0] sm:$0xff] }
 0x557   :  { %3665 = vmatpush.msrb.mxu3 %v3659_v2 }
 0x558   :  { %v6625_v36 = vadd.f32 %v3296_v53, %v493_v50  ;;  %v3255_v26 = vpop.f32.mrf.mxu3  ;;  %v3070_v15 = vpop.f32.mrf.mxu0  ;;  %v3000_v50 = vadd.f32 %v2989_v29, %v2913_v20  ;;  %v7702_v20 = vld [vmem:[#allocation27_spill] sm:$0xff] }
 0x559   :  { %v3272_v21 = vsel %vm7666_vm3, %v3255_v26, 0.0  ;;  %v3164_v5 = vpop.f32.mrf.mxu1  ;;  %v3085_v37 = vsel %vm7668_vm4, %v3070_v15, 0.0  ;;  %vm7687_vm3 = vnez %v7686_v10  ;;  %v3657_v10 = vld [vmem:[%s7163_s4 + $0x218] sm:$0xff] }
 0x55a   :  { %3310 = vst.msk [vmem:[#allocation2 + $0x35] sm:$0xff] %vm7667_vm15, %v6625_v36  ;;  %v3279_v40 = vadd.f32 %v3272_v21, %v3185_v62  ;;  %3353 = vrot.lane.b32.xlu2 %v6625_v36, %s3976_s23  ;;  %3325 = vrot.lane.b32.xlu0 %v6625_v36, %s3975_s22  ;;  %v3092_v25 = vadd.f32 %v3085_v37, %v2998_v33  ;;  %v3179_v51 = vsel %vm7671_vm5, %v3164_v5, 0.0  ;;  %v2907_v9 = vsel %vm7687_vm3, %v6565_v8, 0.0  ;;  %v496_v62 = vld [vmem:[%s7161_s2 + $0x20] sm:$0xff]  ;;  %v7689_v21 = vld [vmem:[#allocation19_spill] sm:$0xff] }
 0x55b   :  { %v2914_v26 = vadd.f32 %v2907_v9, %v2820_v47  ;;  %vm7690_vm15 = vnez %v7689_v21  ;;  %v7691_v8 = vld [vmem:[#allocation20_spill] sm:$0xff]  ;;  %vm7697_vm5 = vnez %v7696_v45  ;;  %v3577_v9 = vld [vmem:[%s7163_s4 + $0x128] sm:$0xff]  ;;  %v3515_v47 = vld [vmem:[%s7163_s4 + $0xb0] sm:$0xff] }
 0x55c   :  { %v3290_v22 = vadd.f32 %v6580_v49, %v3279_v40  ;;  %v3186_v57 = vadd.f32 %v3179_v51, %v3092_v25  ;;  %v2992_v37 = vpop.f32.mrf.mxu2  ;;  %vm7692_vm4 = vnez %v7691_v8  ;;  %v497_v51 = vld [vmem:[%s7161_s2 + $0x28] sm:$0xff]  ;;  %v3499_v21 = vld [vmem:[%s7163_s4 + $0x38] sm:$0xff]  ;;  %v3574_v8 = vld [vmem:[%s7163_s4 + $0x110] sm:$0xff] }
 0x55d   :  { %v3508_v45 = vld [vmem:[%s7163_s4 + $0x78] sm:$0xff] }
 0x55e   :  { %v3297_v58 = vadd.f32 %v3290_v22, %v7670_v61  ;;  %v3001_v22 = vadd.f32 %v2992_v37, %v2914_v26  ;;  %v3514_v26 = vld [vmem:[%s7163_s4 + $0xa8] sm:$0xff]  ;;  %v3512_v37 = vld [vmem:[%s7163_s4 + $0x98] sm:$0xff] }
 0x560   :  { %v6653_v55 = vadd.f32 %v3297_v58, %v494_v30  ;;  %v3258_v59 = vpop.f32.mrf.mxu3  ;;  %v3073_v41 = vpop.f32.mrf.mxu0 }
 0x561   :  { %v3273_v44 = vsel %vm7673_vm1, %v3258_v59, 0.0  ;;  %v3167_v54 = vpop.f32.mrf.mxu1  ;;  %v3086_v1 = vsel %vm7675_vm6, %v3073_v41, 0.0  ;;  %vm7703_vm1 = vcmask 261248  }
 0x562   :  { %3311 = vst.msk [vmem:[#allocation2 + $0x3d] sm:$0xff] %vm7674_vm10, %v6653_v55  ;;  %v3280_v12 = vadd.f32 %v3273_v44, %v3186_v57  ;;  %3355 = vrot.lane.b32.xlu0 %v6653_v55, %s3976_s23  ;;  %3327 = vrot.lane.b32.xlu1 %v6653_v55, %s3975_s22  ;;  %v3093_v43 = vadd.f32 %v3086_v1, %v2999_v46  ;;  %v3180_v11 = vsel %vm7678_vm14, %v3167_v54, 0.0  ;;  %v7695_v57 = vld [vmem:[#allocation22_spill] sm:$0xff]  ;;  %v7698_v46 = vld [vmem:[#allocation24_spill] sm:$0xff]  ;;  %vm7704_vm10 = vmmov %vm7703_vm1 }
 0x563   :  { %vm7699_vm9 = vnez %v7698_v46  ;;  %vm7705_vm6 = vmmov %vm7703_vm1  ;;  %v3652_v46 = vld [vmem:[%s7163_s4 + $0x1f0] sm:$0xff] }
 0x564   :  { %v3291_v18 = vadd.f32 %v6580_v49, %v3280_v12  ;;  %v3187_v42 = vadd.f32 %v3180_v11, %v3093_v43  ;;  %v3518_v11 = vld [vmem:[%s7163_s4 + $0xc8] sm:$0xff]  ;;  %vm7707_vm14 = vmmov %vm7703_vm1 }
 0x565   :  { %vm7713_vm3 = vmmov %vm7703_vm1 }
 0x566   :  { %v3298_v6 = vadd.f32 %v3291_v18, %v7677_v27  ;;  %v7700_v18 = vld [vmem:[#allocation25_spill] sm:$0xff] }
 0x568   :  { %v6681_v16 = vadd.f32 %v3298_v6, %v495_v56  ;;  %v3261_v63 = vpop.f32.mrf.mxu3  ;;  %v3076_v34 = vpop.f32.mrf.mxu0  ;;  %v3519_v6 = vld [vmem:[%s7163_s4 + $0xd0] sm:$0xff] }
 0x569   :  { %v3274_v24 = vsel %vm7682_vm0, %v3261_v63, 0.0  ;;  %v3170_v28 = vpop.f32.mrf.mxu1  ;;  %v3087_v23 = vsel %vm7685_vm8, %v3076_v34, 0.0  ;;  %v3581_v63 = vld [vmem:[%s7163_s4 + $0x148] sm:$0xff]  ;;  %v3503_v34 = vld [vmem:[%s7163_s4 + $0x58] sm:$0xff]  ;;  %vm7710_vm0 = vmmov %vm7706_vm11  ;;  %vm7712_vm8 = vcmask 654848  }
 0x56a   :  { %3312 = vst.msk [vmem:[#allocation2 + $0x45] sm:$0xff] %vm7683_vm7, %v6681_v16  ;;  %v3281_v13 = vadd.f32 %v3274_v24, %v3187_v42  ;;  %3383 = vrot.lane.b32.xlu1 %v6653_v55, %s3977_s1  ;;  %3329 = vrot.lane.b32.xlu2 %v6681_v16, %s3975_s22  ;;  %v3094_v35 = vadd.f32 %v3087_v23, %v3000_v50  ;;  %v3181_v5 = vsel %vm7690_vm15, %v3170_v28, 0.0  ;;  %v3505_v42 = vld [vmem:[%s7163_s4 + $0x68] sm:$0xff]  ;;  %v3580_v24 = vld [vmem:[%s7163_s4 + $0x140] sm:$0xff]  ;;  %vm7711_vm7 = vmmov %vm7709_vm12 }
 0x56b   :  { %3549 = vmatpush.msrb.mxu0 %v3505_v42  ;;  %3587 = vmatpush.msrb.mxu1 %v3581_v63  ;;  %v3658_v50 = vld [vmem:[%s7163_s4 + $0x220] sm:$0xff]  ;;  %v3501_v23 = vld [vmem:[%s7163_s4 + $0x48] sm:$0xff]  ;;  %vm7714_vm15 = vmmov %vm7710_vm0 }
 0x56c   :  { %v3292_v53 = vadd.f32 %v6580_v49, %v3281_v13  ;;  %v3188_v33 = vadd.f32 %v3181_v5, %v3094_v35  ;;  %v3579_v13 = vld [vmem:[%s7163_s4 + $0x138] sm:$0xff]  ;;  %3666 = vmatpush.msrb.mxu3 %v3658_v50  ;;  %v3513_v5 = vld [vmem:[%s7163_s4 + $0xa0] sm:$0xff]  ;;  %v3651_v42 = vld [vmem:[%s7163_s4 + $0x1e8] sm:$0xff] }
 0x56d   :  { %3550 = vmatpush.msrb.mxu0 %v3504_v4  ;;  %3588 = vmatpush.msrb.mxu1 %v3580_v24  ;;  %v3617_v63 = vld [vmem:[%s7163_s4 + $0x1a0] sm:$0xff]  ;;  %v3616_v50 = vld [vmem:[%s7163_s4 + $0x198] sm:$0xff] }
 0x56e   :  { %v3299_v7 = vadd.f32 %v3292_v53, %v7688_v0  ;;  %3667 = vmatpush.msrb.mxu3 %v3657_v10  ;;  %v3576_v0 = vld [vmem:[%s7163_s4 + $0x120] sm:$0xff]  ;;  %v3614_v10 = vld [vmem:[%s7163_s4 + $0x188] sm:$0xff] }
 0x56f   :  { %3551 = vmatpush.msrb.mxu0 %v3503_v34  ;;  %3589 = vmatpush.msrb.mxu1 %v3579_v13  ;;  %v3734_v34 = vld [vmem:[%s7163_s4 + $0x2f0] sm:$0xff]  ;;  %v3650_v13 = vld [vmem:[%s7163_s4 + $0x1e0] sm:$0xff] }
 0x570   :  { %v6709_v15 = vadd.f32 %v3299_v7, %v496_v62  ;;  %v3264_v40 = vpop.f32.mrf.mxu3  ;;  %v3079_v48 = vpop.f32.mrf.mxu0  ;;  %v3500_v62 = vld [vmem:[%s7163_s4 + $0x40] sm:$0xff]  ;;  %v3656_v7 = vld [vmem:[%s7163_s4 + $0x210] sm:$0xff] }
 0x571   :  { %v3275_v32 = vsel %vm7692_vm4, %v3264_v40, 0.0  ;;  %v3088_v30 = vsel %vm7694_vm2, %v3079_v48, 0.0  ;;  %v3173_v61 = vpop.f32.mrf.mxu1  ;;  %3668 = vmatpush.msrb.mxu3 %v3656_v7  ;;  %v3498_v40 = vld [vmem:[%s7163_s4 + $0x30] sm:$0xff]  ;;  %v3497_v48 = vld [vmem:[%s7163_s4 + $0x28] sm:$0xff]  ;;  %vm7715_vm4 = vmmov %vm7711_vm7 }
 0x572   :  { %v3282_v25 = vadd.f32 %v3275_v32, %v3188_v33  ;;  %3357 = vrot.lane.b32.xlu1 %v6681_v16, %s3976_s23  ;;  %3385 = vrot.lane.b32.xlu2 %v6681_v16, %s3977_s1  ;;  %v3095_v58 = vadd.f32 %v3088_v30, %v3001_v22  ;;  %v3182_v19 = vsel %vm7697_vm5, %v3173_v61, 0.0  ;;  %v3575_v33 = vld [vmem:[%s7163_s4 + $0x118] sm:$0xff]  ;;  %v3655_v32 = vld [vmem:[%s7163_s4 + $0x208] sm:$0xff]  ;;  %vm7716_vm2 = vmmov %vm7712_vm8  ;;  %vm7717_vm5 = vcmask 786048  }
 0x573   :  { %3331 = vrot.lane.b32.xlu0 %v6709_v15, %s3975_s22  ;;  %3669 = vmatpush.msrb.mxu3 %v3655_v32  ;;  %v3496_v30 = vld [vmem:[%s7163_s4 + $0x20] sm:$0xff]  ;;  %v3611_v32 = vld [vmem:[%s7163_s4 + $0x170] sm:$0xff] }
 0x574   :  { %v3293_v39 = vadd.f32 %v6580_v49, %v3282_v25  ;;  %v3189_v54 = vadd.f32 %v3182_v19, %v3095_v58  ;;  %v3573_v25 = vld [vmem:[%s7163_s4 + $0x108] sm:$0xff]  ;;  %v3572_v61 = vld [vmem:[%s7163_s4 + $0x100] sm:$0xff]  ;;  %v3495_v58 = vld [vmem:[%s7163_s4 + $0x18] sm:$0xff] }
 0x575   :  { %v3653_v19 = vld [vmem:[%s7163_s4 + $0x1f8] sm:$0xff] }
 0x576   :  { %v3300_v59 = vadd.f32 %v3293_v39, %v7695_v57  ;;  %v3510_v39 = vld [vmem:[%s7163_s4 + $0x88] sm:$0xff]  ;;  %v3571_v57 = vld [vmem:[%s7163_s4 + $0xf8] sm:$0xff] }
 0x578   :  { %v3307_v44 = vadd.f32 %v3300_v59, %v497_v51  ;;  %v3267_v41 = vpop.f32.mrf.mxu3  ;;  %v3509_v51 = vld [vmem:[%s7163_s4 + $0x80] sm:$0xff]  ;;  %v3494_v59 = vld [vmem:[%s7163_s4 + $0x10] sm:$0xff] }
 0x579   :  { %v3276_v12 = vsel %vm7699_vm9, %v3267_v41, 0.0  ;;  %v3507_v41 = vld [vmem:[%s7163_s4 + $0x70] sm:$0xff]  ;;  %vm7718_vm9 = vmmov %vm7710_vm0 }
 0x57a   :  { %v3283_v1 = vadd.f32 %v3276_v12, %v3189_v54  ;;  %3413 = vrot.lane.b32.xlu2 %v6681_v16, %s3978_s24  ;;  %3333 = vrot.lane.b32.xlu1 %v3307_v44, %s3975_s22  ;;  %v3493_v54 = vld [vmem:[%s7163_s4 + $0x8] sm:$0xff] }
 0x57b   :  { %3387 = vrot.lane.b32.xlu0 %v6709_v15, %s3977_s1 }
 0x57c   :  { %v3294_v3 = vadd.f32 %v6580_v49, %v3283_v1  ;;  %v7701_v49 = vld [vmem:[#allocation26_spill] sm:$0xff] }
 0x57d   :  { %v3569_v1 = vld [vmem:[%s7163_s4 + $0xe8] sm:$0xff] }
 0x57e   :  { %v3301_v43 = vadd.f32 %v3294_v3, %v7700_v18  ;;  %v3620_v3 = vld [vmem:[%s7163_s4 + $0x1b8] sm:$0xff]  ;;  %v3492_v18 = vld [vmem:[%s7163_s4] sm:$0xff] }
 0x580   :  { %v6740_v56 = vadd.f32 %v3301_v43, %v498_v38  ;;  %v3568_v43 = vld [vmem:[%s7163_s4 + $0xe0] sm:$0xff] }
 0x582   :  { %3359 = vrot.lane.b32.xlu2 %v6709_v15, %s3976_s23  ;;  %3389 = vrot.lane.b32.xlu1 %v3307_v44, %s3977_s1 }
 0x583   :  { %3415 = vrot.lane.b32.xlu0 %v6709_v15, %s3978_s24 }
 0x58a   :  { %3443 = vrot.lane.b32.xlu2 %v6709_v15, %s3979_s25  ;;  %3417 = vrot.lane.b32.xlu1 %v3307_v44, %s3978_s24 }
 0x58b   :  { %3361 = vrot.lane.b32.xlu0 %v3307_v44, %s3976_s23 }
 0x592   :  { %3473 = vrot.lane.b32.xlu1 %v3307_v44, %s3980_s26  ;;  %3475 = vrot.lane.b32.xlu2 %v6740_v56, %s3980_s26 }
 0x593   :  { %3445 = vrot.lane.b32.xlu0 %v3307_v44, %s3979_s25  ;;  %v3570_v44 = vld [vmem:[%s7163_s4 + $0xf0] sm:$0xff] }
 0x59a   :  { %2584 = vrot.lane.b32.xlu1 %v7701_v49, %s3979_s25  ;;  %2612 = vrot.lane.b32.xlu2 %v7701_v49, %s3980_s26  ;;  %v3737_v49 = vld [vmem:[%s7163_s4 + $0x308] sm:$0xff] }
 0x59b   :  { %1775 = vrot.lane.b32.xlu0 %v7655_v17, %s3980_s26  ;;  %v3520_v17 = vld [vmem:[%s7163_s4 + $0xd8] sm:$0xff] }
 0x59c   :  { %3526 = vmatpush.msrb.mxu2 %v3520_v17  ;;  %v3736_v17 = vld [vmem:[%s7163_s4 + $0x300] sm:$0xff] }
 0x59e   :  { %3527 = vmatpush.msrb.mxu2 %v3519_v6  ;;  %v3618_v6 = vld [vmem:[%s7163_s4 + $0x1a8] sm:$0xff] }
 0x5a0   :  { %3528 = vmatpush.msrb.mxu2 %v3518_v11  ;;  %v3735_v11 = vld [vmem:[%s7163_s4 + $0x2f8] sm:$0xff] }
 0x5a2   :  { %3379 = vrot.lane.b32.xlu1 %v6599_v14, %s3977_s1  ;;  %3351 = vrot.lane.b32.xlu2 %v6599_v14, %s3976_s23 }
 0x5a3   :  { %2614 = vrot.lane.b32.xlu0 %v7702_v20, %s3980_s26  ;;  %3529 = vmatpush.msrb.mxu2 %v3517_v31  ;;  %v3619_v20 = vld [vmem:[%s7163_s4 + $0x1b0] sm:$0xff]  ;;  %v3695_v31 = vld [vmem:[%s7163_s4 + $0x280] sm:$0xff] }
 0x5a5   :  { %3530 = vmatpush.msrb.mxu2 %v3516_v52  ;;  %v3733_v52 = vld [vmem:[%s7163_s4 + $0x2e8] sm:$0xff] }
 0x5a7   :  { %3531 = vmatpush.msrb.mxu2 %v3515_v47  ;;  %v3692_v47 = vld [vmem:[%s7163_s4 + $0x268] sm:$0xff] }
 0x5a9   :  { %3532 = vmatpush.msrb.mxu2 %v3514_v26 }
 0x5aa   :  { %3407 = vrot.lane.b32.xlu1 %v6599_v14, %s3978_s24  ;;  %3381 = vrot.lane.b32.xlu2 %v6625_v36, %s3977_s1 }
 0x5ab   :  { %3411 = vrot.lane.b32.xlu0 %v6653_v55, %s3978_s24  ;;  %3533 = vmatpush.msrb.mxu2 %v3513_v5  ;;  %v3730_v5 = vld [vmem:[%s7163_s4 + $0x2d0] sm:$0xff] }
 0x5ac   :  { %v3324_v27 = vpop.permute.xlu2 %3323 }
 0x5ad   :  { %3344 = vst.msk [vmem:[#allocation2 + $0x26] sm:$0xff] %vm7703_vm1, %v3324_v27  ;;  %3534 = vmatpush.msrb.mxu2 %v3512_v37  ;;  %v3697_v27 = vld [vmem:[%s7163_s4 + $0x290] sm:$0xff]  ;;  %v3690_v37 = vld [vmem:[%s7163_s4 + $0x258] sm:$0xff]  ;;  %vm7719_vm1 = vmmov %vm7715_vm4 }
 0x5b2   :  { %3435 = vrot.lane.b32.xlu1 %v6599_v14, %s3979_s25  ;;  %3409 = vrot.lane.b32.xlu2 %v6625_v36, %s3978_s24 }
 0x5b3   :  { %3439 = vrot.lane.b32.xlu0 %v6653_v55, %s3979_s25 }
 0x5b4   :  { %v3354_v29 = vpop.permute.xlu2 %3353 }
 0x5ba   :  { %3441 = vrot.lane.b32.xlu1 %v6681_v16, %s3979_s25  ;;  %3437 = vrot.lane.b32.xlu2 %v6625_v36, %s3979_s25 }
 0x5bb   :  { %3363 = vrot.lane.b32.xlu0 %v6740_v56, %s3976_s23 }
 0x5c2   :  { %3463 = vrot.lane.b32.xlu1 %v6599_v14, %s3980_s26  ;;  %3465 = vrot.lane.b32.xlu2 %v6625_v36, %s3980_s26  ;;  %v3502_v14 = vld [vmem:[%s7163_s4 + $0x50] sm:$0xff] }
 0x5c3   :  { %3391 = vrot.lane.b32.xlu0 %v6740_v56, %s3977_s1  ;;  %v3578_v36 = vld [vmem:[%s7163_s4 + $0x130] sm:$0xff]  ;;  %3552 = vmatpush.msrb.mxu0 %v3502_v14  ;;  %s3982_s1 = smov [#allocation3]  }
 0x5c4   :  { %v3330_v28 = vpop.permute.xlu2 %3329  ;;  %3590 = vmatpush.msrb.mxu1 %v3578_v36  ;;  %v3615_v14 = vld [vmem:[%s7163_s4 + $0x190] sm:$0xff]  ;;  %s3770_s15 = sshll.u32 %s3982_s1, 4  ;;  %s3771_s15 = int_to_ptr.vmem [resolvable:$true] %s3770_s15 }
 0x5c5   :  { %3347 = vst.msk [vmem:[#allocation2 + $0x3e] sm:$0xff] %vm7704_vm10, %v3330_v28  ;;  %3553 = vmatpush.msrb.mxu0 %v3501_v23  ;;  %v3694_v28 = vld [vmem:[%s7163_s4 + $0x278] sm:$0xff]  ;;  %v3693_v36 = vld [vmem:[%s7163_s4 + $0x270] sm:$0xff]  ;;  %v3732_v23 = vld [vmem:[%s7163_s4 + $0x2e0] sm:$0xff] }
 0x5c6   :  { %3591 = vmatpush.msrb.mxu1 %v3577_v9  ;;  %v3649_v9 = vld [vmem:[%s7163_s4 + $0x1d8] sm:$0xff]  ;;  %vm7720_vm10 = vmmov %vm7716_vm2 }
 0x5c7   :  { %3554 = vmatpush.msrb.mxu0 %v3500_v62  ;;  %v3648_v62 = vld [vmem:[%s7163_s4 + $0x1d0] sm:$0xff] }
 0x5c8   :  { %3592 = vmatpush.msrb.mxu1 %v3576_v0  ;;  %v3691_v0 = vld [vmem:[%s7163_s4 + $0x260] sm:$0xff] }
 0x5c9   :  { %3555 = vmatpush.msrb.mxu0 %v3499_v21 }
 0x5ca   :  { %3335 = vrot.lane.b32.xlu1 %v6740_v56, %s3975_s22  ;;  %3419 = vrot.lane.b32.xlu2 %v6740_v56, %s3978_s24 }
 0x5cb   :  { %3447 = vrot.lane.b32.xlu0 %v6740_v56, %s3979_s25  ;;  %3593 = vmatpush.msrb.mxu1 %v3575_v33  ;;  %v3698_v56 = vld [vmem:[%s7163_s4 + $0x298] sm:$0xff] }
 0x5cc   :  { %v3326_v53 = vpop.permute.xlu0 %3325  ;;  %v6856_v35 = vpop.permute.xlu2 %3385  ;;  %3556 = vmatpush.msrb.mxu0 %v3498_v40  ;;  %v3612_v33 = vld [vmem:[%s7163_s4 + $0x178] sm:$0xff]  ;;  %v3647_v40 = vld [vmem:[%s7163_s4 + $0x1c8] sm:$0xff] }
 0x5cd   :  { %3345 = vst.msk [vmem:[#allocation2 + $0x2e] sm:$0xff] %vm7705_vm6, %v3326_v53  ;;  %3594 = vmatpush.msrb.mxu1 %v3574_v8  ;;  %v3731_v53 = vld [vmem:[%s7163_s4 + $0x2d8] sm:$0xff]  ;;  %v3729_v8 = vld [vmem:[%s7163_s4 + $0x2c8] sm:$0xff]  ;;  %vm7721_vm6 = vmmov %vm7710_vm0 }
 0x5ce   :  { %3373 = vst.msk [vmem:[#allocation2 + $0x27] sm:$0xff] %vm7706_vm11, %v3354_v29  ;;  %3557 = vmatpush.msrb.mxu0 %v3497_v48  ;;  %v3696_v29 = vld [vmem:[%s7163_s4 + $0x288] sm:$0xff]  ;;  %v3646_v48 = vld [vmem:[%s7163_s4 + $0x1c0] sm:$0xff]  ;;  %vm7722_vm11 = vmmov %vm7717_vm5 }
 0x5cf   :  { %3595 = vmatpush.msrb.mxu1 %v3573_v25  ;;  %v3688_v25 = vld [vmem:[%s7163_s4 + $0x248] sm:$0xff] }
 0x5d0   :  { %3558 = vmatpush.msrb.mxu0 %v3496_v30 }
 0x5d1   :  { %3596 = vmatpush.msrb.mxu1 %v3572_v61 }
 0x5d2   :  { %3469 = vrot.lane.b32.xlu1 %v6681_v16, %s3980_s26  ;;  %3471 = vrot.lane.b32.xlu2 %v6709_v15, %s3980_s26  ;;  %v3511_v16 = vld [vmem:[%s7163_s4 + $0x90] sm:$0xff] }
 0x5d3   :  { %3467 = vrot.lane.b32.xlu0 %v6653_v55, %s3980_s26  ;;  %v3654_v55 = vld [vmem:[%s7163_s4 + $0x200] sm:$0xff]  ;;  %3535 = vmatpush.msrb.mxu2 %v3511_v16  ;;  %v3689_v16 = vld [vmem:[%s7163_s4 + $0x250] sm:$0xff] }
 0x5d4   :  { %v3356_v15 = vpop.permute.xlu0 %3355  ;;  %v3328_v22 = vpop.permute.xlu1 %3327  ;;  %3670 = vmatpush.msrb.mxu3 %v3654_v55  ;;  %3559 = vmatpush.msrb.mxu0 %v3495_v58  ;;  %v3727_v55 = vld [vmem:[%s7163_s4 + $0x2b8] sm:$0xff] }
 0x5d5   :  { %3346 = vst.msk [vmem:[#allocation2 + $0x36] sm:$0xff] %vm7707_vm14, %v3328_v22  ;;  %v6912_v60 = vpop.permute.xlu2 %3413  ;;  %3536 = vmatpush.msrb.mxu2 %v3510_v39  ;;  %3597 = vmatpush.msrb.mxu1 %v3571_v57  ;;  %v3610_v22 = vld [vmem:[%s7163_s4 + $0x168] sm:$0xff]  ;;  %v3687_v39 = vld [vmem:[%s7163_s4 + $0x240] sm:$0xff]  ;;  %v3608_v57 = vld [vmem:[%s7163_s4 + $0x158] sm:$0xff]  ;;  %vm7723_vm14 = vcmask 910080  }
 0x5d6   :  { %3374 = vst.msk [vmem:[#allocation2 + $0x2f] sm:$0xff] %vm7708_vm13, %v3356_v15  ;;  %3671 = vmatpush.msrb.mxu3 %v3653_v19  ;;  %3560 = vmatpush.msrb.mxu0 %v3494_v59  ;;  %v3728_v15 = vld [vmem:[%s7163_s4 + $0x2c0] sm:$0xff]  ;;  %v3686_v59 = vld [vmem:[%s7163_s4 + $0x238] sm:$0xff]  ;;  %v3607_v19 = vld [vmem:[%s7163_s4 + $0x150] sm:$0xff]  ;;  %vm7724_vm13 = vcmask 917248  }
 0x5d7   :  { %3537 = vmatpush.msrb.mxu2 %v3509_v51  ;;  %3598 = vmatpush.msrb.mxu1 %v3570_v44  ;;  %v3726_v51 = vld [vmem:[%s7163_s4 + $0x2b0] sm:$0xff] }
 0x5d8   :  { %3672 = vmatpush.msrb.mxu3 %v3652_v46  ;;  %3561 = vmatpush.msrb.mxu0 %v3493_v54  ;;  %v3685_v44 = vld [vmem:[%s7163_s4 + $0x230] sm:$0xff]  ;;  %v3724_v54 = vld [vmem:[%s7163_s4 + $0x2a0] sm:$0xff] }
 0x5d9   :  { %3538 = vmatpush.msrb.mxu2 %v3508_v45  ;;  %3599 = vmatpush.msrb.mxu1 %v3569_v1  ;;  %v3725_v45 = vld [vmem:[%s7163_s4 + $0x2a8] sm:$0xff] }
 0x5da   :  { %3562 = vmatpush.msrb.mxu0 %v3492_v18  ;;  %3673 = vmatpush.msrb.mxu3 %v3651_v42 }
 0x5db   :  { %3539 = vmatpush.msrb.mxu2 %v3507_v41  ;;  %3600 = vmatpush.msrb.mxu1 %v3568_v43 }
 0x5dc   :  { %v3384_v12 = vpop.permute.xlu1 %3383  ;;  %3704 = vmatpush.msra.mxu0 %v3698_v56  ;;  %3674 = vmatpush.msrb.mxu3 %v3650_v13 }
 0x5dd   :  { %3402 = vst.msk [vmem:[#allocation2 + $0x28] sm:$0xff] %vm7709_vm12, %v3384_v12  ;;  %v3360_v38 = vpop.permute.xlu2 %3359  ;;  %3626 = vmatpush.msra.mxu2 %v3620_v3  ;;  %3743 = vmatpush.msra.mxu1 %v3737_v49  ;;  %vm7725_vm12 = vmmov %vm7719_vm1 }
 0x5de   :  { %3705 = vmatpush.msra.mxu0 %v3697_v27  ;;  %3675 = vmatpush.msrb.mxu3 %v3649_v9 }
 0x5df   :  { %3627 = vmatpush.msra.mxu2 %v3619_v20  ;;  %3744 = vmatpush.msra.mxu1 %v3736_v17 }
 0x5e0   :  { %3706 = vmatpush.msra.mxu0 %v3696_v29  ;;  %3676 = vmatpush.msrb.mxu3 %v3648_v62 }
 0x5e1   :  { %3628 = vmatpush.msra.mxu2 %v3618_v6  ;;  %3745 = vmatpush.msra.mxu1 %v3735_v11 }
 0x5e2   :  { %3707 = vmatpush.msra.mxu0 %v3695_v31  ;;  %3677 = vmatpush.msrb.mxu3 %v3647_v40 }
 0x5e3   :  { %3629 = vmatpush.msra.mxu2 %v3617_v63  ;;  %3746 = vmatpush.msra.mxu1 %v3734_v34 }
 0x5e4   :  { %v3358_v2 = vpop.permute.xlu1 %3357  ;;  %3708 = vmatpush.msra.mxu0 %v3694_v28  ;;  %3678 = vmatpush.msrb.mxu3 %v3646_v48  ;;  %v3762_v48 = vld [vmem:[%s7166_s7] sm:$0x1] }
 0x5e5   :  { %3375 = vst.msk [vmem:[#allocation2 + $0x37] sm:$0xff] %vm7710_vm0, %v3358_v2  ;;  %v7001_v4 = vpop.permute.xlu2 %3443  ;;  %v3332_v24 = vpop.permute.xlu0 %3331  ;;  %3630 = vmatpush.msra.mxu2 %v3616_v50  ;;  %3747 = vmatpush.msra.mxu1 %v3733_v52  ;;  %vm7726_vm0 = vcmask 916480  }
 0x5e6   :  { %3403 = vst.msk [vmem:[#allocation2 + $0x30] sm:$0xff] %vm7711_vm7, %v6856_v35  ;;  %3709 = vmatpush.msra.mxu0 %v3693_v36  ;;  %v3613_v35 = vld [vmem:[%s7163_s4 + $0x180] sm:$0xff]  ;;  %vm7727_vm7 = vmmov %vm7726_vm0 }
 0x5e7   :  { %3431 = vst.msk [vmem:[#allocation2 + $0x29] sm:$0xff] %vm7712_vm8, %v6912_v60  ;;  %3631 = vmatpush.msra.mxu2 %v3615_v14  ;;  %3748 = vmatpush.msra.mxu1 %v3732_v23  ;;  %v3609_v60 = vld [vmem:[%s7163_s4 + $0x160] sm:$0xff]  ;;  %vm7728_vm8 = vmmov %vm7726_vm0 }
 0x5e8   :  { %3348 = vst.msk [vmem:[#allocation2 + $0x46] sm:$0xff] %vm7713_vm3, %v3332_v24  ;;  %3710 = vmatpush.msra.mxu0 %v3692_v47  ;;  %vm7729_vm3 = vmmov %vm7726_vm0 }
 0x5e9   :  { %3376 = vst.msk [vmem:[#allocation2 + $0x3f] sm:$0xff] %vm7714_vm15, %v3360_v38  ;;  %3632 = vmatpush.msra.mxu2 %v3614_v10  ;;  %3749 = vmatpush.msra.mxu1 %v3731_v53  ;;  %vm7730_vm15 = vmmov %vm7719_vm1 }
 0x5ea   :  { %3711 = vmatpush.msra.mxu0 %v3691_v0 }
 0x5eb   :  { %3633 = vmatpush.msra.mxu2 %v3613_v35  ;;  %3750 = vmatpush.msra.mxu1 %v3730_v5 }
 0x5ec   :  { %v3334_v26 = vpop.permute.xlu1 %3333  ;;  %3712 = vmatpush.msra.mxu0 %v3690_v37 }
 0x5ed   :  { %v3388_v7 = vpop.permute.xlu0 %3387  ;;  %v7054_v21 = vpop.permute.xlu2 %3475  ;;  %3634 = vmatpush.msra.mxu2 %v3612_v33  ;;  %3751 = vmatpush.msra.mxu1 %v3729_v8 }
 0x5ee   :  { %3404 = vst.msk [vmem:[#allocation2 + $0x38] sm:$0xff] %vm7715_vm4, %v3388_v7  ;;  %3713 = vmatpush.msra.mxu0 %v3689_v16  ;;  %vm7731_vm4 = vmmov %vm7716_vm2 }
 0x5ef   :  { %3635 = vmatpush.msra.mxu2 %v3611_v32  ;;  %3752 = vmatpush.msra.mxu1 %v3728_v15 }
 0x5f0   :  { %3714 = vmatpush.msra.mxu0 %v3688_v25 }
 0x5f1   :  { %3636 = vmatpush.msra.mxu2 %v3610_v22  ;;  %3753 = vmatpush.msra.mxu1 %v3727_v55 }
 0x5f2   :  { %3715 = vmatpush.msra.mxu0 %v3687_v39 }
 0x5f3   :  { %3637 = vmatpush.msra.mxu2 %v3609_v60  ;;  %3754 = vmatpush.msra.mxu1 %v3726_v51 }
 0x5f4   :  { %v3390_v30 = vpop.permute.xlu1 %3389  ;;  %3716 = vmatpush.msra.mxu0 %v3686_v59 }
 0x5f5   :  { %v3416_v61 = vpop.permute.xlu0 %3415  ;;  %v2613_v58 = vpop.permute.xlu2 %2612  ;;  %3638 = vmatpush.msra.mxu2 %v3608_v57  ;;  %3755 = vmatpush.msra.mxu1 %v3725_v45 }
 0x5f6   :  { %3432 = vst.msk [vmem:[#allocation2 + $0x31] sm:$0xff] %vm7716_vm2, %v3416_v61  ;;  %3717 = vmatpush.msra.mxu0 %v3685_v44  ;;  %vm7732_vm2 = vmmov %vm7726_vm0 }
 0x5f7   :  { %3460 = vst.msk [vmem:[#allocation2 + $0x2a] sm:$0xff] %vm7717_vm5, %v7001_v4  ;;  %3639 = vmatpush.msra.mxu2 %v3607_v19  ;;  %3756 = vmatpush.msra.mxu1 %v3724_v54  ;;  %vm7733_vm5 = vmmov %vm7726_vm0 }
 0x5fc   :  { %v3418_v41 = vpop.permute.xlu1 %3417 }
 0x5fd   :  { %v3362_v46 = vpop.permute.xlu0 %3361  ;;  %v3352_v12 = vpop.permute.xlu2 %3351 }
 0x5fe   :  { %3377 = vst.msk [vmem:[#allocation2 + $0x47] sm:$0xff] %vm7718_vm9, %v3362_v46  ;;  %vm7734_vm9 = vmmov %vm7726_vm0 }
 0x5ff   :  { %3405 = vst.msk [vmem:[#allocation2 + $0x40] sm:$0xff] %vm7719_vm1, %v3390_v30  ;;  %vm7735_vm1 = vmmov %vm7731_vm4 }
 0x600   :  { %3433 = vst.msk [vmem:[#allocation2 + $0x39] sm:$0xff] %vm7720_vm10, %v3418_v41  ;;  %vm7736_vm10 = vmmov %vm7735_vm1 }
 0x601   :  { %3372 = vst.msk [vmem:[#allocation2 + $0x1f] sm:$0xff] %vm7721_vm6, %v3352_v12  ;;  %vm7737_vm6 = vmmov %vm7722_vm11 }
 0x604   :  { %v3474_v1 = vpop.permute.xlu1 %3473 }
 0x605   :  { %v3446_v3 = vpop.permute.xlu0 %3445  ;;  %v3382_v38 = vpop.permute.xlu2 %3381 }
 0x606   :  { %3461 = vst.msk [vmem:[#allocation2 + $0x32] sm:$0xff] %vm7722_vm11, %v3446_v3  ;;  %vm7738_vm11 = vmmov %vm7737_vm6 }
 0x607   :  { %3490 = vst.msk [vmem:[#allocation2 + $0x33] sm:$0x1] %vm7723_vm14, %v7054_v21  ;;  %vm7739_vm14 = vcmask 647680  }
 0x608   :  { %3489 = vst.msk [vmem:[#allocation2 + $0x2b] sm:$0xff] %vm7724_vm13, %v3474_v1  ;;  %vm7740_vm13 = vmmov %vm7737_vm6 }
 0x609   :  { %3401 = vst.msk [vmem:[#allocation2 + $0x20] sm:$0xff] %vm7725_vm12, %v3382_v38  ;;  %vm7741_vm12 = vcmask 917248  }
 0x60c   :  { %v2585_v18 = vpop.permute.xlu1 %2584 }
 0x60d   :  { %v1776_v43 = vpop.permute.xlu0 %1775  ;;  %v3410_v56 = vpop.permute.xlu2 %3409 }
 0x60e   :  { %v3723_v2 = vld [vmem:[#allocation2 + $0x33] sm:$0x1] }
 0x60f   :  { %v3506_v49 = vld [vmem:[#allocation2 + $0x2e] sm:$0x1]  ;;  %v3491_v20 = vld [vmem:[#allocation2 + $0x2d] sm:$0x1]  ;;  %v3567_v27 = vld [vmem:[#allocation2 + $0x2f] sm:$0x1] }
 0x610   :  { %3929 = vmatmul.msk.f32.vlgmr.msrb.gmra.mxu2 %vm7726_vm0, %v3506_v49  ;;  %3930 = vmatmul.msk.f32.vlgmr.msrb.gmra.mxu0 %vm7727_vm7, %v3491_v20  ;;  %v3645_v17 = vld [vmem:[#allocation2 + $0x31] sm:$0x1]  ;;  %v3606_v42 = vld [vmem:[#allocation2 + $0x30] sm:$0x1]  ;;  %v3684_v63 = vld [vmem:[#allocation2 + $0x32] sm:$0x1] }
 0x611   :  { %3931 = vmatmul.msk.f32.vlgmr.msrb.gmra.mxu1 %vm7728_vm8, %v3567_v27  ;;  %3933 = vmatmul.msk.f32.vlgmr.msrb.gmra.mxu3 %vm7729_vm3, %v3645_v17  ;;  %vm7742_vm0 = vcmask 516480   ;;  %vm7743_vm7 = vcmask 778880   ;;  %vm7744_vm8 = vmmov %vm7741_vm12 }
 0x612   :  { %vm7745_vm3 = vmmov %vm7744_vm8 }
 0x614   :  { %v3380_v6 = vpop.permute.xlu1 %3379 }
 0x615   :  { %v2615_v29 = vpop.permute.xlu0 %2614  ;;  %3400 = vst.msk [vmem:[#allocation2 + $0x18] sm:$0xff] %vm7730_vm15, %v3380_v6  ;;  %v3438_v11 = vpop.permute.xlu2 %3437  ;;  %vm7746_vm15 = vcmask 122880  }
 0x616   :  { %3429 = vst.msk [vmem:[#allocation2 + $0x19] sm:$0xff] %vm7731_vm4, %v3410_v56 }
 0x618   :  { %3932 = vmatmul.msk.f32.vlgmr.msra.gmra.mxu2 %vm7732_vm2, %v3606_v42  ;;  %3934 = vmatmul.msk.f32.vlgmr.msra.gmra.mxu0 %vm7733_vm5, %v3684_v63 }
 0x619   :  { %3935 = vmatmul.msk.f32.vlgmr.msra.gmra.mxu1 %vm7734_vm9, %v3723_v2 }
 0x61c   :  { %v3408_v31 = vpop.permute.xlu1 %3407 }
 0x61d   :  { %v3412_v4 = vpop.permute.xlu0 %3411  ;;  %3428 = vst.msk [vmem:[#allocation2 + $0x11] sm:$0xff] %vm7735_vm1, %v3408_v31  ;;  %v3466_v24 = vpop.permute.xlu2 %3465 }
 0x61e   :  { %3430 = vst.msk [vmem:[#allocation2 + $0x21] sm:$0xff] %vm7736_vm10, %v3412_v4 }
 0x61f   :  { %3457 = vst.msk [vmem:[#allocation2 + $0x12] sm:$0xff] %vm7737_vm6, %v3438_v11 }
 0x624   :  { %v3436_v34 = vpop.permute.xlu1 %3435 }
 0x625   :  { %v3440_v50 = vpop.permute.xlu0 %3439  ;;  %v3420_v13 = vpop.permute.xlu2 %3419 }
 0x626   :  { %3458 = vst.msk [vmem:[#allocation2 + $0x1a] sm:$0xff] %vm7738_vm11, %v3440_v50 }
 0x627   :  { %3434 = vst.msk [vmem:[#allocation2 + $0x41] sm:$0x1] %vm7739_vm14, %v3420_v13 }
 0x62c   :  { %v3442_v28 = vpop.permute.xlu1 %3441 }
 0x62d   :  { %3459 = vst.msk [vmem:[#allocation2 + $0x22] sm:$0xff] %vm7740_vm13, %v3442_v28  ;;  %v3364_v52 = vpop.permute.xlu0 %3363  ;;  %v3472_v14 = vpop.permute.xlu2 %3471 }
 0x62e   :  { %3488 = vst.msk [vmem:[#allocation2 + $0x23] sm:$0xff] %vm7741_vm12, %v3472_v14 }
 0x634   :  { %v3464_v36 = vpop.permute.xlu1 %3463 }
 0x635   :  { %v3392_v23 = vpop.permute.xlu0 %3391 }
 0x636   :  { %3406 = vst.msk [vmem:[#allocation2 + $0x48] sm:$0x1] %vm7742_vm0, %v3392_v23 }
 0x63c   :  { %v3336_v10 = vpop.permute.xlu1 %3335 }
 0x63d   :  { %v3448_v9 = vpop.permute.xlu0 %3447 }
 0x63e   :  { %3462 = vst.msk [vmem:[#allocation2 + $0x3a] sm:$0x1] %vm7743_vm7, %v3448_v9 }
 0x644   :  { %v3470_v47 = vpop.permute.xlu1 %3469 }
 0x645   :  { %v3468_v53 = vpop.permute.xlu0 %3467  ;;  %3487 = vst.msk [vmem:[#allocation2 + $0x1b] sm:$0xff] %vm7744_vm8, %v3470_v47 }
 0x646   :  { %3486 = vst.msk [vmem:[#allocation2 + $0x13] sm:$0xff] %vm7745_vm3, %v3468_v53 }
 0x68d   :  { %v3564_v62 = vpop.f32.mrf.mxu0 }
 0x68e   :  { %v3602_v0 = vpop.f32.mrf.mxu1 }
 0x693   :  { %v3541_v35 = vpop.f32.mrf.mxu2 }
 0x694   :  { %v3565_v26 = vadd.f32 %v3564_v62, %v3541_v35  ;;  %v3680_v33 = vpop.f32.mrf.mxu3 }
 0x695   :  { %v3719_v37 = vpop.f32.mrf.mxu0 }
 0x696   :  { %v3605_v7 = vadd.f32 %v3602_v0, %v3565_v26  ;;  %v3758_v32 = vpop.f32.mrf.mxu1 }
 0x69b   :  { %v3641_v21 = vpop.f32.mrf.mxu2 }
 0x69c   :  { %v3644_v5 = vadd.f32 %v3641_v21, %v3605_v7 }
 0x69e   :  { %v3683_v40 = vadd.f32 %v3680_v33, %v3644_v5 }
 0x6a0   :  { %v3722_v8 = vadd.f32 %v3719_v37, %v3683_v40 }
 0x6a2   :  { %v3761_v16 = vadd.f32 %v3758_v32, %v3722_v8 }
 0x6a4   :  { %v3763_v15 = vadd.f32 %v3762_v48, %v3761_v16 }
 0x6a6   :  { %3764 = vst.msk [vmem:[#allocation3] sm:$0x1] %vm7746_vm15, %v3763_v15 }
 0x6a7   :  { %3775 = dma.vmem_to_hbm [thread:$0]  %s3771_s15, 16, %s3773_s16, [#allocation4]  }
 0x6a8   :  { %3972 = dma.done.wait [#allocation4], 16  }
 0x6a9   :  { %3973 = vsyncadd [#allocation4], 4294967280 }
 0x6aa   :  { %3780 = vsyncpa [#allocation4], 1 }

</bundles_post_ra>
